<compile_context>
chip_gen: v7x
topology: tpu7x:2x2x1
jax: 0.10.0
libtpu: 0.0.40
codegen_flags: <defaults>
</compile_context>

<pallas_src>
import jax
import jax.numpy as jnp
from jax.experimental import pallas as pl
from jax.experimental.pallas import tpu as pltpu


def _downsample_kernel(x_ref, w1_ref, b1_ref, w2_ref, b2_ref,
                       x1_ref, pool_ref, xpad_ref, y1p_ref, rowmax_ref):
    G, H, W, Cin = x_ref.shape
    Hp, Wp = H + 2, W + 2
    Cmid = w1_ref.shape[1]
    Cout = w2_ref.shape[1]
    sdt = xpad_ref.dtype          # matmul / staging dtype (f32 or bf16)
    M = G * H * W

    def stage_padded(dst_ref, val, c):
        """Write val (G,H,W,c) into dst_ref (G,Hp,Wp,c) with a 1-px zero halo.

        Only the halo ring is (re)zeroed every step -> safe with a parallel
        batch axis on megacore; the interior is one contiguous store.
        """
        dst_ref[:, 0:1, :, :] = jnp.zeros((G, 1, Wp, c), sdt)
        dst_ref[:, H + 1:H + 2, :, :] = jnp.zeros((G, 1, Wp, c), sdt)
        dst_ref[:, 1:H + 1, 0:1, :] = jnp.zeros((G, H, 1, c), sdt)
        dst_ref[:, 1:H + 1, W + 1:W + 2, :] = jnp.zeros((G, H, 1, c), sdt)
        dst_ref[:, 1:H + 1, 1:W + 1, :] = val.astype(sdt)

    def conv3x3_relu(src_ref, w_ref, b_ref, cin):
        """3x3 / pad=1 conv + bias + ReLU from a padded ref; returns (M, cout) f32."""
        if 9 * cin <= 256:
            # Tiny-C: fuse all taps along K -> ONE (M, 9*cin) x (9*cin, cout) matmul.
            taps = [src_ref[:, ky:ky + H, kx:kx + W, :].reshape(M, cin)
                    for ky in range(3) for kx in range(3)]
            acc = jnp.dot(jnp.concatenate(taps, axis=-1), w_ref[...],
                          preferred_element_type=jnp.float32)
        else:
            # Large-C: K=cin already fills the MXU contraction; 9 accumulating
            # matmuls, no 9x patch materialization / lane concatenate.
            acc = jnp.zeros((M, w_ref.shape[1]), jnp.float32)
            for t in range(9):
                ky, kx = t // 3, t % 3
                tap = src_ref[:, ky:ky + H, kx:kx + W, :].reshape(M, cin)
                acc = acc + jnp.dot(tap, w_ref[t * cin:(t + 1) * cin, :],
                                    preferred_element_type=jnp.float32)
        return jnp.maximum(acc + b_ref[...], 0.0)           # f32 epilogue

    # ---- stage the (unpadded) input block with the conv1 halo (pad folded in).
    stage_padded(xpad_ref, x_ref[...], Cin)

    # ---- conv1 + ReLU, stage its output with the conv2 halo.
    y1 = conv3x3_relu(xpad_ref, w1_ref, b1_ref, Cin)         # (M, Cmid) f32
    stage_padded(y1p_ref, y1.reshape(G, H, W, Cmid), Cmid)

    # ---- conv2 + ReLU; store x1 immediately so the output DMA can drain.
    y2 = conv3x3_relu(y1p_ref, w2_ref, b2_ref, Cmid)         # (M, Cout) f32
    y2g = y2.reshape(G, H, W, Cout)
    x1_ref[...] = y2g.astype(x1_ref.dtype)

    # ---- 2x2 / stride-2 max pool WITHOUT reading the x1 output block back:
    # H pairs from the in-register value (major-dim split, layout-free),
    # W pairs via strided reads of a tiny f32 scratch (proven pattern).
    rows = y2g.reshape(G * (H // 2), 2, W, Cout)
    rowmax_ref[...] = jnp.maximum(rows[:, 0, :, :], rows[:, 1, :, :])
    colmax = jnp.maximum(rowmax_ref[:, pl.ds(0, W // 2, stride=2), :],
                         rowmax_ref[:, pl.ds(1, W // 2, stride=2), :])
    pool_ref[...] = colmax.reshape(G, H // 2, W // 2, Cout).astype(pool_ref.dtype)


def downsample_forward_nhwc(x_nhwc, w1, b1, w2, b2, *, batch_block=1,
                            compute_dtype=jnp.float32, vmem_limit_bytes=None):
    """x_nhwc: (B, H, W, Cin); weights in PyTorch OIHW layout.
    Returns (x1, pooled) in NHWC, f32."""
    B, H, W, Cin = x_nhwc.shape
    Cmid, Cout = w1.shape[0], w2.shape[0]
    assert w1.shape[1] == Cin and w2.shape[1] == Cmid
    assert H % 2 == 0 and W % 2 == 0
    assert B % batch_block == 0
    G = batch_block

    # Glue: tap-major im2col weight layout (same layout serves both the fused
    # single-matmul path and the 9-accumulating-dot path).
    w1t = jnp.transpose(w1, (2, 3, 1, 0)).reshape(9 * Cin, Cmid).astype(compute_dtype)
    w2t = jnp.transpose(w2, (2, 3, 1, 0)).reshape(9 * Cmid, Cout).astype(compute_dtype)
    b1r = b1.reshape(1, Cmid).astype(jnp.float32)
    b2r = b2.reshape(1, Cout).astype(jnp.float32)

    x1, pooled = pl.pallas_call(
        _downsample_kernel,
        out_shape=(
            jax.ShapeDtypeStruct((B, H, W, Cout), jnp.float32),
            jax.ShapeDtypeStruct((B, H // 2, W // 2, Cout), jnp.float32),
        ),
        grid=(B // G,),
        in_specs=[
            pl.BlockSpec((G, H, W, Cin), lambda b: (b, 0, 0, 0)),   # unpadded input
            pl.BlockSpec((9 * Cin, Cmid), lambda b: (0, 0)),
            pl.BlockSpec((1, Cmid), lambda b: (0, 0)),
            pl.BlockSpec((9 * Cmid, Cout), lambda b: (0, 0)),
            pl.BlockSpec((1, Cout), lambda b: (0, 0)),
        ],
        out_specs=(
            pl.BlockSpec((G, H, W, Cout), lambda b: (b, 0, 0, 0)),
            pl.BlockSpec((G, H // 2, W // 2, Cout), lambda b: (b, 0, 0, 0)),
        ),
        scratch_shapes=[
            pltpu.VMEM((G, H + 2, W + 2, Cin), compute_dtype),   # padded input
            pltpu.VMEM((G, H + 2, W + 2, Cmid), compute_dtype),  # padded conv1 out
            pltpu.VMEM((G * (H // 2), W, Cout), jnp.float32),    # H-maxed rows (pool)
        ],
        compiler_params=pltpu.CompilerParams(
            dimension_semantics=("parallel",),      # batch steps are independent
            vmem_limit_bytes=vmem_limit_bytes),
    )(x_nhwc, w1t, b1r, w2t, b2r)
    return x1, pooled


def downsample_forward(x_nchw, w1, b1, w2, b2, *, batch_block=1,
                       compute_dtype=jnp.float32, vmem_limit_bytes=None):
    """PyTorch-style NCHW interface matching DownSample.forward."""
    x_nhwc = jnp.transpose(x_nchw, (0, 2, 3, 1))
    x1, pooled = downsample_forward_nhwc(x_nhwc, w1, b1, w2, b2,
                                         batch_block=batch_block,
                                         compute_dtype=compute_dtype,
                                         vmem_limit_bytes=vmem_limit_bytes)
    return (jnp.transpose(x1, (0, 3, 1, 2)),
            jnp.transpose(pooled, (0, 3, 1, 2)))


def _reference(x_nchw, w1, b1, w2, b2, cast_dtype=None):
    """Pure-XLA reference.  cast_dtype=jnp.bfloat16 emulates the kernel's bf16
    staging/quantization points (f32 accumulation) for a tighter bf16 check."""
    def q(a):
        return a.astype(cast_dtype).astype(jnp.float32) if cast_dtype is not None else a
    dn = jax.lax.conv_dimension_numbers(x_nchw.shape, w1.shape,
                                        ("NCHW", "OIHW", "NCHW"))
    y = jax.lax.conv_general_dilated(q(x_nchw), q(w1), (1, 1), ((1, 1), (1, 1)),
                                     dimension_numbers=dn)
    y = jax.nn.relu(y + b1[None, :, None, None])
    y = jax.lax.conv_general_dilated(q(y), q(w2), (1, 1), ((1, 1), (1, 1)),
                                     dimension_numbers=dn)
    x1 = jax.nn.relu(y + b2[None, :, None, None])
    pooled = jax.lax.reduce_window(x1, -jnp.inf, jax.lax.max,
                                   (1, 1, 2, 2), (1, 1, 2, 2), "VALID")
    return x1, pooled


if __name__ == "__main__":
    B, Cin, Cout, H, W = 2, 4, 8, 16, 16

    key = jax.random.PRNGKey(0)
    kx_, k1, kb1, k2, kb2 = jax.random.split(key, 5)
    x = jax.random.normal(kx_, (B, Cin, H, W), dtype=jnp.float32)
    # Deterministic synthetic parameters (PyTorch OIHW conv layout).
    w1 = jax.random.normal(k1, (Cout, Cin, 3, 3), dtype=jnp.float32) * 0.1
    b1 = jax.random.normal(kb1, (Cout,), dtype=jnp.float32) * 0.1
    w2 = jax.random.normal(k2, (Cout, Cout, 3, 3), dtype=jnp.float32) * 0.1
    b2 = jax.random.normal(kb2, (Cout,), dtype=jnp.float32) * 0.1

    x1_ref_np, pooled_ref_np = _reference(x, w1, b1, w2, b2)

    # f32 path, one image per grid step (batch axis parallel across cores).
    x1, pooled = downsample_forward(x, w1, b1, w2, b2,
                                    batch_block=1, compute_dtype=jnp.float32)
    jax.block_until_ready((x1, pooled))
    assert x1.shape == (B, Cout, H, W)
    assert pooled.shape == (B, Cout, H // 2, W // 2)
    assert jnp.allclose(x1, x1_ref_np, atol=1e-4, rtol=1e-4)
    assert jnp.allclose(pooled, pooled_ref_np, atol=1e-4, rtol=1e-4)

    # bf16 matmul path (f32 accumulation), both images fused into one step.
    x1b, pooledb = downsample_forward(x, w1, b1, w2, b2,
                                      batch_block=2, compute_dtype=jnp.bfloat16)
    jax.block_until_ready((x1b, pooledb))
    assert x1b.shape == (B, Cout, H, W)
    assert pooledb.shape == (B, Cout, H // 2, W // 2)
    # Loose check vs the f32 reference (bf16 rounding), plus a tighter check
    # vs a reference quantized through bf16 at the same points as the kernel
    # (validates layout/indexing independent of bf16 rounding error).
    assert jnp.allclose(x1b, x1_ref_np, atol=1e-1, rtol=5e-2)
    assert jnp.allclose(pooledb, pooled_ref_np, atol=1e-1, rtol=5e-2)
    x1_refb, pooled_refb = _reference(x, w1, b1, w2, b2, cast_dtype=jnp.bfloat16)
    assert jnp.allclose(x1b, x1_refb, atol=1e-2, rtol=1e-2)
    assert jnp.allclose(pooledb, pooled_refb, atol=1e-2, rtol=1e-2)

    print("KERNEL_OK")
</pallas_src>

<mosaic_0001>
module attributes {stable_mosaic.version = 11 : i64} {
  func.func @_downsample_kernel(%arg0: i32, %arg1: memref<1x16x16x4xf32, #tpu.memory_space<vmem>>, %arg2: memref<36x8xf32, #tpu.memory_space<vmem>>, %arg3: memref<1x8xf32, #tpu.memory_space<vmem>>, %arg4: memref<72x8xf32, #tpu.memory_space<vmem>>, %arg5: memref<1x8xf32, #tpu.memory_space<vmem>>, %arg6: memref<1x16x16x8xf32, #tpu.memory_space<vmem>>, %arg7: memref<1x8x8x8xf32, #tpu.memory_space<vmem>>, %arg8: memref<1x18x18x4xf32, #tpu.memory_space<vmem>>, %arg9: memref<1x18x18x8xf32, #tpu.memory_space<vmem>>, %arg10: memref<8x16x8xf32, #tpu.memory_space<vmem>>) attributes {dimension_semantics = [#tpu.dimension_semantics<parallel>], iteration_bounds = array<i64: 2>, scalar_prefetch = 0 : i64, scratch_operands = 3 : i64, tpu.core_type = #tpu.core_type<tc>, window_params = [{transform_indices = @transform_0, window_bounds = array<i64: 1, 16, 16, 4>}, {pipeline_mode = #tpu.pipeline_mode<synchronous>, transform_indices = @transform_1, window_bounds = array<i64: 36, 8>}, {pipeline_mode = #tpu.pipeline_mode<synchronous>, transform_indices = @transform_2, window_bounds = array<i64: 1, 8>}, {pipeline_mode = #tpu.pipeline_mode<synchronous>, transform_indices = @transform_3, window_bounds = array<i64: 72, 8>}, {pipeline_mode = #tpu.pipeline_mode<synchronous>, transform_indices = @transform_4, window_bounds = array<i64: 1, 8>}, {transform_indices = @transform_5, window_bounds = array<i64: 1, 16, 16, 8>}, {transform_indices = @transform_6, window_bounds = array<i64: 1, 8, 8, 8>}]} {
    %c0 = arith.constant 0 : index
    %c0_0 = arith.constant 0 : index
    %c0_1 = arith.constant 0 : index
    %c0_2 = arith.constant 0 : index
    %0 = vector.load %arg1[%c0, %c0_0, %c0_1, %c0_2] : memref<1x16x16x4xf32, #tpu.memory_space<vmem>>, vector<1x16x16x4xf32>
    %cst = arith.constant 0.000000e+00 : f32
    %1 = vector.broadcast %cst : f32 to vector<1x1x18x4xf32>
    %c0_3 = arith.constant 0 : index
    %c0_4 = arith.constant 0 : index
    %c0_5 = arith.constant 0 : index
    %c0_6 = arith.constant 0 : index
    %2 = vector.load %arg8[%c0_3, %c0_4, %c0_5, %c0_6] : memref<1x18x18x4xf32, #tpu.memory_space<vmem>>, vector<1x1x18x4xf32>
    tpu.vector_store %arg8[%c0_3, %c0_4, %c0_5, %c0_6], %1 {strides = array<i32>} : memref<1x18x18x4xf32, #tpu.memory_space<vmem>>, vector<1x1x18x4xf32>,
    %cst_7 = arith.constant 0.000000e+00 : f32
    %3 = vector.broadcast %cst_7 : f32 to vector<1x1x18x4xf32>
    %c0_8 = arith.constant 0 : index
    %c17 = arith.constant 17 : index
    %c0_9 = arith.constant 0 : index
    %c0_10 = arith.constant 0 : index
    %4 = vector.load %arg8[%c0_8, %c17, %c0_9, %c0_10] : memref<1x18x18x4xf32, #tpu.memory_space<vmem>>, vector<1x1x18x4xf32>
    tpu.vector_store %arg8[%c0_8, %c17, %c0_9, %c0_10], %3 {strides = array<i32>} : memref<1x18x18x4xf32, #tpu.memory_space<vmem>>, vector<1x1x18x4xf32>,
    %cst_11 = arith.constant 0.000000e+00 : f32
    %5 = vector.broadcast %cst_11 : f32 to vector<1x16x1x4xf32>
    %c0_12 = arith.constant 0 : index
    %c1 = arith.constant 1 : index
    %c0_13 = arith.constant 0 : index
    %c0_14 = arith.constant 0 : index
    %6 = vector.load %arg8[%c0_12, %c1, %c0_13, %c0_14] : memref<1x18x18x4xf32, #tpu.memory_space<vmem>>, vector<1x16x1x4xf32>
    tpu.vector_store %arg8[%c0_12, %c1, %c0_13, %c0_14], %5 {strides = array<i32>} : memref<1x18x18x4xf32, #tpu.memory_space<vmem>>, vector<1x16x1x4xf32>,
    %cst_15 = arith.constant 0.000000e+00 : f32
    %7 = vector.broadcast %cst_15 : f32 to vector<1x16x1x4xf32>
    %c0_16 = arith.constant 0 : index
    %c1_17 = arith.constant 1 : index
    %c17_18 = arith.constant 17 : index
    %c0_19 = arith.constant 0 : index
    %8 = vector.load %arg8[%c0_16, %c1_17, %c17_18, %c0_19] : memref<1x18x18x4xf32, #tpu.memory_space<vmem>>, vector<1x16x1x4xf32>
    tpu.vector_store %arg8[%c0_16, %c1_17, %c17_18, %c0_19], %7 {strides = array<i32>} : memref<1x18x18x4xf32, #tpu.memory_space<vmem>>, vector<1x16x1x4xf32>,
    %c0_20 = arith.constant 0 : index
    %c1_21 = arith.constant 1 : index
    %c1_22 = arith.constant 1 : index
    %c0_23 = arith.constant 0 : index
    %9 = vector.load %arg8[%c0_20, %c1_21, %c1_22, %c0_23] : memref<1x18x18x4xf32, #tpu.memory_space<vmem>>, vector<1x16x16x4xf32>
    tpu.vector_store %arg8[%c0_20, %c1_21, %c1_22, %c0_23], %0 {strides = array<i32>} : memref<1x18x18x4xf32, #tpu.memory_space<vmem>>, vector<1x16x16x4xf32>,
    %c0_24 = arith.constant 0 : index
    %c0_25 = arith.constant 0 : index
    %c0_26 = arith.constant 0 : index
    %c0_27 = arith.constant 0 : index
    %10 = vector.load %arg8[%c0_24, %c0_25, %c0_26, %c0_27] : memref<1x18x18x4xf32, #tpu.memory_space<vmem>>, vector<1x16x16x4xf32>
    %11 = vector.shape_cast %10 : vector<1x16x16x4xf32> to vector<256x4xf32>
    %c0_28 = arith.constant 0 : index
    %c0_29 = arith.constant 0 : index
    %c1_30 = arith.constant 1 : index
    %c0_31 = arith.constant 0 : index
    %12 = vector.load %arg8[%c0_28, %c0_29, %c1_30, %c0_31] : memref<1x18x18x4xf32, #tpu.memory_space<vmem>>, vector<1x16x16x4xf32>
    %13 = vector.shape_cast %12 : vector<1x16x16x4xf32> to vector<256x4xf32>
    %c0_32 = arith.constant 0 : index
    %c0_33 = arith.constant 0 : index
    %c2 = arith.constant 2 : index
    %c0_34 = arith.constant 0 : index
    %14 = vector.load %arg8[%c0_32, %c0_33, %c2, %c0_34] : memref<1x18x18x4xf32, #tpu.memory_space<vmem>>, vector<1x16x16x4xf32>
    %15 = vector.shape_cast %14 : vector<1x16x16x4xf32> to vector<256x4xf32>
    %c0_35 = arith.constant 0 : index
    %c1_36 = arith.constant 1 : index
    %c0_37 = arith.constant 0 : index
    %c0_38 = arith.constant 0 : index
    %16 = vector.load %arg8[%c0_35, %c1_36, %c0_37, %c0_38] : memref<1x18x18x4xf32, #tpu.memory_space<vmem>>, vector<1x16x16x4xf32>
    %17 = vector.shape_cast %16 : vector<1x16x16x4xf32> to vector<256x4xf32>
    %c0_39 = arith.constant 0 : index
    %c1_40 = arith.constant 1 : index
    %c1_41 = arith.constant 1 : index
    %c0_42 = arith.constant 0 : index
    %18 = vector.load %arg8[%c0_39, %c1_40, %c1_41, %c0_42] : memref<1x18x18x4xf32, #tpu.memory_space<vmem>>, vector<1x16x16x4xf32>
    %19 = vector.shape_cast %18 : vector<1x16x16x4xf32> to vector<256x4xf32>
    %c0_43 = arith.constant 0 : index
    %c1_44 = arith.constant 1 : index
    %c2_45 = arith.constant 2 : index
    %c0_46 = arith.constant 0 : index
    %20 = vector.load %arg8[%c0_43, %c1_44, %c2_45, %c0_46] : memref<1x18x18x4xf32, #tpu.memory_space<vmem>>, vector<1x16x16x4xf32>
    %21 = vector.shape_cast %20 : vector<1x16x16x4xf32> to vector<256x4xf32>
    %c0_47 = arith.constant 0 : index
    %c2_48 = arith.constant 2 : index
    %c0_49 = arith.constant 0 : index
    %c0_50 = arith.constant 0 : index
    %22 = vector.load %arg8[%c0_47, %c2_48, %c0_49, %c0_50] : memref<1x18x18x4xf32, #tpu.memory_space<vmem>>, vector<1x16x16x4xf32>
    %23 = vector.shape_cast %22 : vector<1x16x16x4xf32> to vector<256x4xf32>
    %c0_51 = arith.constant 0 : index
    %c2_52 = arith.constant 2 : index
    %c1_53 = arith.constant 1 : index
    %c0_54 = arith.constant 0 : index
    %24 = vector.load %arg8[%c0_51, %c2_52, %c1_53, %c0_54] : memref<1x18x18x4xf32, #tpu.memory_space<vmem>>, vector<1x16x16x4xf32>
    %25 = vector.shape_cast %24 : vector<1x16x16x4xf32> to vector<256x4xf32>
    %c0_55 = arith.constant 0 : index
    %c2_56 = arith.constant 2 : index
    %c2_57 = arith.constant 2 : index
    %c0_58 = arith.constant 0 : index
    %26 = vector.load %arg8[%c0_55, %c2_56, %c2_57, %c0_58] : memref<1x18x18x4xf32, #tpu.memory_space<vmem>>, vector<1x16x16x4xf32>
    %27 = vector.shape_cast %26 : vector<1x16x16x4xf32> to vector<256x4xf32>
    %28 = tpu.concatenate %11, %13, %15, %17, %19, %21, %23, %25, %27 in 1 : vector<256x4xf32>, vector<256x4xf32>, vector<256x4xf32>, vector<256x4xf32>, vector<256x4xf32>, vector<256x4xf32>, vector<256x4xf32>, vector<256x4xf32>, vector<256x4xf32> -> vector<256x36xf32>
    %c0_59 = arith.constant 0 : index
    %c0_60 = arith.constant 0 : index
    %29 = vector.load %arg2[%c0_59, %c0_60] : memref<36x8xf32, #tpu.memory_space<vmem>>, vector<36x8xf32>
    %cst_61 = arith.constant dense<0.000000e+00> : vector<256x8xf32>
    %30 = tpu.matmul %28, %29, %cst_61 {dimension_numbers = #tpu.dot_dimension_numbers<[1], [0], [0], [1], [0, 0, 1, 1], [], []>} : vector<256x36xf32>, vector<36x8xf32>, vector<256x8xf32> -> vector<256x8xf32>
    %c0_62 = arith.constant 0 : index
    %c0_63 = arith.constant 0 : index
    %31 = vector.load %arg3[%c0_62, %c0_63] : memref<1x8xf32, #tpu.memory_space<vmem>>, vector<1x8xf32>
    %32 = vector.broadcast %31 : vector<1x8xf32> to vector<256x8xf32>
    %33 = arith.addf %30, %32 : vector<256x8xf32>
    %cst_64 = arith.constant 0.000000e+00 : f32
    %34 = vector.broadcast %cst_64 : f32 to vector<256x8xf32>
    %35 = arith.maximumf %33, %34 : vector<256x8xf32>
    %36 = vector.shape_cast %35 : vector<256x8xf32> to vector<1x16x16x8xf32>
    %cst_65 = arith.constant 0.000000e+00 : f32
    %37 = vector.broadcast %cst_65 : f32 to vector<1x1x18x8xf32>
    %c0_66 = arith.constant 0 : index
    %c0_67 = arith.constant 0 : index
    %c0_68 = arith.constant 0 : index
    %c0_69 = arith.constant 0 : index
    %38 = vector.load %arg9[%c0_66, %c0_67, %c0_68, %c0_69] : memref<1x18x18x8xf32, #tpu.memory_space<vmem>>, vector<1x1x18x8xf32>
    tpu.vector_store %arg9[%c0_66, %c0_67, %c0_68, %c0_69], %37 {strides = array<i32>} : memref<1x18x18x8xf32, #tpu.memory_space<vmem>>, vector<1x1x18x8xf32>,
    %cst_70 = arith.constant 0.000000e+00 : f32
    %39 = vector.broadcast %cst_70 : f32 to vector<1x1x18x8xf32>
    %c0_71 = arith.constant 0 : index
    %c17_72 = arith.constant 17 : index
    %c0_73 = arith.constant 0 : index
    %c0_74 = arith.constant 0 : index
    %40 = vector.load %arg9[%c0_71, %c17_72, %c0_73, %c0_74] : memref<1x18x18x8xf32, #tpu.memory_space<vmem>>, vector<1x1x18x8xf32>
    tpu.vector_store %arg9[%c0_71, %c17_72, %c0_73, %c0_74], %39 {strides = array<i32>} : memref<1x18x18x8xf32, #tpu.memory_space<vmem>>, vector<1x1x18x8xf32>,
    %cst_75 = arith.constant 0.000000e+00 : f32
    %41 = vector.broadcast %cst_75 : f32 to vector<1x16x1x8xf32>
    %c0_76 = arith.constant 0 : index
    %c1_77 = arith.constant 1 : index
    %c0_78 = arith.constant 0 : index
    %c0_79 = arith.constant 0 : index
    %42 = vector.load %arg9[%c0_76, %c1_77, %c0_78, %c0_79] : memref<1x18x18x8xf32, #tpu.memory_space<vmem>>, vector<1x16x1x8xf32>
    tpu.vector_store %arg9[%c0_76, %c1_77, %c0_78, %c0_79], %41 {strides = array<i32>} : memref<1x18x18x8xf32, #tpu.memory_space<vmem>>, vector<1x16x1x8xf32>,
    %cst_80 = arith.constant 0.000000e+00 : f32
    %43 = vector.broadcast %cst_80 : f32 to vector<1x16x1x8xf32>
    %c0_81 = arith.constant 0 : index
    %c1_82 = arith.constant 1 : index
    %c17_83 = arith.constant 17 : index
    %c0_84 = arith.constant 0 : index
    %44 = vector.load %arg9[%c0_81, %c1_82, %c17_83, %c0_84] : memref<1x18x18x8xf32, #tpu.memory_space<vmem>>, vector<1x16x1x8xf32>
    tpu.vector_store %arg9[%c0_81, %c1_82, %c17_83, %c0_84], %43 {strides = array<i32>} : memref<1x18x18x8xf32, #tpu.memory_space<vmem>>, vector<1x16x1x8xf32>,
    %c0_85 = arith.constant 0 : index
    %c1_86 = arith.constant 1 : index
    %c1_87 = arith.constant 1 : index
    %c0_88 = arith.constant 0 : index
    %45 = vector.load %arg9[%c0_85, %c1_86, %c1_87, %c0_88] : memref<1x18x18x8xf32, #tpu.memory_space<vmem>>, vector<1x16x16x8xf32>
    tpu.vector_store %arg9[%c0_85, %c1_86, %c1_87, %c0_88], %36 {strides = array<i32>} : memref<1x18x18x8xf32, #tpu.memory_space<vmem>>, vector<1x16x16x8xf32>,
    %c0_89 = arith.constant 0 : index
    %c0_90 = arith.constant 0 : index
    %c0_91 = arith.constant 0 : index
    %c0_92 = arith.constant 0 : index
    %46 = vector.load %arg9[%c0_89, %c0_90, %c0_91, %c0_92] : memref<1x18x18x8xf32, #tpu.memory_space<vmem>>, vector<1x16x16x8xf32>
    %47 = vector.shape_cast %46 : vector<1x16x16x8xf32> to vector<256x8xf32>
    %c0_93 = arith.constant 0 : index
    %c0_94 = arith.constant 0 : index
    %c1_95 = arith.constant 1 : index
    %c0_96 = arith.constant 0 : index
    %48 = vector.load %arg9[%c0_93, %c0_94, %c1_95, %c0_96] : memref<1x18x18x8xf32, #tpu.memory_space<vmem>>, vector<1x16x16x8xf32>
    %49 = vector.shape_cast %48 : vector<1x16x16x8xf32> to vector<256x8xf32>
    %c0_97 = arith.constant 0 : index
    %c0_98 = arith.constant 0 : index
    %c2_99 = arith.constant 2 : index
    %c0_100 = arith.constant 0 : index
    %50 = vector.load %arg9[%c0_97, %c0_98, %c2_99, %c0_100] : memref<1x18x18x8xf32, #tpu.memory_space<vmem>>, vector<1x16x16x8xf32>
    %51 = vector.shape_cast %50 : vector<1x16x16x8xf32> to vector<256x8xf32>
    %c0_101 = arith.constant 0 : index
    %c1_102 = arith.constant 1 : index
    %c0_103 = arith.constant 0 : index
    %c0_104 = arith.constant 0 : index
    %52 = vector.load %arg9[%c0_101, %c1_102, %c0_103, %c0_104] : memref<1x18x18x8xf32, #tpu.memory_space<vmem>>, vector<1x16x16x8xf32>
    %53 = vector.shape_cast %52 : vector<1x16x16x8xf32> to vector<256x8xf32>
    %c0_105 = arith.constant 0 : index
    %c1_106 = arith.constant 1 : index
    %c1_107 = arith.constant 1 : index
    %c0_108 = arith.constant 0 : index
    %54 = vector.load %arg9[%c0_105, %c1_106, %c1_107, %c0_108] : memref<1x18x18x8xf32, #tpu.memory_space<vmem>>, vector<1x16x16x8xf32>
    %55 = vector.shape_cast %54 : vector<1x16x16x8xf32> to vector<256x8xf32>
    %c0_109 = arith.constant 0 : index
    %c1_110 = arith.constant 1 : index
    %c2_111 = arith.constant 2 : index
    %c0_112 = arith.constant 0 : index
    %56 = vector.load %arg9[%c0_109, %c1_110, %c2_111, %c0_112] : memref<1x18x18x8xf32, #tpu.memory_space<vmem>>, vector<1x16x16x8xf32>
    %57 = vector.shape_cast %56 : vector<1x16x16x8xf32> to vector<256x8xf32>
    %c0_113 = arith.constant 0 : index
    %c2_114 = arith.constant 2 : index
    %c0_115 = arith.constant 0 : index
    %c0_116 = arith.constant 0 : index
    %58 = vector.load %arg9[%c0_113, %c2_114, %c0_115, %c0_116] : memref<1x18x18x8xf32, #tpu.memory_space<vmem>>, vector<1x16x16x8xf32>
    %59 = vector.shape_cast %58 : vector<1x16x16x8xf32> to vector<256x8xf32>
    %c0_117 = arith.constant 0 : index
    %c2_118 = arith.constant 2 : index
    %c1_119 = arith.constant 1 : index
    %c0_120 = arith.constant 0 : index
    %60 = vector.load %arg9[%c0_117, %c2_118, %c1_119, %c0_120] : memref<1x18x18x8xf32, #tpu.memory_space<vmem>>, vector<1x16x16x8xf32>
    %61 = vector.shape_cast %60 : vector<1x16x16x8xf32> to vector<256x8xf32>
    %c0_121 = arith.constant 0 : index
    %c2_122 = arith.constant 2 : index
    %c2_123 = arith.constant 2 : index
    %c0_124 = arith.constant 0 : index
    %62 = vector.load %arg9[%c0_121, %c2_122, %c2_123, %c0_124] : memref<1x18x18x8xf32, #tpu.memory_space<vmem>>, vector<1x16x16x8xf32>
    %63 = vector.shape_cast %62 : vector<1x16x16x8xf32> to vector<256x8xf32>
    %64 = tpu.concatenate %47, %49, %51, %53, %55, %57, %59, %61, %63 in 1 : vector<256x8xf32>, vector<256x8xf32>, vector<256x8xf32>, vector<256x8xf32>, vector<256x8xf32>, vector<256x8xf32>, vector<256x8xf32>, vector<256x8xf32>, vector<256x8xf32> -> vector<256x72xf32>
    %c0_125 = arith.constant 0 : index
    %c0_126 = arith.constant 0 : index
    %65 = vector.load %arg4[%c0_125, %c0_126] : memref<72x8xf32, #tpu.memory_space<vmem>>, vector<72x8xf32>
    %cst_127 = arith.constant dense<0.000000e+00> : vector<256x8xf32>
    %66 = tpu.matmul %64, %65, %cst_127 {dimension_numbers = #tpu.dot_dimension_numbers<[1], [0], [0], [1], [0, 0, 1, 1], [], []>} : vector<256x72xf32>, vector<72x8xf32>, vector<256x8xf32> -> vector<256x8xf32>
    %c0_128 = arith.constant 0 : index
    %c0_129 = arith.constant 0 : index
    %67 = vector.load %arg5[%c0_128, %c0_129] : memref<1x8xf32, #tpu.memory_space<vmem>>, vector<1x8xf32>
    %68 = vector.broadcast %67 : vector<1x8xf32> to vector<256x8xf32>
    %69 = arith.addf %66, %68 : vector<256x8xf32>
    %cst_130 = arith.constant 0.000000e+00 : f32
    %70 = vector.broadcast %cst_130 : f32 to vector<256x8xf32>
    %71 = arith.maximumf %69, %70 : vector<256x8xf32>
    %72 = vector.shape_cast %71 : vector<256x8xf32> to vector<1x16x16x8xf32>
    %c0_131 = arith.constant 0 : index
    %c0_132 = arith.constant 0 : index
    %c0_133 = arith.constant 0 : index
    %c0_134 = arith.constant 0 : index
    %73 = vector.load %arg6[%c0_131, %c0_132, %c0_133, %c0_134] : memref<1x16x16x8xf32, #tpu.memory_space<vmem>>, vector<1x16x16x8xf32>
    tpu.vector_store %arg6[%c0_131, %c0_132, %c0_133, %c0_134], %72 {strides = array<i32>} : memref<1x16x16x8xf32, #tpu.memory_space<vmem>>, vector<1x16x16x8xf32>,
    %74 = vector.shape_cast %72 : vector<1x16x16x8xf32> to vector<8x2x16x8xf32>
    %75 = vector.extract_strided_slice %74 {offsets = [0, 0, 0, 0], sizes = [8, 1, 16, 8], strides = [1, 1, 1, 1]} : vector<8x2x16x8xf32> to vector<8x1x16x8xf32>
    %76 = vector.shape_cast %75 : vector<8x1x16x8xf32> to vector<8x16x8xf32>
    %77 = vector.extract_strided_slice %74 {offsets = [0, 1, 0, 0], sizes = [8, 1, 16, 8], strides = [1, 1, 1, 1]} : vector<8x2x16x8xf32> to vector<8x1x16x8xf32>
    %78 = vector.shape_cast %77 : vector<8x1x16x8xf32> to vector<8x16x8xf32>
    %79 = arith.maximumf %76, %78 : vector<8x16x8xf32>
    %c0_135 = arith.constant 0 : index
    %c0_136 = arith.constant 0 : index
    %c0_137 = arith.constant 0 : index
    %80 = vector.load %arg10[%c0_135, %c0_136, %c0_137] : memref<8x16x8xf32, #tpu.memory_space<vmem>>, vector<8x16x8xf32>
    tpu.vector_store %arg10[%c0_135, %c0_136, %c0_137], %79 {strides = array<i32>} : memref<8x16x8xf32, #tpu.memory_space<vmem>>, vector<8x16x8xf32>,
    %c0_138 = arith.constant 0 : index
    %c0_139 = arith.constant 0 : index
    %c0_140 = arith.constant 0 : index
    %81 = tpu.strided_load %arg10[%c0_138, %c0_139, %c0_140] {strides = array<i32: 1, 2, 1>} : memref<8x16x8xf32, #tpu.memory_space<vmem>>, vector<8x8x8xf32>
    %c0_141 = arith.constant 0 : index
    %c1_142 = arith.constant 1 : index
    %c0_143 = arith.constant 0 : index
    %82 = tpu.strided_load %arg10[%c0_141, %c1_142, %c0_143] {strides = array<i32: 1, 2, 1>} : memref<8x16x8xf32, #tpu.memory_space<vmem>>, vector<8x8x8xf32>
    %83 = arith.maximumf %81, %82 : vector<8x8x8xf32>
    %84 = vector.shape_cast %83 : vector<8x8x8xf32> to vector<1x8x8x8xf32>
    %c0_144 = arith.constant 0 : index
    %c0_145 = arith.constant 0 : index
    %c0_146 = arith.constant 0 : index
    %c0_147 = arith.constant 0 : index
    %85 = vector.load %arg7[%c0_144, %c0_145, %c0_146, %c0_147] : memref<1x8x8x8xf32, #tpu.memory_space<vmem>>, vector<1x8x8x8xf32>
    tpu.vector_store %arg7[%c0_144, %c0_145, %c0_146, %c0_147], %84 {strides = array<i32>} : memref<1x8x8x8xf32, #tpu.memory_space<vmem>>, vector<1x8x8x8xf32>,
    return
  }
  func.func @transform_0(%arg0: i32) -> (i32, i32, i32, i32) {
    %c0_i32 = arith.constant 0 : i32
    %c0_i32_0 = arith.constant 0 : i32
    %c0_i32_1 = arith.constant 0 : i32
    %c0_i32_2 = arith.constant 0 : i32
    return %arg0, %c0_i32, %c0_i32_0, %c0_i32_1 : i32, i32, i32, i32
  }
  func.func @transform_1(%arg0: i32) -> (i32, i32) {
    %c0_i32 = arith.constant 0 : i32
    %c0_i32_0 = arith.constant 0 : i32
    %c0_i32_1 = arith.constant 0 : i32
    return %c0_i32, %c0_i32_0 : i32, i32
  }
  func.func @transform_2(%arg0: i32) -> (i32, i32) {
    %c0_i32 = arith.constant 0 : i32
    %c0_i32_0 = arith.constant 0 : i32
    %c0_i32_1 = arith.constant 0 : i32
    return %c0_i32, %c0_i32_0 : i32, i32
  }
  func.func @transform_3(%arg0: i32) -> (i32, i32) {
    %c0_i32 = arith.constant 0 : i32
    %c0_i32_0 = arith.constant 0 : i32
    %c0_i32_1 = arith.constant 0 : i32
    return %c0_i32, %c0_i32_0 : i32, i32
  }
  func.func @transform_4(%arg0: i32) -> (i32, i32) {
    %c0_i32 = arith.constant 0 : i32
    %c0_i32_0 = arith.constant 0 : i32
    %c0_i32_1 = arith.constant 0 : i32
    return %c0_i32, %c0_i32_0 : i32, i32
  }
  func.func @transform_5(%arg0: i32) -> (i32, i32, i32, i32) {
    %c0_i32 = arith.constant 0 : i32
    %c0_i32_0 = arith.constant 0 : i32
    %c0_i32_1 = arith.constant 0 : i32
    %c0_i32_2 = arith.constant 0 : i32
    return %arg0, %c0_i32, %c0_i32_0, %c0_i32_1 : i32, i32, i32, i32
  }
  func.func @transform_6(%arg0: i32) -> (i32, i32, i32, i32) {
    %c0_i32 = arith.constant 0 : i32
    %c0_i32_0 = arith.constant 0 : i32
    %c0_i32_1 = arith.constant 0 : i32
    %c0_i32_2 = arith.constant 0 : i32
    return %arg0, %c0_i32, %c0_i32_0, %c0_i32_1 : i32, i32, i32, i32
  }
}

</mosaic_0001>

<bundles_post_ra>
// kernel: tpu_custom_call.1
= control target key start
LH: loop header
LB: loop body
LE: loop exit
PB: predicated region body
PF: predicated region fallthrough
CT: control target
= control target key end

     0   :  { %12 = vsyncpa [#allocation6], 0  ;;  %s8268_s0 = inlined_call_operand.vmem [shape: f32[2,16,16,4], index: 0, kind: input, shape index: {}]   ;;  %s8269_s1 = inlined_call_operand.vmem [shape: f32[36,8], index: 1, kind: input, shape index: {}]   ;;  %s8270_s2 = inlined_call_operand.vmem [shape: f32[1,8], index: 2, kind: input, shape index: {}]   ;;  %s8271_s3 = inlined_call_operand.vmem [shape: f32[72,8], index: 3, kind: input, shape index: {}]   ;;  %s8272_s4 = inlined_call_operand.vmem [shape: f32[1,8], index: 4, kind: input, shape index: {}]   ;;  %s8273_s5 = inlined_call_operand.vmem [shape: f32[2,16,16,8], index: 5, kind: output, shape index: {0}]   ;;  %s8274_s6 = inlined_call_operand.hbm [shape: f32[2,8,8,8], index: 6, kind: output, shape index: {1}]  }
   0x1   :  { %14 = vsyncpa [#allocation6 + $0x1], 0  ;;  %s5070_s21 = smov 0   ;;  %s5072_s22 = smov 0  }
   0x2   :  { %s5074_s23 = smov 0   ;;  %s5076_s24 = smov 0  }
   0x3 LB: > { %s5091_s25 = sadd.s32 4294967295, %s5018_s24   ;;  %s4553_s26 = sadd.s32 4294967294, %s5018_s24   ;;  %s5018_s24 = sphi %s5076_s24, %s8772_s24   ;;  %s5014_s23 = sphi %s5074_s23, %s8771_s23   ;;  %s5010_s22 = sphi %s5072_s22, %s8770_s22   ;;  %s5006_s21 = sphi %s5070_s21, %s8769_s21  }
   0x4   : > { %s5095_s27 = sadd.s32 1, %s5018_s24   ;;  %s163_s28 = sadd.s32 1, %s5014_s23 }
   0x5   : > { %s160_s29 = ssub.s32 %s5018_s24, %s5095_s27  ;;  %p173_p0 = scmp.ne.s32.totalorder %s5014_s23, %s5010_s22 }
   0x6   : > { %p161_p1 = scmp.eq.s32.totalorder %s160_s29, 0  ;;  %p174_p2 = scmp.eq.s32.totalorder %s5091_s25, 1 }
   0x7   : > { %p179_p3 = scmp.ne.s32.totalorder %s5010_s22, %s5006_s21  ;;  %p180_p4 = scmp.eq.s32.totalorder %s4553_s26, 1 }
   0x8   : > { %s5106_s30 = scalar_select %p161_p1, %s5014_s23, %s163_s28  }
   0x9   : > { %p5108_p5 = por %p174_p2, %p173_p0  ;;  %p5112_p6 = por %p180_p4, %p179_p3 }
   0xa   : > { %p4556_p7 = scmp.ge.s32.totalorder %s5018_s24, 1  ;;  %p218_p8 = scmp.lt.s32.totalorder %s5018_s24, 3 }
   0xc   : > { %p219_p9 = pnand %p4556_p7, %p218_p8 }
   0xe   : > { %222 = sbr.rel (%p219_p9) target bundleno = 1695 (0x69f), region = 40 }
  0x15   : > { %vm295_vm0 = vcmask 31744   ;;  %vm298_vm1 = vcmask 25600   ;;  %p253_p10 = scmp.lt.s32.totalorder %s5091_s25, 1  ;;  %vm305_vm2 = vcmask 24576   ;;  %v8275_v0 = vmov 0.0   ;;  %s5021_s14 = smov 4  }
  0x16   : > { %296 = vst.msk [vmem:[#allocation2] sm:$0xff] %vm295_vm0, %v8275_v0  ;;  %297 = vst.msk [vmem:[#allocation2 + $0x8] sm:$0xff] %vm295_vm0, %v8275_v0  ;;  %vm1715_vm3 = vcmask 64512   ;;  %s5022_s15 = smov 8   ;;  %s5023_s16 = smov 12   ;;  %vm2055_vm4 = vcmask 1043456  }
  0x17   : > { %301 = vst.msk [vmem:[#allocation2 + $0x198] sm:$0xff] %vm295_vm0, %v8275_v0  ;;  %302 = vst.msk [vmem:[#allocation2 + $0x1a0] sm:$0xff] %vm295_vm0, %v8275_v0  ;;  %s5196_s9 = scalar_select %p253_p10, %s5091_s25, 1  ;;  %vm1748_vm5 = vcmask 97280   ;;  %vm1781_vm6 = vcmask 130048   ;;  %vm1814_vm7 = vcmask 162816  }
  0x18   : > { %299 = vst.msk [vmem:[#allocation2 + $0x10] sm:$0x3] %vm298_vm1, %v8275_v0  ;;  %303 = vst.msk [vmem:[#allocation2 + $0x1a8] sm:$0x3] %vm298_vm1, %v8275_v0  ;;  %s5024_s17 = smov 16   ;;  %s5025_s18 = smov 20  }
  0x19   : > { %322 = vst.msk [vmem:[#allocation2 + $0x29] sm:$0x1] %vm305_vm2, %v8275_v0  ;;  %306 = vst.msk [vmem:[#allocation2 + $0x18] sm:$0x1] %vm305_vm2, %v8275_v0  ;;  %s4634_s10 = sshll.u32 %s5196_s9, 8  ;;  %s5026_s19 = smov 24  }
  0x1a   : > { %307 = vst.msk [vmem:[#allocation2 + $0x30] sm:$0x1] %vm305_vm2, %v8275_v0  ;;  %308 = vst.msk [vmem:[#allocation2 + $0x48] sm:$0x1] %vm305_vm2, %v8275_v0  ;;  %s5204_s13 = scalar_lea.vmem %s8268_s0, %s4634_s10  ;;  %s5027_s20 = smov 28   ;;  %vm1847_vm8 = vcmask 195584  }
  0x1b   : > { %309 = vst.msk [vmem:[#allocation2 + $0x60] sm:$0x1] %vm305_vm2, %v8275_v0  ;;  %310 = vst.msk [vmem:[#allocation2 + $0x78] sm:$0x1] %vm305_vm2, %v8275_v0  ;;  %v263_v1 = vld [vmem:[%s5204_s13] sm:$0xff]  ;;  %v265_v2 = vld [vmem:[%s5204_s13 + $0x10] sm:$0xff] }
  0x1c   : > { %311 = vst.msk [vmem:[#allocation2 + $0x90] sm:$0x1] %vm305_vm2, %v8275_v0  ;;  %312 = vst.msk [vmem:[#allocation2 + $0xa8] sm:$0x1] %vm305_vm2, %v8275_v0  ;;  %v264_v3 = vld [vmem:[%s5204_s13 + $0x8] sm:$0xff]  ;;  %v267_v4 = vld [vmem:[%s5204_s13 + $0x20] sm:$0xff] }
  0x1d   : > { %313 = vst.msk [vmem:[#allocation2 + $0xc0] sm:$0x1] %vm305_vm2, %v8275_v0  ;;  %314 = vst.msk [vmem:[#allocation2 + $0xd8] sm:$0x1] %vm305_vm2, %v8275_v0  ;;  %v266_v5 = vld [vmem:[%s5204_s13 + $0x18] sm:$0xff]  ;;  %v269_v6 = vld [vmem:[%s5204_s13 + $0x30] sm:$0xff] }
  0x1e   : > { %315 = vst.msk [vmem:[#allocation2 + $0xf0] sm:$0x1] %vm305_vm2, %v8275_v0  ;;  %316 = vst.msk [vmem:[#allocation2 + $0x108] sm:$0x1] %vm305_vm2, %v8275_v0  ;;  %v402_v7 = vld [vmem:[#allocation2 + $0x1] sm:$0xff]  ;;  %v270_v11 = vld [vmem:[%s5204_s13 + $0x38] sm:$0xff] }
  0x1f   : > { %317 = vst.msk [vmem:[#allocation2 + $0x120] sm:$0x1] %vm305_vm2, %v8275_v0  ;;  %318 = vst.msk [vmem:[#allocation2 + $0x138] sm:$0x1] %vm305_vm2, %v8275_v0  ;;  %v403_v8 = vld [vmem:[#allocation2 + $0x9] sm:$0xff]  ;;  %691 = vrot.lane.b32.xlu0 %v402_v7, %s5021_s14  ;;  %v271_v10 = vld [vmem:[%s5204_s13 + $0x40] sm:$0xff] }
  0x20   : > { %319 = vst.msk [vmem:[#allocation2 + $0x150] sm:$0x1] %vm305_vm2, %v8275_v0  ;;  %320 = vst.msk [vmem:[#allocation2 + $0x168] sm:$0x1] %vm305_vm2, %v8275_v0  ;;  %v268_v9 = vld [vmem:[%s5204_s13 + $0x28] sm:$0xff]  ;;  %v273_v12 = vld [vmem:[%s5204_s13 + $0x50] sm:$0xff] }
  0x21   : > { %321 = vst.msk [vmem:[#allocation2 + $0x180] sm:$0x1] %vm305_vm2, %v8275_v0  ;;  %323 = vst.msk [vmem:[#allocation2 + $0x41] sm:$0x1] %vm305_vm2, %v8275_v0  ;;  %v272_v13 = vld [vmem:[%s5204_s13 + $0x48] sm:$0xff]  ;;  %v275_v14 = vld [vmem:[%s5204_s13 + $0x60] sm:$0xff] }
  0x22   : > { %324 = vst.msk [vmem:[#allocation2 + $0x59] sm:$0x1] %vm305_vm2, %v8275_v0  ;;  %325 = vst.msk [vmem:[#allocation2 + $0x71] sm:$0x1] %vm305_vm2, %v8275_v0  ;;  %v274_v15 = vld [vmem:[%s5204_s13 + $0x58] sm:$0xff]  ;;  %v277_v16 = vld [vmem:[%s5204_s13 + $0x70] sm:$0xff] }
  0x23   : > { %326 = vst.msk [vmem:[#allocation2 + $0x89] sm:$0x1] %vm305_vm2, %v8275_v0  ;;  %327 = vst.msk [vmem:[#allocation2 + $0xa1] sm:$0x1] %vm305_vm2, %v8275_v0  ;;  %v276_v17 = vld [vmem:[%s5204_s13 + $0x68] sm:$0xff]  ;;  %v279_v18 = vld [vmem:[%s5204_s13 + $0x80] sm:$0xff]  ;;  %693 = vrot.lane.b32.xlu0 %v403_v8, %s5021_s14 }
  0x24   : > { %328 = vst.msk [vmem:[#allocation2 + $0xb9] sm:$0x1] %vm305_vm2, %v8275_v0  ;;  %329 = vst.msk [vmem:[#allocation2 + $0xd1] sm:$0x1] %vm305_vm2, %v8275_v0  ;;  %v278_v19 = vld [vmem:[%s5204_s13 + $0x78] sm:$0xff]  ;;  %v281_v20 = vld [vmem:[%s5204_s13 + $0x90] sm:$0xff] }
  0x25   : > { %330 = vst.msk [vmem:[#allocation2 + $0xe9] sm:$0x1] %vm305_vm2, %v8275_v0  ;;  %331 = vst.msk [vmem:[#allocation2 + $0x101] sm:$0x1] %vm305_vm2, %v8275_v0  ;;  %v280_v21 = vld [vmem:[%s5204_s13 + $0x88] sm:$0xff]  ;;  %v283_v22 = vld [vmem:[%s5204_s13 + $0xa0] sm:$0xff] }
  0x26   : > { %332 = vst.msk [vmem:[#allocation2 + $0x119] sm:$0x1] %vm305_vm2, %v8275_v0  ;;  %333 = vst.msk [vmem:[#allocation2 + $0x131] sm:$0x1] %vm305_vm2, %v8275_v0  ;;  %v282_v23 = vld [vmem:[%s5204_s13 + $0x98] sm:$0xff]  ;;  %v285_v24 = vld [vmem:[%s5204_s13 + $0xb0] sm:$0xff] }
  0x27   : > { %334 = vst.msk [vmem:[#allocation2 + $0x149] sm:$0x1] %vm305_vm2, %v8275_v0  ;;  %335 = vst.msk [vmem:[#allocation2 + $0x161] sm:$0x1] %vm305_vm2, %v8275_v0  ;;  %v284_v28 = vld [vmem:[%s5204_s13 + $0xa8] sm:$0xff]  ;;  %v287_v29 = vld [vmem:[%s5204_s13 + $0xc0] sm:$0xff] }
  0x28   : > { %336 = vst.msk [vmem:[#allocation2 + $0x179] sm:$0x1] %vm305_vm2, %v8275_v0  ;;  %337 = vst.msk [vmem:[#allocation2 + $0x191] sm:$0x1] %vm305_vm2, %v8275_v0  ;;  %v286_v33 = vld [vmem:[%s5204_s13 + $0xb8] sm:$0xff]  ;;  %v289_v34 = vld [vmem:[%s5204_s13 + $0xd0] sm:$0xff] }
  0x29   : > { %338 = vst.msk [vmem:[#allocation2 + $0x19] sm:$0xff] %vm295_vm0, %v263_v1  ;;  %340 = vst.msk [vmem:[#allocation2 + $0x31] sm:$0xff] %vm295_vm0, %v265_v2  ;;  %v288_v35 = vld [vmem:[%s5204_s13 + $0xc8] sm:$0xff]  ;;  %v291_v36 = vld [vmem:[%s5204_s13 + $0xe0] sm:$0xff]  ;;  %s5028_s26 = smov 32   ;;  %vm1880_vm9 = vcmask 228352  }
  0x2a   : > { %339 = vst.msk [vmem:[#allocation2 + $0x21] sm:$0xff] %vm295_vm0, %v264_v3  ;;  %342 = vst.msk [vmem:[#allocation2 + $0x49] sm:$0xff] %vm295_vm0, %v267_v4  ;;  %v290_v37 = vld [vmem:[%s5204_s13 + $0xd8] sm:$0xff]  ;;  %v292_v39 = vld [vmem:[%s5204_s13 + $0xe8] sm:$0xff]  ;;  %vm1913_vm10 = vcmask 261120   ;;  %vm1958_vm11 = vcmask 293888  }
  0x2b   : > { %341 = vst.msk [vmem:[#allocation2 + $0x39] sm:$0xff] %vm295_vm0, %v266_v5  ;;  %344 = vst.msk [vmem:[#allocation2 + $0x61] sm:$0xff] %vm295_vm0, %v269_v6  ;;  %v293_v58 = vld [vmem:[%s5204_s13 + $0xf0] sm:$0xff]  ;;  %v294_v62 = vld [vmem:[%s5204_s13 + $0xf8] sm:$0xff]  ;;  %vm2318_vm12 = vcmask 58368   ;;  %vm2325_vm13 = vcmask 57344  }
  0x2c   : > { %343 = vst.msk [vmem:[#allocation2 + $0x51] sm:$0xff] %vm295_vm0, %v268_v9  ;;  %346 = vst.msk [vmem:[#allocation2 + $0x79] sm:$0xff] %vm295_vm0, %v271_v10  ;;  %v434_v1 = vld [vmem:[#allocation2 + $0x2] sm:$0xff]  ;;  %v435_v4 = vld [vmem:[#allocation2 + $0xa] sm:$0xff]  ;;  %s5029_s12 = smov 40   ;;  %s5032_s11 = smov 64  }
  0x2d   : > { %345 = vst.msk [vmem:[#allocation2 + $0x69] sm:$0xff] %vm295_vm0, %v270_v11  ;;  %348 = vst.msk [vmem:[#allocation2 + $0x91] sm:$0xff] %vm295_vm0, %v273_v12  ;;  %vm3831_vm14 = vcmask 326656   ;;  %vm3864_vm15 = vcmask 392192   ;;  %vm3930_vm1 = vcmask 523264   ;;  %vm3979_vm2 = vcmask 588800  }
  0x2e   : > { %347 = vst.msk [vmem:[#allocation2 + $0x81] sm:$0xff] %vm295_vm0, %v272_v13  ;;  %350 = vst.msk [vmem:[#allocation2 + $0xa9] sm:$0xff] %vm295_vm0, %v275_v14  ;;  %s250_s9 = sand.u32 1, %s5010_s22  }
  0x2f   : > { %349 = vst.msk [vmem:[#allocation2 + $0x99] sm:$0xff] %vm295_vm0, %v274_v15  ;;  %352 = vst.msk [vmem:[#allocation2 + $0xc1] sm:$0xff] %vm295_vm0, %v277_v16 }
  0x30   : > { %351 = vst.msk [vmem:[#allocation2 + $0xb1] sm:$0xff] %vm295_vm0, %v276_v17  ;;  %354 = vst.msk [vmem:[#allocation2 + $0xd9] sm:$0xff] %vm295_vm0, %v279_v18  ;;  %v5249_v25 = vld [vmem:[#allocation2 + $0x19] sm:$0xff]  ;;  %v5251_v26 = vld [vmem:[#allocation2 + $0x31] sm:$0xff] }
  0x31   : > { %353 = vst.msk [vmem:[#allocation2 + $0xc9] sm:$0xff] %vm295_vm0, %v278_v19  ;;  %356 = vst.msk [vmem:[#allocation2 + $0xf1] sm:$0xff] %vm295_vm0, %v281_v20  ;;  %695 = vrot.lane.b32.xlu1 %v5249_v25, %s5021_s14  ;;  %v5258_v27 = vld [vmem:[#allocation2 + $0x21] sm:$0xff]  ;;  %699 = vrot.lane.b32.xlu0 %v5251_v26, %s5021_s14  ;;  %v5266_v30 = vld [vmem:[#allocation2 + $0x49] sm:$0xff] }
  0x32   : > { %355 = vst.msk [vmem:[#allocation2 + $0xe1] sm:$0xff] %vm295_vm0, %v280_v21  ;;  %358 = vst.msk [vmem:[#allocation2 + $0x109] sm:$0xff] %vm295_vm0, %v283_v22  ;;  %v5270_v31 = vld [vmem:[#allocation2 + $0x39] sm:$0xff]  ;;  %v5274_v32 = vld [vmem:[#allocation2 + $0x61] sm:$0xff] }
  0x33   : > { %357 = vst.msk [vmem:[#allocation2 + $0xf9] sm:$0xff] %vm295_vm0, %v282_v23  ;;  %360 = vst.msk [vmem:[#allocation2 + $0x121] sm:$0xff] %vm295_vm0, %v285_v24  ;;  %v5286_v38 = vld [vmem:[#allocation2 + $0x51] sm:$0xff]  ;;  %v5294_v40 = vld [vmem:[#allocation2 + $0x79] sm:$0xff] }
  0x34   : > { %359 = vst.msk [vmem:[#allocation2 + $0x111] sm:$0xff] %vm295_vm0, %v284_v28  ;;  %362 = vst.msk [vmem:[#allocation2 + $0x139] sm:$0xff] %vm295_vm0, %v287_v29  ;;  %v5298_v41 = vld [vmem:[#allocation2 + $0x69] sm:$0xff]  ;;  %v5302_v42 = vld [vmem:[#allocation2 + $0x91] sm:$0xff] }
  0x35   : > { %697 = vrot.lane.b32.xlu1 %v5258_v27, %s5021_s14  ;;  %703 = vrot.lane.b32.xlu0 %v5266_v30, %s5021_s14  ;;  %361 = vst.msk [vmem:[#allocation2 + $0x129] sm:$0xff] %vm295_vm0, %v286_v33  ;;  %364 = vst.msk [vmem:[#allocation2 + $0x151] sm:$0xff] %vm295_vm0, %v289_v34  ;;  %v5306_v43 = vld [vmem:[#allocation2 + $0x81] sm:$0xff]  ;;  %v5310_v44 = vld [vmem:[#allocation2 + $0xa9] sm:$0xff] }
  0x36   : > { %363 = vst.msk [vmem:[#allocation2 + $0x141] sm:$0xff] %vm295_vm0, %v288_v35  ;;  %366 = vst.msk [vmem:[#allocation2 + $0x169] sm:$0xff] %vm295_vm0, %v291_v36  ;;  %v5314_v45 = vld [vmem:[#allocation2 + $0x99] sm:$0xff]  ;;  %v5318_v46 = vld [vmem:[#allocation2 + $0xc1] sm:$0xff] }
  0x37   : > { %365 = vst.msk [vmem:[#allocation2 + $0x159] sm:$0xff] %vm295_vm0, %v290_v37  ;;  %367 = vst.msk [vmem:[#allocation2 + $0x171] sm:$0xff] %vm295_vm0, %v292_v39  ;;  %v5322_v47 = vld [vmem:[#allocation2 + $0xb1] sm:$0xff]  ;;  %v5326_v48 = vld [vmem:[#allocation2 + $0xd9] sm:$0xff] }
  0x38   : > { %v5330_v49 = vld [vmem:[#allocation2 + $0xc9] sm:$0xff]  ;;  %v5334_v50 = vld [vmem:[#allocation2 + $0xf1] sm:$0xff]  ;;  %2316 = vst.msk [vmem:[#allocation3] sm:$0xff] %vm1715_vm3, %v8275_v0  ;;  %2317 = vst.msk [vmem:[#allocation3 + $0x8] sm:$0xff] %vm1715_vm3, %v8275_v0 }
  0x39   : > { %701 = vrot.lane.b32.xlu1 %v5270_v31, %s5021_s14  ;;  %707 = vrot.lane.b32.xlu0 %v5274_v32, %s5021_s14  ;;  %v5338_v51 = vld [vmem:[#allocation2 + $0xe1] sm:$0xff]  ;;  %v5342_v52 = vld [vmem:[#allocation2 + $0x109] sm:$0xff]  ;;  %2321 = vst.msk [vmem:[#allocation3 + $0x198] sm:$0xff] %vm1715_vm3, %v8275_v0  ;;  %2322 = vst.msk [vmem:[#allocation3 + $0x1a0] sm:$0xff] %vm1715_vm3, %v8275_v0 }
  0x3a   : > { %v5346_v53 = vld [vmem:[#allocation2 + $0xf9] sm:$0xff]  ;;  %v5350_v54 = vld [vmem:[#allocation2 + $0x121] sm:$0xff]  ;;  %368 = vst.msk [vmem:[#allocation2 + $0x181] sm:$0xff] %vm295_vm0, %v293_v58  ;;  %369 = vst.msk [vmem:[#allocation2 + $0x189] sm:$0xff] %vm295_vm0, %v294_v62 }
  0x3b   : > { %v5354_v55 = vld [vmem:[#allocation2 + $0x111] sm:$0xff]  ;;  %v5358_v56 = vld [vmem:[#allocation2 + $0x139] sm:$0xff]  ;;  %v5408_v6 = vld [vmem:[#allocation2 + $0x22] sm:$0xff] }
  0x3c   : > { %v5370_v57 = vld [vmem:[#allocation2 + $0x129] sm:$0xff]  ;;  %v5376_v59 = vld [vmem:[#allocation2 + $0x151] sm:$0xff]  ;;  %v5399_v3 = vld [vmem:[#allocation2 + $0x1a] sm:$0xff] }
  0x3d   : > { %705 = vrot.lane.b32.xlu1 %v5286_v38, %s5021_s14  ;;  %711 = vrot.lane.b32.xlu0 %v5294_v40, %s5021_s14  ;;  %v5380_v60 = vld [vmem:[#allocation2 + $0x141] sm:$0xff]  ;;  %v5384_v61 = vld [vmem:[#allocation2 + $0x169] sm:$0xff]  ;;  %v5405_v5 = vld [vmem:[#allocation2 + $0x32] sm:$0xff] }
  0x3e   : > { %v5390_v63 = vld [vmem:[#allocation2 + $0x159] sm:$0xff]  ;;  %v5396_v2 = vld [vmem:[#allocation2 + $0x171] sm:$0xff]  ;;  %v5420_v9 = vld [vmem:[#allocation2 + $0x62] sm:$0xff] }
  0x3f   : > { %v5412_v7 = vld [vmem:[#allocation2 + $0x4a] sm:$0xff]  ;;  %v5416_v8 = vld [vmem:[#allocation2 + $0x3a] sm:$0xff]  ;;  %v5424_v10 = vld [vmem:[#allocation2 + $0x52] sm:$0xff] }
  0x40   : > { %v5428_v11 = vld [vmem:[#allocation2 + $0x7a] sm:$0xff]  ;;  %v5432_v12 = vld [vmem:[#allocation2 + $0x6a] sm:$0xff]  ;;  %v5436_v13 = vld [vmem:[#allocation2 + $0x92] sm:$0xff] }
  0x41   : > { %709 = vrot.lane.b32.xlu1 %v5298_v41, %s5021_s14  ;;  %715 = vrot.lane.b32.xlu0 %v5302_v42, %s5021_s14  ;;  %v5440_v14 = vld [vmem:[#allocation2 + $0x82] sm:$0xff]  ;;  %v5444_v15 = vld [vmem:[#allocation2 + $0xaa] sm:$0xff]  ;;  %v5448_v16 = vld [vmem:[#allocation2 + $0x9a] sm:$0xff] }
  0x42   : > { %v5452_v17 = vld [vmem:[#allocation2 + $0xc2] sm:$0xff]  ;;  %v5456_v18 = vld [vmem:[#allocation2 + $0xb2] sm:$0xff]  ;;  %v5460_v19 = vld [vmem:[#allocation2 + $0xda] sm:$0xff] }
  0x43   : > { %v5464_v20 = vld [vmem:[#allocation2 + $0xca] sm:$0xff]  ;;  %v5468_v21 = vld [vmem:[#allocation2 + $0xf2] sm:$0xff]  ;;  %v5472_v22 = vld [vmem:[#allocation2 + $0xe2] sm:$0xff] }
  0x44   : > { %v5476_v23 = vld [vmem:[#allocation2 + $0x10a] sm:$0xff]  ;;  %v5480_v24 = vld [vmem:[#allocation2 + $0xfa] sm:$0xff]  ;;  %v5484_v28 = vld [vmem:[#allocation2 + $0x122] sm:$0xff] }
  0x45   : > { %713 = vrot.lane.b32.xlu1 %v5306_v43, %s5021_s14  ;;  %719 = vrot.lane.b32.xlu0 %v5310_v44, %s5021_s14  ;;  %v5488_v29 = vld [vmem:[#allocation2 + $0x112] sm:$0xff]  ;;  %v5492_v33 = vld [vmem:[#allocation2 + $0x13a] sm:$0xff]  ;;  %v5498_v35 = vld [vmem:[#allocation2 + $0x12a] sm:$0xff] }
  0x46   : > { %v5502_v36 = vld [vmem:[#allocation2 + $0x152] sm:$0xff]  ;;  %v5508_v39 = vld [vmem:[#allocation2 + $0x142] sm:$0xff]  ;;  %v5514_v62 = vld [vmem:[#allocation2 + $0x16a] sm:$0xff] }
  0x47   : > { %8316 = vst [vmem:[#allocation10_spill] sm:$0xff] %v5508_v39  ;;  %8318 = vst [vmem:[#allocation12_spill] sm:$0xff] %v5514_v62 }
  0x49   : > { %717 = vrot.lane.b32.xlu1 %v5314_v45, %s5021_s14  ;;  %723 = vrot.lane.b32.xlu0 %v5318_v46, %s5021_s14 }
  0x4d   : > { %721 = vrot.lane.b32.xlu1 %v5322_v47, %s5021_s14  ;;  %727 = vrot.lane.b32.xlu0 %v5326_v48, %s5021_s14 }
  0x51   : > { %725 = vrot.lane.b32.xlu1 %v5330_v49, %s5021_s14  ;;  %731 = vrot.lane.b32.xlu0 %v5334_v50, %s5021_s14 }
  0x55   : > { %729 = vrot.lane.b32.xlu1 %v5338_v51, %s5021_s14  ;;  %735 = vrot.lane.b32.xlu0 %v5342_v52, %s5021_s14 }
  0x59   : > { %733 = vrot.lane.b32.xlu1 %v5346_v53, %s5021_s14  ;;  %739 = vrot.lane.b32.xlu0 %v5350_v54, %s5021_s14 }
  0x5d   : > { %737 = vrot.lane.b32.xlu1 %v5354_v55, %s5021_s14  ;;  %743 = vrot.lane.b32.xlu0 %v5358_v56, %s5021_s14 }
  0x61   : > { %741 = vrot.lane.b32.xlu1 %v5370_v57, %s5021_s14  ;;  %747 = vrot.lane.b32.xlu0 %v5376_v59, %s5021_s14 }
  0x65   : > { %745 = vrot.lane.b32.xlu1 %v5380_v60, %s5021_s14  ;;  %751 = vrot.lane.b32.xlu0 %v5384_v61, %s5021_s14 }
  0x69   : > { %749 = vrot.lane.b32.xlu1 %v5390_v63, %s5021_s14  ;;  %819 = vrot.lane.b32.xlu0 %v434_v1, %s5022_s15 }
  0x6d   : > { %753 = vrot.lane.b32.xlu1 %v5396_v2, %s5021_s14  ;;  %823 = vrot.lane.b32.xlu0 %v5399_v3, %s5022_s15  ;;  %s7915_s14 = scalar_lea.vmem %s8273_s5, %s4634_s10  ;;  %s4557_s10 = sshll.u32 %s250_s9, 6 }
  0x71   : > { %821 = vrot.lane.b32.xlu1 %v435_v4, %s5022_s15  ;;  %827 = vrot.lane.b32.xlu0 %v5405_v5, %s5022_s15  ;;  %v5520_v4 = vld [vmem:[#allocation2 + $0x15a] sm:$0xff] }
  0x72   : > { %8320 = vst [vmem:[#allocation14_spill] sm:$0xff] %v5520_v4 }
  0x75   : > { %825 = vrot.lane.b32.xlu1 %v5408_v6, %s5022_s15  ;;  %831 = vrot.lane.b32.xlu0 %v5412_v7, %s5022_s15 }
  0x79   : > { %829 = vrot.lane.b32.xlu1 %v5416_v8, %s5022_s15  ;;  %835 = vrot.lane.b32.xlu0 %v5420_v9, %s5022_s15 }
  0x7d   : > { %833 = vrot.lane.b32.xlu1 %v5424_v10, %s5022_s15  ;;  %839 = vrot.lane.b32.xlu0 %v5428_v11, %s5022_s15 }
  0x81   : > { %837 = vrot.lane.b32.xlu1 %v5432_v12, %s5022_s15  ;;  %843 = vrot.lane.b32.xlu0 %v5436_v13, %s5022_s15 }
  0x85   : > { %841 = vrot.lane.b32.xlu1 %v5440_v14, %s5022_s15  ;;  %847 = vrot.lane.b32.xlu0 %v5444_v15, %s5022_s15 }
  0x89   : > { %845 = vrot.lane.b32.xlu1 %v5448_v16, %s5022_s15  ;;  %851 = vrot.lane.b32.xlu0 %v5452_v17, %s5022_s15 }
  0x8d   : > { %849 = vrot.lane.b32.xlu1 %v5456_v18, %s5022_s15  ;;  %855 = vrot.lane.b32.xlu0 %v5460_v19, %s5022_s15 }
  0x91   : > { %853 = vrot.lane.b32.xlu1 %v5464_v20, %s5022_s15  ;;  %859 = vrot.lane.b32.xlu0 %v5468_v21, %s5022_s15  ;;  %v5494_v34 = vpop.permute.xlu0 %691 }
  0x92   : > { %8314 = vst [vmem:[#allocation8_spill] sm:$0xff] %v5494_v34  ;;  %v5530_v34 = vld [vmem:[#allocation2 + $0x172] sm:$0xff] }
  0x93   : > { %8323 = vst [vmem:[#allocation17_spill] sm:$0xff] %v5530_v34 }
  0x95   : > { %857 = vrot.lane.b32.xlu1 %v5472_v22, %s5022_s15  ;;  %863 = vrot.lane.b32.xlu0 %v5476_v23, %s5022_s15  ;;  %v5504_v37 = vpop.permute.xlu0 %693 }
  0x96   : > { %8315 = vst [vmem:[#allocation9_spill] sm:$0xff] %v5504_v37 }
  0x99   : > { %861 = vrot.lane.b32.xlu1 %v5480_v24, %s5022_s15  ;;  %867 = vrot.lane.b32.xlu0 %v5484_v28, %s5022_s15 }
  0x9d   : > { %865 = vrot.lane.b32.xlu1 %v5488_v29, %s5022_s15  ;;  %871 = vrot.lane.b32.xlu0 %v5492_v33, %s5022_s15 }
  0xa1   : > { %869 = vrot.lane.b32.xlu1 %v5498_v35, %s5022_s15  ;;  %875 = vrot.lane.b32.xlu0 %v5502_v36, %s5022_s15 }
  0xa3   : > { %v5512_v58 = vpop.permute.xlu1 %695  ;;  %v5516_v1 = vpop.permute.xlu0 %699 }
  0xa4   : > { %8317 = vst [vmem:[#allocation11_spill] sm:$0xff] %v5512_v58  ;;  %8319 = vst [vmem:[#allocation13_spill] sm:$0xff] %v5516_v1  ;;  %v372_v58 = vld [vmem:[#allocation2 + $0x18] sm:$0xff] }
  0xa5   : > { %873 = vrot.lane.b32.xlu1 %v5508_v39, %s5022_s15  ;;  %879 = vrot.lane.b32.xlu0 %v5514_v62, %s5022_s15  ;;  %v5539_v62 = vld [vmem:[#allocation2 + $0x30] sm:$0xff] }
  0xa6   : > { %8326 = vst [vmem:[#allocation20_spill] sm:$0xff] %v5539_v62 }
  0xa7   : > { %v5524_v0 = vpop.permute.xlu1 %697  ;;  %v5526_v37 = vpop.permute.xlu0 %703 }
  0xa8   : > { %8321 = vst [vmem:[#allocation15_spill] sm:$0xff] %v5524_v0  ;;  %8322 = vst [vmem:[#allocation16_spill] sm:$0xff] %v5526_v37  ;;  %v373_v0 = vld [vmem:[#allocation2 + $0x20] sm:$0xff] }
  0xa9   : > { %877 = vrot.lane.b32.xlu1 %v5520_v4, %s5022_s15  ;;  %947 = vrot.lane.b32.xlu0 %v372_v58, %s5023_s16  ;;  %v5548_v58 = vld [vmem:[#allocation2 + $0x48] sm:$0xff] }
  0xaa   : > { %8329 = vst [vmem:[#allocation23_spill] sm:$0xff] %v5548_v58 }
  0xab   : > { %v5533_v1 = vpop.permute.xlu1 %701  ;;  %v5535_v39 = vpop.permute.xlu0 %707 }
  0xac   : > { %8324 = vst [vmem:[#allocation18_spill] sm:$0xff] %v5533_v1  ;;  %8325 = vst [vmem:[#allocation19_spill] sm:$0xff] %v5535_v39  ;;  %v5554_v1 = vld [vmem:[#allocation2 + $0x38] sm:$0xff] }
  0xad   : > { %881 = vrot.lane.b32.xlu1 %v5530_v34, %s5022_s15  ;;  %951 = vrot.lane.b32.xlu0 %v5539_v62, %s5023_s16  ;;  %8331 = vst [vmem:[#allocation25_spill] sm:$0xff] %v5554_v1 }
  0xaf   : > { %v5543_v37 = vpop.permute.xlu1 %705  ;;  %v5545_v4 = vpop.permute.xlu0 %711 }
  0xb0   : > { %8327 = vst [vmem:[#allocation21_spill] sm:$0xff] %v5543_v37  ;;  %8328 = vst [vmem:[#allocation22_spill] sm:$0xff] %v5545_v4  ;;  %v5560_v37 = vld [vmem:[#allocation2 + $0x60] sm:$0xff]  ;;  %v5566_v4 = vld [vmem:[#allocation2 + $0x50] sm:$0xff] }
  0xb1   : > { %949 = vrot.lane.b32.xlu1 %v373_v0, %s5023_s16  ;;  %955 = vrot.lane.b32.xlu0 %v5548_v58, %s5023_s16  ;;  %8333 = vst [vmem:[#allocation27_spill] sm:$0xff] %v5560_v37  ;;  %8335 = vst [vmem:[#allocation29_spill] sm:$0xff] %v5566_v4 }
  0xb3   : > { %v5552_v39 = vpop.permute.xlu1 %709  ;;  %v5556_v34 = vpop.permute.xlu0 %715 }
  0xb4   : > { %8330 = vst [vmem:[#allocation24_spill] sm:$0xff] %v5552_v39  ;;  %8332 = vst [vmem:[#allocation26_spill] sm:$0xff] %v5556_v34  ;;  %v5572_v39 = vld [vmem:[#allocation2 + $0x78] sm:$0xff] }
  0xb5   : > { %953 = vrot.lane.b32.xlu1 %v5554_v1, %s5023_s16  ;;  %959 = vrot.lane.b32.xlu0 %v5560_v37, %s5023_s16  ;;  %8337 = vst [vmem:[#allocation31_spill] sm:$0xff] %v5572_v39  ;;  %v5578_v1 = vld [vmem:[#allocation2 + $0x68] sm:$0xff] }
  0xb6   : > { %8339 = vst [vmem:[#allocation33_spill] sm:$0xff] %v5578_v1 }
  0xb7   : > { %v5564_v0 = vpop.permute.xlu1 %713  ;;  %v5568_v62 = vpop.permute.xlu0 %719 }
  0xb8   : > { %8334 = vst [vmem:[#allocation28_spill] sm:$0xff] %v5564_v0  ;;  %8336 = vst [vmem:[#allocation30_spill] sm:$0xff] %v5568_v62  ;;  %v5584_v0 = vld [vmem:[#allocation2 + $0x90] sm:$0xff] }
  0xb9   : > { %957 = vrot.lane.b32.xlu1 %v5566_v4, %s5023_s16  ;;  %963 = vrot.lane.b32.xlu0 %v5572_v39, %s5023_s16  ;;  %8341 = vst [vmem:[#allocation35_spill] sm:$0xff] %v5584_v0  ;;  %v5590_v4 = vld [vmem:[#allocation2 + $0x80] sm:$0xff] }
  0xba   : > { %8343 = vst [vmem:[#allocation37_spill] sm:$0xff] %v5590_v4 }
  0xbb   : > { %v5576_v34 = vpop.permute.xlu1 %717  ;;  %v5580_v58 = vpop.permute.xlu0 %723 }
  0xbc   : > { %8338 = vst [vmem:[#allocation32_spill] sm:$0xff] %v5576_v34  ;;  %8340 = vst [vmem:[#allocation34_spill] sm:$0xff] %v5580_v58  ;;  %v5596_v34 = vld [vmem:[#allocation2 + $0xa8] sm:$0xff] }
  0xbd   : > { %961 = vrot.lane.b32.xlu1 %v5578_v1, %s5023_s16  ;;  %967 = vrot.lane.b32.xlu0 %v5584_v0, %s5023_s16  ;;  %8345 = vst [vmem:[#allocation39_spill] sm:$0xff] %v5596_v34  ;;  %v5602_v1 = vld [vmem:[#allocation2 + $0x98] sm:$0xff] }
  0xbe   : > { %8347 = vst [vmem:[#allocation41_spill] sm:$0xff] %v5602_v1 }
  0xbf   : > { %v5588_v62 = vpop.permute.xlu1 %721  ;;  %v5592_v37 = vpop.permute.xlu0 %727 }
  0xc0   : > { %8342 = vst [vmem:[#allocation36_spill] sm:$0xff] %v5588_v62  ;;  %8344 = vst [vmem:[#allocation38_spill] sm:$0xff] %v5592_v37  ;;  %v5608_v62 = vld [vmem:[#allocation2 + $0xc0] sm:$0xff] }
  0xc1   : > { %965 = vrot.lane.b32.xlu1 %v5590_v4, %s5023_s16  ;;  %971 = vrot.lane.b32.xlu0 %v5596_v34, %s5023_s16  ;;  %8349 = vst [vmem:[#allocation43_spill] sm:$0xff] %v5608_v62  ;;  %v5614_v4 = vld [vmem:[#allocation2 + $0xb0] sm:$0xff] }
  0xc2   : > { %8351 = vst [vmem:[#allocation45_spill] sm:$0xff] %v5614_v4 }
  0xc3   : > { %v5600_v58 = vpop.permute.xlu1 %725  ;;  %v5604_v39 = vpop.permute.xlu0 %731 }
  0xc4   : > { %8346 = vst [vmem:[#allocation40_spill] sm:$0xff] %v5600_v58  ;;  %8348 = vst [vmem:[#allocation42_spill] sm:$0xff] %v5604_v39  ;;  %v5620_v58 = vld [vmem:[#allocation2 + $0xd8] sm:$0xff] }
  0xc5   : > { %969 = vrot.lane.b32.xlu1 %v5602_v1, %s5023_s16  ;;  %975 = vrot.lane.b32.xlu0 %v5608_v62, %s5023_s16  ;;  %8353 = vst [vmem:[#allocation47_spill] sm:$0xff] %v5620_v58  ;;  %v5626_v1 = vld [vmem:[#allocation2 + $0xc8] sm:$0xff] }
  0xc6   : > { %8355 = vst [vmem:[#allocation49_spill] sm:$0xff] %v5626_v1 }
  0xc7   : > { %v5612_v37 = vpop.permute.xlu1 %729  ;;  %v5616_v0 = vpop.permute.xlu0 %735 }
  0xc8   : > { %8350 = vst [vmem:[#allocation44_spill] sm:$0xff] %v5612_v37  ;;  %8352 = vst [vmem:[#allocation46_spill] sm:$0xff] %v5616_v0  ;;  %v5632_v37 = vld [vmem:[#allocation2 + $0xf0] sm:$0xff] }
  0xc9   : > { %973 = vrot.lane.b32.xlu1 %v5614_v4, %s5023_s16  ;;  %979 = vrot.lane.b32.xlu0 %v5620_v58, %s5023_s16  ;;  %8357 = vst [vmem:[#allocation51_spill] sm:$0xff] %v5632_v37  ;;  %v5638_v4 = vld [vmem:[#allocation2 + $0xe0] sm:$0xff] }
  0xca   : > { %8359 = vst [vmem:[#allocation53_spill] sm:$0xff] %v5638_v4 }
  0xcb   : > { %v5624_v39 = vpop.permute.xlu1 %733  ;;  %v5628_v34 = vpop.permute.xlu0 %739 }
  0xcc   : > { %8354 = vst [vmem:[#allocation48_spill] sm:$0xff] %v5624_v39  ;;  %8356 = vst [vmem:[#allocation50_spill] sm:$0xff] %v5628_v34  ;;  %v5644_v39 = vld [vmem:[#allocation2 + $0x108] sm:$0xff] }
  0xcd   : > { %977 = vrot.lane.b32.xlu1 %v5626_v1, %s5023_s16  ;;  %983 = vrot.lane.b32.xlu0 %v5632_v37, %s5023_s16  ;;  %8361 = vst [vmem:[#allocation55_spill] sm:$0xff] %v5644_v39  ;;  %v5650_v1 = vld [vmem:[#allocation2 + $0xf8] sm:$0xff] }
  0xce   : > { %8363 = vst [vmem:[#allocation57_spill] sm:$0xff] %v5650_v1 }
  0xcf   : > { %v5636_v0 = vpop.permute.xlu1 %737  ;;  %v5640_v62 = vpop.permute.xlu0 %743 }
  0xd0   : > { %8358 = vst [vmem:[#allocation52_spill] sm:$0xff] %v5636_v0  ;;  %8360 = vst [vmem:[#allocation54_spill] sm:$0xff] %v5640_v62  ;;  %v5656_v0 = vld [vmem:[#allocation2 + $0x120] sm:$0xff] }
  0xd1   : > { %981 = vrot.lane.b32.xlu1 %v5638_v4, %s5023_s16  ;;  %987 = vrot.lane.b32.xlu0 %v5644_v39, %s5023_s16  ;;  %8365 = vst [vmem:[#allocation59_spill] sm:$0xff] %v5656_v0  ;;  %v5662_v4 = vld [vmem:[#allocation2 + $0x110] sm:$0xff] }
  0xd2   : > { %8367 = vst [vmem:[#allocation61_spill] sm:$0xff] %v5662_v4 }
  0xd3   : > { %v5648_v34 = vpop.permute.xlu1 %741  ;;  %v5652_v58 = vpop.permute.xlu0 %747 }
  0xd4   : > { %8362 = vst [vmem:[#allocation56_spill] sm:$0xff] %v5648_v34  ;;  %8364 = vst [vmem:[#allocation58_spill] sm:$0xff] %v5652_v58  ;;  %v5668_v34 = vld [vmem:[#allocation2 + $0x138] sm:$0xff] }
  0xd5   : > { %985 = vrot.lane.b32.xlu1 %v5650_v1, %s5023_s16  ;;  %991 = vrot.lane.b32.xlu0 %v5656_v0, %s5023_s16  ;;  %8369 = vst [vmem:[#allocation63_spill] sm:$0xff] %v5668_v34  ;;  %v5674_v1 = vld [vmem:[#allocation2 + $0x128] sm:$0xff] }
  0xd6   : > { %8371 = vst [vmem:[#allocation65_spill] sm:$0xff] %v5674_v1 }
  0xd7   : > { %v5660_v62 = vpop.permute.xlu1 %745  ;;  %v5664_v37 = vpop.permute.xlu0 %751 }
  0xd8   : > { %8366 = vst [vmem:[#allocation60_spill] sm:$0xff] %v5660_v62  ;;  %8368 = vst [vmem:[#allocation62_spill] sm:$0xff] %v5664_v37  ;;  %v5680_v62 = vld [vmem:[#allocation2 + $0x150] sm:$0xff] }
  0xd9   : > { %989 = vrot.lane.b32.xlu1 %v5662_v4, %s5023_s16  ;;  %995 = vrot.lane.b32.xlu0 %v5668_v34, %s5023_s16  ;;  %8373 = vst [vmem:[#allocation67_spill] sm:$0xff] %v5680_v62  ;;  %v5686_v4 = vld [vmem:[#allocation2 + $0x140] sm:$0xff] }
  0xda   : > { %8375 = vst [vmem:[#allocation69_spill] sm:$0xff] %v5686_v4  ;;  %v5700_v34 = vld [vmem:[#allocation2 + $0x180] sm:$0xff] }
  0xdb   : > { %v5672_v58 = vpop.permute.xlu1 %749  ;;  %v5676_v39 = vpop.permute.xlu0 %819 }
  0xdc   : > { %8370 = vst [vmem:[#allocation64_spill] sm:$0xff] %v5672_v58  ;;  %8372 = vst [vmem:[#allocation66_spill] sm:$0xff] %v5676_v39  ;;  %v5692_v58 = vld [vmem:[#allocation2 + $0x168] sm:$0xff] }
  0xdd   : > { %993 = vrot.lane.b32.xlu1 %v5674_v1, %s5023_s16  ;;  %999 = vrot.lane.b32.xlu0 %v5680_v62, %s5023_s16  ;;  %v5698_v1 = vld [vmem:[#allocation2 + $0x158] sm:$0xff] }
  0xde   : > { %8378 = vst [vmem:[#allocation72_spill] sm:$0xff] %v5698_v1 }
  0xdf   : > { %v5684_v37 = vpop.permute.xlu1 %753  ;;  %v5688_v0 = vpop.permute.xlu0 %823 }
  0xe0   : > { %8374 = vst [vmem:[#allocation68_spill] sm:$0xff] %v5684_v37  ;;  %8376 = vst [vmem:[#allocation70_spill] sm:$0xff] %v5688_v0  ;;  %v5710_v0 = vld [vmem:[#allocation2 + $0x170] sm:$0xff] }
  0xe1   : > { %997 = vrot.lane.b32.xlu1 %v5686_v4, %s5023_s16  ;;  %1003 = vrot.lane.b32.xlu0 %v5692_v58, %s5023_s16 }
  0xe3   : > { %v5696_v39 = vpop.permute.xlu1 %821  ;;  %v5702_v62 = vpop.permute.xlu0 %827 }
  0xe4   : > { %8377 = vst [vmem:[#allocation71_spill] sm:$0xff] %v5696_v39  ;;  %8379 = vst [vmem:[#allocation73_spill] sm:$0xff] %v5702_v62  ;;  %v5716_v39 = vld [vmem:[#allocation2 + $0x188] sm:$0xff] }
  0xe5   : > { %1001 = vrot.lane.b32.xlu1 %v5698_v1, %s5023_s16  ;;  %1007 = vrot.lane.b32.xlu0 %v5700_v34, %s5023_s16 }
  0xe7   : > { %v5708_v37 = vpop.permute.xlu1 %825  ;;  %v5712_v4 = vpop.permute.xlu0 %831 }
  0xe8   : > { %8380 = vst [vmem:[#allocation74_spill] sm:$0xff] %v5708_v37  ;;  %8381 = vst [vmem:[#allocation75_spill] sm:$0xff] %v5712_v4 }
  0xe9   : > { %1005 = vrot.lane.b32.xlu1 %v5710_v0, %s5023_s16  ;;  %1075 = vrot.lane.b32.xlu0 %v5249_v25, %s5024_s17 }
  0xeb   : > { %v5720_v62 = vpop.permute.xlu1 %829  ;;  %v5722_v1 = vpop.permute.xlu0 %835 }
  0xec   : > { %8382 = vst [vmem:[#allocation76_spill] sm:$0xff] %v5720_v62  ;;  %8383 = vst [vmem:[#allocation77_spill] sm:$0xff] %v5722_v1 }
  0xed   : > { %1009 = vrot.lane.b32.xlu1 %v5716_v39, %s5023_s16  ;;  %1079 = vrot.lane.b32.xlu0 %v5251_v26, %s5024_s17  ;;  %s8013_s16 = scalar_lea.vmem [#allocation5], %s4557_s10 }
  0xef   : > { %v5728_v4 = vpop.permute.xlu1 %833  ;;  %v5730_v37 = vpop.permute.xlu0 %839 }
  0xf1   : > { %1077 = vrot.lane.b32.xlu1 %v5258_v27, %s5024_s17  ;;  %1083 = vrot.lane.b32.xlu0 %v5266_v30, %s5024_s17 }
  0xf3   : > { %v5736_v25 = vpop.permute.xlu1 %837  ;;  %v5738_v62 = vpop.permute.xlu0 %843 }
  0xf4   : > { %8384 = vst [vmem:[#allocation78_spill] sm:$0xff] %v5738_v62 }
  0xf5   : > { %1081 = vrot.lane.b32.xlu1 %v5270_v31, %s5024_s17  ;;  %1087 = vrot.lane.b32.xlu0 %v5274_v32, %s5024_s17 }
  0xf7   : > { %v5744_v26 = vpop.permute.xlu1 %841  ;;  %v5746_v1 = vpop.permute.xlu0 %847 }
  0xf8   : > { %8385 = vst [vmem:[#allocation79_spill] sm:$0xff] %v5746_v1 }
  0xf9   : > { %1085 = vrot.lane.b32.xlu1 %v5286_v38, %s5024_s17  ;;  %1091 = vrot.lane.b32.xlu0 %v5294_v40, %s5024_s17 }
  0xfb   : > { %v5752_v27 = vpop.permute.xlu1 %845  ;;  %v5754_v30 = vpop.permute.xlu0 %851 }
  0xfc   : > { %8386 = vst [vmem:[#allocation80_spill] sm:$0xff] %v5752_v27  ;;  %8387 = vst [vmem:[#allocation81_spill] sm:$0xff] %v5754_v30  ;;  %v616_v27 = vld [vmem:[#allocation2 + $0x129] sm:$0xff] }
  0xfd   : > { %1089 = vrot.lane.b32.xlu1 %v5298_v41, %s5024_s17  ;;  %1095 = vrot.lane.b32.xlu0 %v5302_v42, %s5024_s17 }
  0xff   : > { %v5760_v31 = vpop.permute.xlu1 %849  ;;  %v5762_v32 = vpop.permute.xlu0 %855 }
 0x100   : > { %8388 = vst [vmem:[#allocation82_spill] sm:$0xff] %v5760_v31  ;;  %8389 = vst [vmem:[#allocation83_spill] sm:$0xff] %v5762_v32  ;;  %v628_v32 = vld [vmem:[#allocation2 + $0x3a] sm:$0xff] }
 0x101   : > { %1093 = vrot.lane.b32.xlu1 %v5306_v43, %s5024_s17  ;;  %1099 = vrot.lane.b32.xlu0 %v5310_v44, %s5024_s17 }
 0x103   : > { %v5768_v38 = vpop.permute.xlu1 %853  ;;  %v5770_v40 = vpop.permute.xlu0 %859 }
 0x104   : > { %8390 = vst [vmem:[#allocation84_spill] sm:$0xff] %v5768_v38  ;;  %8391 = vst [vmem:[#allocation85_spill] sm:$0xff] %v5770_v40  ;;  %v600_v38 = vld [vmem:[#allocation2 + $0x69] sm:$0xff] }
 0x105   : > { %1097 = vrot.lane.b32.xlu1 %v5314_v45, %s5024_s17  ;;  %1103 = vrot.lane.b32.xlu0 %v5318_v46, %s5024_s17 }
 0x107   : > { %v5776_v41 = vpop.permute.xlu1 %857  ;;  %v5778_v42 = vpop.permute.xlu0 %863 }
 0x108   : > { %8392 = vst [vmem:[#allocation86_spill] sm:$0xff] %v5776_v41  ;;  %8393 = vst [vmem:[#allocation87_spill] sm:$0xff] %v5778_v42 }
 0x109   : > { %1101 = vrot.lane.b32.xlu1 %v5322_v47, %s5024_s17  ;;  %1107 = vrot.lane.b32.xlu0 %v5326_v48, %s5024_s17 }
 0x10b   : > { %v5784_v43 = vpop.permute.xlu1 %861  ;;  %v5786_v44 = vpop.permute.xlu0 %867 }
 0x10c   : > { %8394 = vst [vmem:[#allocation88_spill] sm:$0xff] %v5784_v43  ;;  %8395 = vst [vmem:[#allocation89_spill] sm:$0xff] %v5786_v44  ;;  %v8433_v44 = vld [vmem:[#allocation29_spill] sm:$0xff] }
 0x10d   : > { %1105 = vrot.lane.b32.xlu1 %v5330_v49, %s5024_s17  ;;  %1111 = vrot.lane.b32.xlu0 %v5334_v50, %s5024_s17  ;;  %v8444_v43 = vld [vmem:[#allocation41_spill] sm:$0xff] }
 0x10f   : > { %v5792_v45 = vpop.permute.xlu1 %865  ;;  %v5794_v46 = vpop.permute.xlu0 %871 }
 0x110   : > { %8396 = vst [vmem:[#allocation90_spill] sm:$0xff] %v5792_v45  ;;  %8397 = vst [vmem:[#allocation91_spill] sm:$0xff] %v5794_v46  ;;  %v8436_v45 = vld [vmem:[#allocation33_spill] sm:$0xff] }
 0x111   : > { %1109 = vrot.lane.b32.xlu1 %v5338_v51, %s5024_s17  ;;  %1115 = vrot.lane.b32.xlu0 %v5342_v52, %s5024_s17 }
 0x113   : > { %v5800_v47 = vpop.permute.xlu1 %869  ;;  %v5802_v48 = vpop.permute.xlu0 %875 }
 0x114   : > { %8398 = vst [vmem:[#allocation92_spill] sm:$0xff] %v5800_v47  ;;  %8399 = vst [vmem:[#allocation93_spill] sm:$0xff] %v5802_v48 }
 0x115   : > { %1113 = vrot.lane.b32.xlu1 %v5346_v53, %s5024_s17  ;;  %1119 = vrot.lane.b32.xlu0 %v5350_v54, %s5024_s17 }
 0x117   : > { %v5808_v49 = vpop.permute.xlu1 %873  ;;  %v5810_v50 = vpop.permute.xlu0 %879 }
 0x118   : > { %8400 = vst [vmem:[#allocation94_spill] sm:$0xff] %v5808_v49  ;;  %8401 = vst [vmem:[#allocation95_spill] sm:$0xff] %v5810_v50 }
 0x119   : > { %1117 = vrot.lane.b32.xlu1 %v5354_v55, %s5024_s17  ;;  %1123 = vrot.lane.b32.xlu0 %v5358_v56, %s5024_s17  ;;  %v5834_v56 = vld [vmem:[#allocation2 + $0x181] sm:$0xff] }
 0x11b   : > { %v5816_v51 = vpop.permute.xlu1 %877  ;;  %v5818_v52 = vpop.permute.xlu0 %947 }
 0x11c   : > { %8402 = vst [vmem:[#allocation96_spill] sm:$0xff] %v5816_v51 }
 0x11d   : > { %1121 = vrot.lane.b32.xlu1 %v5370_v57, %s5024_s17  ;;  %1127 = vrot.lane.b32.xlu0 %v5376_v59, %s5024_s17 }
 0x11f   : > { %v5824_v53 = vpop.permute.xlu1 %881  ;;  %v5826_v54 = vpop.permute.xlu0 %951 }
 0x120   : > { %8403 = vst [vmem:[#allocation97_spill] sm:$0xff] %v5824_v53 }
 0x121   : > { %1125 = vrot.lane.b32.xlu1 %v5380_v60, %s5024_s17  ;;  %1131 = vrot.lane.b32.xlu0 %v5384_v61, %s5024_s17  ;;  %v5848_v60 = vld [vmem:[#allocation2 + $0x189] sm:$0xff] }
 0x123   : > { %v5832_v55 = vpop.permute.xlu1 %949  ;;  %v5836_v50 = vpop.permute.xlu0 %955 }
 0x125   : > { %1129 = vrot.lane.b32.xlu1 %v5390_v63, %s5024_s17  ;;  %1135 = vrot.lane.b32.xlu0 %v5834_v56, %s5024_s17 }
 0x127   : > { %v5842_v57 = vpop.permute.xlu1 %953  ;;  %v5844_v59 = vpop.permute.xlu0 %959 }
 0x129   : > { %1133 = vrot.lane.b32.xlu1 %v5396_v2, %s5024_s17  ;;  %1203 = vrot.lane.b32.xlu0 %v5399_v3, %s5025_s18 }
 0x12b   : > { %v5852_v61 = vpop.permute.xlu1 %957  ;;  %v5854_v53 = vpop.permute.xlu0 %963 }
 0x12d   : > { %1137 = vrot.lane.b32.xlu1 %v5848_v60, %s5024_s17  ;;  %1207 = vrot.lane.b32.xlu0 %v5405_v5, %s5025_s18 }
 0x12f   : > { %v5860_v63 = vpop.permute.xlu1 %961  ;;  %v5862_v51 = vpop.permute.xlu0 %967 }
 0x131   : > { %1205 = vrot.lane.b32.xlu1 %v5408_v6, %s5025_s18  ;;  %1211 = vrot.lane.b32.xlu0 %v5412_v7, %s5025_s18 }
 0x133   : > { %v5868_v2 = vpop.permute.xlu1 %965  ;;  %v5870_v3 = vpop.permute.xlu0 %971 }
 0x134   : > { %8404 = vst [vmem:[#allocation98_spill] sm:$0xff] %v5870_v3 }
 0x135   : > { %1209 = vrot.lane.b32.xlu1 %v5416_v8, %s5025_s18  ;;  %1215 = vrot.lane.b32.xlu0 %v5420_v9, %s5025_s18 }
 0x137   : > { %v5876_v5 = vpop.permute.xlu1 %969  ;;  %v5878_v48 = vpop.permute.xlu0 %975 }
 0x138   : > { %8405 = vst [vmem:[#allocation99_spill] sm:$0xff] %v5878_v48 }
 0x139   : > { %1213 = vrot.lane.b32.xlu1 %v5424_v10, %s5025_s18  ;;  %1219 = vrot.lane.b32.xlu0 %v5428_v11, %s5025_s18 }
 0x13b   : > { %v5884_v6 = vpop.permute.xlu1 %973  ;;  %v5886_v7 = vpop.permute.xlu0 %979 }
 0x13c   : > { %8406 = vst [vmem:[#allocation100_spill] sm:$0xff] %v5884_v6  ;;  %8407 = vst [vmem:[#allocation101_spill] sm:$0xff] %v5886_v7  ;;  %v646_v6 = vld [vmem:[#allocation2 + $0x112] sm:$0xff] }
 0x13d   : > { %1217 = vrot.lane.b32.xlu1 %v5432_v12, %s5025_s18  ;;  %1223 = vrot.lane.b32.xlu0 %v5436_v13, %s5025_s18 }
 0x13f   : > { %v5892_v8 = vpop.permute.xlu1 %977  ;;  %v5894_v9 = vpop.permute.xlu0 %983 }
 0x140   : > { %8408 = vst [vmem:[#allocation102_spill] sm:$0xff] %v5892_v8  ;;  %8409 = vst [vmem:[#allocation103_spill] sm:$0xff] %v5894_v9  ;;  %v602_v8 = vld [vmem:[#allocation2 + $0x81] sm:$0xff] }
 0x141   : > { %1221 = vrot.lane.b32.xlu1 %v5440_v14, %s5025_s18  ;;  %1227 = vrot.lane.b32.xlu0 %v5444_v15, %s5025_s18 }
 0x143   : > { %v5900_v10 = vpop.permute.xlu1 %981  ;;  %v5902_v11 = vpop.permute.xlu0 %987 }
 0x144   : > { %8410 = vst [vmem:[#allocation104_spill] sm:$0xff] %v5900_v10  ;;  %8411 = vst [vmem:[#allocation105_spill] sm:$0xff] %v5902_v11  ;;  %v630_v10 = vld [vmem:[#allocation2 + $0x52] sm:$0xff] }
 0x145   : > { %1225 = vrot.lane.b32.xlu1 %v5448_v16, %s5025_s18  ;;  %1231 = vrot.lane.b32.xlu0 %v5452_v17, %s5025_s18 }
 0x147   : > { %v5908_v12 = vpop.permute.xlu1 %985  ;;  %v5910_v13 = vpop.permute.xlu0 %991 }
 0x148   : > { %8412 = vst [vmem:[#allocation106_spill] sm:$0xff] %v5908_v12  ;;  %8413 = vst [vmem:[#allocation107_spill] sm:$0xff] %v5910_v13  ;;  %v8448_v12 = vld [vmem:[#allocation45_spill] sm:$0xff] }
 0x149   : > { %1229 = vrot.lane.b32.xlu1 %v5456_v18, %s5025_s18  ;;  %1235 = vrot.lane.b32.xlu0 %v5460_v19, %s5025_s18 }
 0x14b   : > { %v5916_v14 = vpop.permute.xlu1 %989  ;;  %v5918_v15 = vpop.permute.xlu0 %995 }
 0x14c   : > { %8414 = vst [vmem:[#allocation108_spill] sm:$0xff] %v5916_v14  ;;  %8415 = vst [vmem:[#allocation109_spill] sm:$0xff] %v5918_v15  ;;  %v8431_v15 = vld [vmem:[#allocation27_spill] sm:$0xff]  ;;  %v8440_v14 = vld [vmem:[#allocation37_spill] sm:$0xff] }
 0x14d   : > { %1233 = vrot.lane.b32.xlu1 %v5464_v20, %s5025_s18  ;;  %1239 = vrot.lane.b32.xlu0 %v5468_v21, %s5025_s18 }
 0x14f   : > { %v5924_v16 = vpop.permute.xlu1 %993  ;;  %v5926_v17 = vpop.permute.xlu0 %999 }
 0x150   : > { %8416 = vst [vmem:[#allocation110_spill] sm:$0xff] %v5924_v16  ;;  %8417 = vst [vmem:[#allocation111_spill] sm:$0xff] %v5926_v17  ;;  %v8434_v16 = vld [vmem:[#allocation31_spill] sm:$0xff] }
 0x151   : > { %1237 = vrot.lane.b32.xlu1 %v5472_v22, %s5025_s18  ;;  %1243 = vrot.lane.b32.xlu0 %v5476_v23, %s5025_s18 }
 0x153   : > { %v5932_v18 = vpop.permute.xlu1 %997  ;;  %v5934_v19 = vpop.permute.xlu0 %1003 }
 0x154   : > { %8418 = vst [vmem:[#allocation112_spill] sm:$0xff] %v5932_v18  ;;  %8419 = vst [vmem:[#allocation113_spill] sm:$0xff] %v5934_v19 }
 0x155   : > { %1241 = vrot.lane.b32.xlu1 %v5480_v24, %s5025_s18  ;;  %1247 = vrot.lane.b32.xlu0 %v5484_v28, %s5025_s18 }
 0x157   : > { %v5940_v20 = vpop.permute.xlu1 %1001  ;;  %v5942_v21 = vpop.permute.xlu0 %1007 }
 0x158   : > { %8420 = vst [vmem:[#allocation114_spill] sm:$0xff] %v5940_v20  ;;  %8421 = vst [vmem:[#allocation115_spill] sm:$0xff] %v5942_v21  ;;  %v8424_v21 = vld [vmem:[#allocation10_spill] sm:$0xff]  ;;  %v8428_v20 = vld [vmem:[#allocation20_spill] sm:$0xff] }
 0x159   : > { %1245 = vrot.lane.b32.xlu1 %v5488_v29, %s5025_s18  ;;  %1251 = vrot.lane.b32.xlu0 %v5492_v33, %s5025_s18  ;;  %v8425_v29 = vld [vmem:[#allocation12_spill] sm:$0xff] }
 0x15b   : > { %v5948_v22 = vpop.permute.xlu1 %1005  ;;  %v5950_v23 = vpop.permute.xlu0 %1075 }
 0x15c   : > { %8422 = vst [vmem:[#allocation116_spill] sm:$0xff] %v5948_v22  ;;  %v5966_v22 = vld [vmem:[#allocation2 + $0x182] sm:$0xff] }
 0x15d   : > { %1249 = vrot.lane.b32.xlu1 %v5498_v35, %s5025_s18  ;;  %1255 = vrot.lane.b32.xlu0 %v5502_v36, %s5025_s18  ;;  %v8426_v35 = vld [vmem:[#allocation14_spill] sm:$0xff] }
 0x15f   : > { %v5956_v24 = vpop.permute.xlu1 %1009  ;;  %v5958_v28 = vpop.permute.xlu0 %1079 }
 0x160   : > { %8423 = vst [vmem:[#allocation117_spill] sm:$0xff] %v5956_v24 }
 0x161   : > { %1253 = vrot.lane.b32.xlu1 %v8424_v21, %s5025_s18  ;;  %1259 = vrot.lane.b32.xlu0 %v8425_v29, %s5025_s18  ;;  %v8427_v21 = vld [vmem:[#allocation17_spill] sm:$0xff] }
 0x162   : > { %v5980_v29 = vld [vmem:[#allocation2 + $0x18a] sm:$0xff] }
 0x163   : > { %v5964_v33 = vpop.permute.xlu1 %1077  ;;  %v5968_v19 = vpop.permute.xlu0 %1083 }
 0x165   : > { %1257 = vrot.lane.b32.xlu1 %v8426_v35, %s5025_s18  ;;  %1263 = vrot.lane.b32.xlu0 %v5966_v22, %s5025_s18  ;;  %v8429_v35 = vld [vmem:[#allocation23_spill] sm:$0xff] }
 0x167   : > { %v5974_v36 = vpop.permute.xlu1 %1081  ;;  %v5976_v24 = vpop.permute.xlu0 %1087 }
 0x169   : > { %1261 = vrot.lane.b32.xlu1 %v8427_v21, %s5025_s18  ;;  %1331 = vrot.lane.b32.xlu0 %v8428_v20, %s5026_s19  ;;  %v8430_v21 = vld [vmem:[#allocation25_spill] sm:$0xff] }
 0x16b   : > { %v5984_v17 = vpop.permute.xlu1 %1085  ;;  %v5986_v49 = vpop.permute.xlu0 %1091 }
 0x16d   : > { %1265 = vrot.lane.b32.xlu1 %v5980_v29, %s5025_s18  ;;  %1335 = vrot.lane.b32.xlu0 %v8429_v35, %s5026_s19  ;;  %s4636_s18 = sshll.u32 %s5091_s25, 10  ;;  %s8226_s25 = scalar_lea.sflag [#allocation6], %s250_s9 }
 0x16f   : > { %v5992_v46 = vpop.permute.xlu1 %1089  ;;  %v5994_v18 = vpop.permute.xlu0 %1095 }
 0x171   : > { %1333 = vrot.lane.b32.xlu1 %v8430_v21, %s5026_s19  ;;  %1339 = vrot.lane.b32.xlu0 %v8431_v15, %s5026_s19  ;;  %v8437_v21 = vld [vmem:[#allocation35_spill] sm:$0xff] }
 0x173   : > { %v6000_v20 = vpop.permute.xlu1 %1093  ;;  %v6002_v47 = vpop.permute.xlu0 %1099 }
 0x174   : > { %8432 = vst [vmem:[#allocation10_spill] sm:$0xff] %v6002_v47 }
 0x175   : > { %1337 = vrot.lane.b32.xlu1 %v8433_v44, %s5026_s19  ;;  %1343 = vrot.lane.b32.xlu0 %v8434_v16, %s5026_s19  ;;  %v8441_v44 = vld [vmem:[#allocation39_spill] sm:$0xff] }
 0x177   : > { %v6008_v35 = vpop.permute.xlu1 %1097  ;;  %v6010_v13 = vpop.permute.xlu0 %1103 }
 0x178   : > { %8435 = vst [vmem:[#allocation12_spill] sm:$0xff] %v6010_v13 }
 0x179   : > { %1341 = vrot.lane.b32.xlu1 %v8436_v45, %s5026_s19  ;;  %1347 = vrot.lane.b32.xlu0 %v8437_v21, %s5026_s19  ;;  %v8445_v45 = vld [vmem:[#allocation43_spill] sm:$0xff] }
 0x17b   : > { %v6016_v15 = vpop.permute.xlu1 %1101  ;;  %v6018_v42 = vpop.permute.xlu0 %1107 }
 0x17c   : > { %8438 = vst [vmem:[#allocation14_spill] sm:$0xff] %v6016_v15  ;;  %8439 = vst [vmem:[#allocation17_spill] sm:$0xff] %v6018_v42  ;;  %v614_v15 = vld [vmem:[#allocation2 + $0x111] sm:$0xff] }
 0x17d   : > { %1345 = vrot.lane.b32.xlu1 %v8440_v14, %s5026_s19  ;;  %1351 = vrot.lane.b32.xlu0 %v8441_v44, %s5026_s19  ;;  %v8449_v14 = vld [vmem:[#allocation47_spill] sm:$0xff] }
 0x17f   : > { %v6024_v16 = vpop.permute.xlu1 %1105  ;;  %v6026_v11 = vpop.permute.xlu0 %1111 }
 0x180   : > { %8442 = vst [vmem:[#allocation20_spill] sm:$0xff] %v6024_v16  ;;  %8443 = vst [vmem:[#allocation23_spill] sm:$0xff] %v6026_v11  ;;  %v8452_v11 = vld [vmem:[#allocation49_spill] sm:$0xff] }
 0x181   : > { %1349 = vrot.lane.b32.xlu1 %v8444_v43, %s5026_s19  ;;  %1355 = vrot.lane.b32.xlu0 %v8445_v45, %s5026_s19  ;;  %v8453_v43 = vld [vmem:[#allocation51_spill] sm:$0xff]  ;;  %v632_v16 = vld [vmem:[#allocation2 + $0x6a] sm:$0xff] }
 0x183   : > { %v6032_v21 = vpop.permute.xlu1 %1109  ;;  %v6034_v40 = vpop.permute.xlu0 %1115 }
 0x184   : > { %8446 = vst [vmem:[#allocation25_spill] sm:$0xff] %v6032_v21  ;;  %8447 = vst [vmem:[#allocation27_spill] sm:$0xff] %v6034_v40  ;;  %v8456_v40 = vld [vmem:[#allocation53_spill] sm:$0xff] }
 0x185   : > { %1353 = vrot.lane.b32.xlu1 %v8448_v12, %s5026_s19  ;;  %1359 = vrot.lane.b32.xlu0 %v8449_v14, %s5026_s19  ;;  %v8457_v12 = vld [vmem:[#allocation55_spill] sm:$0xff] }
 0x187   : > { %v6040_v44 = vpop.permute.xlu1 %1113  ;;  %v6042_v9 = vpop.permute.xlu0 %1119 }
 0x188   : > { %8450 = vst [vmem:[#allocation29_spill] sm:$0xff] %v6040_v44  ;;  %8451 = vst [vmem:[#allocation31_spill] sm:$0xff] %v6042_v9  ;;  %v8460_v9 = vld [vmem:[#allocation57_spill] sm:$0xff] }
 0x189   : > { %1357 = vrot.lane.b32.xlu1 %v8452_v11, %s5026_s19  ;;  %1363 = vrot.lane.b32.xlu0 %v8453_v43, %s5026_s19  ;;  %v8461_v11 = vld [vmem:[#allocation59_spill] sm:$0xff] }
 0x18b   : > { %v6048_v45 = vpop.permute.xlu1 %1117  ;;  %v6050_v41 = vpop.permute.xlu0 %1123 }
 0x18c   : > { %8454 = vst [vmem:[#allocation33_spill] sm:$0xff] %v6048_v45  ;;  %8455 = vst [vmem:[#allocation35_spill] sm:$0xff] %v6050_v41  ;;  %v8464_v41 = vld [vmem:[#allocation61_spill] sm:$0xff] }
 0x18d   : > { %1361 = vrot.lane.b32.xlu1 %v8456_v40, %s5026_s19  ;;  %1367 = vrot.lane.b32.xlu0 %v8457_v12, %s5026_s19  ;;  %v8465_v40 = vld [vmem:[#allocation63_spill] sm:$0xff] }
 0x18f   : > { %v6056_v14 = vpop.permute.xlu1 %1121  ;;  %v6058_v44 = vpop.permute.xlu0 %1127 }
 0x190   : > { %8458 = vst [vmem:[#allocation37_spill] sm:$0xff] %v6056_v14  ;;  %8459 = vst [vmem:[#allocation39_spill] sm:$0xff] %v6058_v44  ;;  %v8468_v44 = vld [vmem:[#allocation65_spill] sm:$0xff] }
 0x191   : > { %1365 = vrot.lane.b32.xlu1 %v8460_v9, %s5026_s19  ;;  %1371 = vrot.lane.b32.xlu0 %v8461_v11, %s5026_s19  ;;  %v1946_v9 = vld [vmem:[%s8269_s1] sm:$0xff]  ;;  %v1947_v11 = vld [vmem:[%s8269_s1 + $0x8] sm:$0xff] }
 0x193   : > { %v6064_v43 = vpop.permute.xlu1 %1125  ;;  %v6066_v45 = vpop.permute.xlu0 %1131 }
 0x194   : > { %8462 = vst [vmem:[#allocation41_spill] sm:$0xff] %v6064_v43  ;;  %8463 = vst [vmem:[#allocation43_spill] sm:$0xff] %v6066_v45  ;;  %v4839_v45 = vpack.c.bf16 %v1947_v11, %v1946_v9  ;;  %v1949_v9 = vld [vmem:[%s8269_s1 + $0x18] sm:$0xff] }
 0x195   : > { %1369 = vrot.lane.b32.xlu1 %v8464_v41, %s5026_s19  ;;  %1375 = vrot.lane.b32.xlu0 %v8465_v40, %s5026_s19  ;;  %v8469_v41 = vld [vmem:[#allocation67_spill] sm:$0xff] }
 0x196   : > { %4840 = vmatprep.subr.bf16.mxu0 %v4839_v45 }
 0x197   : > { %v6072_v12 = vpop.permute.xlu1 %1129  ;;  %v6074_v14 = vpop.permute.xlu0 %1135  ;;  %4842 = vmatpush3.bf16.msra.mxu0 %v4839_v45 }
 0x198   : > { %8466 = vst [vmem:[#allocation45_spill] sm:$0xff] %v6072_v12  ;;  %8467 = vst [vmem:[#allocation47_spill] sm:$0xff] %v6074_v14  ;;  %v8471_v14 = vld [vmem:[#allocation69_spill] sm:$0xff] }
 0x199   : > { %1373 = vrot.lane.b32.xlu1 %v8468_v44, %s5026_s19  ;;  %1379 = vrot.lane.b32.xlu0 %v8469_v41, %s5026_s19  ;;  %v1948_v44 = vld [vmem:[%s8269_s1 + $0x10] sm:$0xff] }
 0x19a   : > { %v4843_v11 = vpack.c.bf16 %v1949_v9, %v1948_v44  ;;  %v1950_v44 = vld [vmem:[%s8269_s1 + $0x20] sm:$0xf] }
 0x19b   : > { %v6086_v40 = vpop.permute.xlu1 %1133  ;;  %v6088_v12 = vpop.permute.xlu0 %1203 }
 0x19c   : > { %8470 = vst [vmem:[#allocation49_spill] sm:$0xff] %v6086_v40  ;;  %4844 = vmatprep.subr.bf16.mxu0 %v4843_v11 }
 0x19d   : > { %1377 = vrot.lane.b32.xlu1 %v8471_v14, %s5026_s19  ;;  %1383 = vrot.lane.b32.xlu0 %v5692_v58, %s5026_s19  ;;  %v8473_v14 = vld [vmem:[#allocation72_spill] sm:$0xff]  ;;  %v593_v58 = vld [vmem:[#allocation2 + $0x198] sm:$0xff] }
 0x19e   : > { %4846 = vmatpush3.bf16.msra.mxu0 %v4843_v11 }
 0x19f   : > { %v6100_v41 = vpop.permute.xlu1 %1137  ;;  %v6102_v40 = vpop.permute.xlu0 %1207  ;;  %4723 = vmatprep.subr.msk.mxu0 %vm2055_vm4, %v1950_v44 }
 0x1a0   : > { %8472 = vst [vmem:[#allocation51_spill] sm:$0xff] %v6100_v41  ;;  %v595_v41 = vld [vmem:[#allocation2 + $0x31] sm:$0xff] }
 0x1a1   : > { %1381 = vrot.lane.b32.xlu1 %v8473_v14, %s5026_s19  ;;  %1387 = vrot.lane.b32.xlu0 %v5700_v34, %s5026_s19  ;;  %v596_v34 = vld [vmem:[#allocation2 + $0x39] sm:$0xff] }
 0x1a2   : > { %4724 = vmatpush3.msk.msra.mxu0 %vm2055_vm4, %v1950_v44 }
 0x1a3   : > { %v6108_v45 = vpop.permute.xlu1 %1205  ;;  %v6113_v9 = vpop.permute.xlu0 %1211 }
 0x1a5   : > { %1385 = vrot.lane.b32.xlu1 %v5710_v0, %s5026_s19  ;;  %1391 = vrot.lane.b32.xlu0 %v593_v58, %s5026_s19  ;;  %v627_v0 = vld [vmem:[#allocation2 + $0x32] sm:$0xff] }
 0x1a6   : > { %v598_v58 = vld [vmem:[#allocation2 + $0x51] sm:$0xff] }
 0x1a7   : > { %v6118_v11 = vpop.permute.xlu1 %1209  ;;  %v6120_v14 = vpop.permute.xlu0 %1215 }
 0x1a9   : > { %1389 = vrot.lane.b32.xlu1 %v5716_v39, %s5026_s19  ;;  %1461 = vrot.lane.b32.xlu0 %v596_v34, %s5027_s20  ;;  %v597_v39 = vld [vmem:[#allocation2 + $0x49] sm:$0xff] }
 0x1ab   : > { %v6125_v43 = vpop.permute.xlu1 %1213  ;;  %v6127_v21 = vpop.permute.xlu0 %1219 }
 0x1ad   : > { %1459 = vrot.lane.b32.xlu1 %v595_v41, %s5027_s20  ;;  %1589 = vrot.lane.b32.xlu0 %v628_v32, %s5028_s26  ;;  %v629_v41 = vld [vmem:[#allocation2 + $0x4a] sm:$0xff] }
 0x1af   : > { %v6131_v44 = vpop.permute.xlu1 %1217  ;;  %v6133_v42 = vpop.permute.xlu0 %1223 }
 0x1b1   : > { %1587 = vrot.lane.b32.xlu1 %v627_v0, %s5028_s26  ;;  %1465 = vrot.lane.b32.xlu0 %v598_v58, %s5027_s20  ;;  %v599_v0 = vld [vmem:[#allocation2 + $0x61] sm:$0xff] }
 0x1b3   : > { %v6137_v34 = vpop.permute.xlu1 %1221  ;;  %v6139_v7 = vpop.permute.xlu0 %1227 }
 0x1b4   : > { %8474 = vst [vmem:[#allocation53_spill] sm:$0xff] %v6139_v7 }
 0x1b5   : > { %1463 = vrot.lane.b32.xlu1 %v597_v39, %s5027_s20  ;;  %1593 = vrot.lane.b32.xlu0 %v630_v10, %s5028_s26  ;;  %v631_v39 = vld [vmem:[#allocation2 + $0x62] sm:$0xff] }
 0x1b7   : > { %v6143_v32 = vpop.permute.xlu1 %1225  ;;  %v6145_v30 = vpop.permute.xlu0 %1231 }
 0x1b8   : > { %8475 = vst [vmem:[#allocation55_spill] sm:$0xff] %v6143_v32  ;;  %8476 = vst [vmem:[#allocation57_spill] sm:$0xff] %v6145_v30  ;;  %v634_v30 = vld [vmem:[#allocation2 + $0x82] sm:$0xff] }
 0x1b9   : > { %1591 = vrot.lane.b32.xlu1 %v629_v41, %s5028_s26  ;;  %1469 = vrot.lane.b32.xlu0 %v600_v38, %s5027_s20  ;;  %v601_v41 = vld [vmem:[#allocation2 + $0x79] sm:$0xff] }
 0x1bb   : > { %v6149_v58 = vpop.permute.xlu1 %1229  ;;  %v6151_v13 = vpop.permute.xlu0 %1235 }
 0x1bc   : > { %8477 = vst [vmem:[#allocation59_spill] sm:$0xff] %v6149_v58  ;;  %8478 = vst [vmem:[#allocation61_spill] sm:$0xff] %v6151_v13  ;;  %v604_v13 = vld [vmem:[#allocation2 + $0x99] sm:$0xff] }
 0x1bd   : > { %1467 = vrot.lane.b32.xlu1 %v599_v0, %s5027_s20  ;;  %1597 = vrot.lane.b32.xlu0 %v632_v16, %s5028_s26  ;;  %v633_v0 = vld [vmem:[#allocation2 + $0x7a] sm:$0xff] }
 0x1be   : > { %v644_v58 = vld [vmem:[#allocation2 + $0xfa] sm:$0xff] }
 0x1bf   : > { %v6155_v10 = vpop.permute.xlu1 %1233  ;;  %v6157_v48 = vpop.permute.xlu0 %1239 }
 0x1c0   : > { %8479 = vst [vmem:[#allocation63_spill] sm:$0xff] %v6155_v10  ;;  %8480 = vst [vmem:[#allocation65_spill] sm:$0xff] %v6157_v48  ;;  %v636_v48 = vld [vmem:[#allocation2 + $0x9a] sm:$0xff] }
 0x1c1   : > { %1595 = vrot.lane.b32.xlu1 %v631_v39, %s5028_s26  ;;  %1473 = vrot.lane.b32.xlu0 %v602_v8, %s5027_s20  ;;  %v603_v39 = vld [vmem:[#allocation2 + $0x91] sm:$0xff] }
 0x1c3   : > { %v6161_v38 = vpop.permute.xlu1 %1237  ;;  %v6163_v31 = vpop.permute.xlu0 %1243 }
 0x1c4   : > { %8481 = vst [vmem:[#allocation67_spill] sm:$0xff] %v6161_v38  ;;  %8482 = vst [vmem:[#allocation69_spill] sm:$0xff] %v6163_v31  ;;  %v606_v31 = vld [vmem:[#allocation2 + $0xb1] sm:$0xff] }
 0x1c5   : > { %1471 = vrot.lane.b32.xlu1 %v601_v41, %s5027_s20  ;;  %1601 = vrot.lane.b32.xlu0 %v634_v30, %s5028_s26  ;;  %v635_v41 = vld [vmem:[#allocation2 + $0x92] sm:$0xff] }
 0x1c7   : > { %v6167_v16 = vpop.permute.xlu1 %1241  ;;  %v6169_v10 = vpop.permute.xlu0 %1247 }
 0x1c8   : > { %8483 = vst [vmem:[#allocation72_spill] sm:$0xff] %v6167_v16  ;;  %8484 = vst [vmem:[#allocation118_spill] sm:$0xff] %v6169_v10  ;;  %v638_v10 = vld [vmem:[#allocation2 + $0xb2] sm:$0xff] }
 0x1c9   : > { %1599 = vrot.lane.b32.xlu1 %v633_v0, %s5028_s26  ;;  %1477 = vrot.lane.b32.xlu0 %v604_v13, %s5027_s20  ;;  %v605_v0 = vld [vmem:[#allocation2 + $0xa9] sm:$0xff] }
 0x1cb   : > { %v6173_v8 = vpop.permute.xlu1 %1245  ;;  %v6175_v38 = vpop.permute.xlu0 %1251 }
 0x1cc   : > { %8485 = vst [vmem:[#allocation119_spill] sm:$0xff] %v6173_v8  ;;  %8486 = vst [vmem:[#allocation120_spill] sm:$0xff] %v6175_v38  ;;  %v608_v38 = vld [vmem:[#allocation2 + $0xc9] sm:$0xff] }
 0x1cd   : > { %1475 = vrot.lane.b32.xlu1 %v603_v39, %s5027_s20  ;;  %1605 = vrot.lane.b32.xlu0 %v636_v48, %s5028_s26  ;;  %v637_v39 = vld [vmem:[#allocation2 + $0xaa] sm:$0xff] }
 0x1cf   : > { %v6179_v30 = vpop.permute.xlu1 %1249  ;;  %v6181_v16 = vpop.permute.xlu0 %1255 }
 0x1d0   : > { %8487 = vst [vmem:[#allocation121_spill] sm:$0xff] %v6179_v30  ;;  %8488 = vst [vmem:[#allocation122_spill] sm:$0xff] %v6181_v16  ;;  %v640_v16 = vld [vmem:[#allocation2 + $0xca] sm:$0xff] }
 0x1d1   : > { %1603 = vrot.lane.b32.xlu1 %v635_v41, %s5028_s26  ;;  %1481 = vrot.lane.b32.xlu0 %v606_v31, %s5027_s20  ;;  %v607_v41 = vld [vmem:[#allocation2 + $0xc1] sm:$0xff] }
 0x1d3   : > { %v6185_v13 = vpop.permute.xlu1 %1253  ;;  %v6187_v8 = vpop.permute.xlu0 %1259 }
 0x1d4   : > { %8489 = vst [vmem:[#allocation123_spill] sm:$0xff] %v6185_v13  ;;  %8490 = vst [vmem:[#allocation124_spill] sm:$0xff] %v6187_v8  ;;  %v610_v8 = vld [vmem:[#allocation2 + $0xe1] sm:$0xff] }
 0x1d5   : > { %1479 = vrot.lane.b32.xlu1 %v605_v0, %s5027_s20  ;;  %1609 = vrot.lane.b32.xlu0 %v638_v10, %s5028_s26  ;;  %v639_v0 = vld [vmem:[#allocation2 + $0xc2] sm:$0xff] }
 0x1d7   : > { %v6191_v48 = vpop.permute.xlu1 %1257  ;;  %v6193_v30 = vpop.permute.xlu0 %1263 }
 0x1d8   : > { %8491 = vst [vmem:[#allocation125_spill] sm:$0xff] %v6191_v48  ;;  %8492 = vst [vmem:[#allocation126_spill] sm:$0xff] %v6193_v30  ;;  %v642_v30 = vld [vmem:[#allocation2 + $0xe2] sm:$0xff] }
 0x1d9   : > { %1607 = vrot.lane.b32.xlu1 %v637_v39, %s5028_s26  ;;  %1485 = vrot.lane.b32.xlu0 %v608_v38, %s5027_s20  ;;  %v609_v39 = vld [vmem:[#allocation2 + $0xd9] sm:$0xff] }
 0x1db   : > { %v6197_v31 = vpop.permute.xlu1 %1261  ;;  %v6199_v13 = vpop.permute.xlu0 %1331 }
 0x1dc   : > { %8493 = vst [vmem:[#allocation127_spill] sm:$0xff] %v6197_v31 }
 0x1dd   : > { %1483 = vrot.lane.b32.xlu1 %v607_v41, %s5027_s20  ;;  %1613 = vrot.lane.b32.xlu0 %v640_v16, %s5028_s26  ;;  %v641_v41 = vld [vmem:[#allocation2 + $0xda] sm:$0xff] }
 0x1df   : > { %v6203_v10 = vpop.permute.xlu1 %1265  ;;  %v6205_v48 = vpop.permute.xlu0 %1335 }
 0x1e0   : > { %8494 = vst [vmem:[#allocation128_spill] sm:$0xff] %v6203_v10  ;;  %v612_v10 = vld [vmem:[#allocation2 + $0xf9] sm:$0xff] }
 0x1e1   : > { %1611 = vrot.lane.b32.xlu1 %v639_v0, %s5028_s26  ;;  %1489 = vrot.lane.b32.xlu0 %v610_v8, %s5027_s20  ;;  %v611_v0 = vld [vmem:[#allocation2 + $0xf1] sm:$0xff] }
 0x1e3   : > { %v6209_v38 = vpop.permute.xlu1 %1333  ;;  %v6211_v31 = vpop.permute.xlu0 %1339 }
 0x1e5   : > { %1487 = vrot.lane.b32.xlu1 %v609_v39, %s5027_s20  ;;  %1617 = vrot.lane.b32.xlu0 %v642_v30, %s5028_s26  ;;  %v643_v39 = vld [vmem:[#allocation2 + $0xf2] sm:$0xff] }
 0x1e7   : > { %v6215_v16 = vpop.permute.xlu1 %1337  ;;  %v6217_v1 = vpop.permute.xlu0 %1343 }
 0x1e9   : > { %1615 = vrot.lane.b32.xlu1 %v641_v41, %s5028_s26  ;;  %1493 = vrot.lane.b32.xlu0 %v612_v10, %s5027_s20  ;;  %v613_v41 = vld [vmem:[#allocation2 + $0x109] sm:$0xff] }
 0x1eb   : > { %v6221_v8 = vpop.permute.xlu1 %1341  ;;  %v6223_v7 = vpop.permute.xlu0 %1347 }
 0x1ed   : > { %1491 = vrot.lane.b32.xlu1 %v611_v0, %s5027_s20  ;;  %1621 = vrot.lane.b32.xlu0 %v644_v58, %s5028_s26  ;;  %v645_v0 = vld [vmem:[#allocation2 + $0x10a] sm:$0xff] }
 0x1ef   : > { %v6227_v30 = vpop.permute.xlu1 %1345  ;;  %v6229_v47 = vpop.permute.xlu0 %1351 }
 0x1f0   : > { %8495 = vst [vmem:[#allocation129_spill] sm:$0xff] %v6229_v47  ;;  %v648_v47 = vld [vmem:[#allocation2 + $0x12a] sm:$0xff] }
 0x1f1   : > { %1619 = vrot.lane.b32.xlu1 %v643_v39, %s5028_s26  ;;  %1497 = vrot.lane.b32.xlu0 %v614_v15, %s5027_s20  ;;  %v615_v39 = vld [vmem:[#allocation2 + $0x121] sm:$0xff] }
 0x1f3   : > { %v6233_v10 = vpop.permute.xlu1 %1349  ;;  %v6235_v3 = vpop.permute.xlu0 %1355 }
 0x1f4   : > { %8496 = vst [vmem:[#allocation130_spill] sm:$0xff] %v6235_v3  ;;  %v618_v3 = vld [vmem:[#allocation2 + $0x141] sm:$0xff] }
 0x1f5   : > { %1495 = vrot.lane.b32.xlu1 %v613_v41, %s5027_s20  ;;  %1625 = vrot.lane.b32.xlu0 %v646_v6, %s5028_s26  ;;  %v647_v41 = vld [vmem:[#allocation2 + $0x122] sm:$0xff] }
 0x1f7   : > { %v6239_v58 = vpop.permute.xlu1 %1353  ;;  %v6241_v62 = vpop.permute.xlu0 %1359 }
 0x1f8   : > { %8497 = vst [vmem:[#allocation131_spill] sm:$0xff] %v6239_v58  ;;  %8498 = vst [vmem:[#allocation132_spill] sm:$0xff] %v6241_v62  ;;  %v650_v62 = vld [vmem:[#allocation2 + $0x142] sm:$0xff] }
 0x1f9   : > { %1623 = vrot.lane.b32.xlu1 %v645_v0, %s5028_s26  ;;  %1501 = vrot.lane.b32.xlu0 %v616_v27, %s5027_s20  ;;  %v617_v0 = vld [vmem:[#allocation2 + $0x139] sm:$0xff] }
 0x1fb   : > { %v6245_v15 = vpop.permute.xlu1 %1357  ;;  %v6247_v32 = vpop.permute.xlu0 %1363 }
 0x1fc   : > { %8499 = vst [vmem:[#allocation133_spill] sm:$0xff] %v6245_v15  ;;  %8500 = vst [vmem:[#allocation134_spill] sm:$0xff] %v6247_v32  ;;  %v620_v32 = vld [vmem:[#allocation2 + $0x159] sm:$0xff] }
 0x1fd   : > { %1499 = vrot.lane.b32.xlu1 %v615_v39, %s5027_s20  ;;  %1629 = vrot.lane.b32.xlu0 %v648_v47, %s5028_s26  ;;  %v649_v39 = vld [vmem:[#allocation2 + $0x13a] sm:$0xff] }
 0x1ff   : > { %v6251_v6 = vpop.permute.xlu1 %1361  ;;  %v6253_v58 = vpop.permute.xlu0 %1367 }
 0x200   : > { %8501 = vst [vmem:[#allocation135_spill] sm:$0xff] %v6251_v6  ;;  %8502 = vst [vmem:[#allocation136_spill] sm:$0xff] %v6253_v58  ;;  %v652_v58 = vld [vmem:[#allocation2 + $0x15a] sm:$0xff] }
 0x201   : > { %1627 = vrot.lane.b32.xlu1 %v647_v41, %s5028_s26  ;;  %1505 = vrot.lane.b32.xlu0 %v618_v3, %s5027_s20  ;;  %v619_v41 = vld [vmem:[#allocation2 + $0x151] sm:$0xff] }
 0x203   : > { %v6257_v27 = vpop.permute.xlu1 %1365  ;;  %v6259_v15 = vpop.permute.xlu0 %1371 }
 0x204   : > { %8503 = vst [vmem:[#allocation137_spill] sm:$0xff] %v6257_v27  ;;  %8504 = vst [vmem:[#allocation138_spill] sm:$0xff] %v6259_v15  ;;  %v622_v15 = vld [vmem:[#allocation2 + $0x171] sm:$0xff] }
 0x205   : > { %1503 = vrot.lane.b32.xlu1 %v617_v0, %s5027_s20  ;;  %1633 = vrot.lane.b32.xlu0 %v650_v62, %s5028_s26  ;;  %v651_v0 = vld [vmem:[#allocation2 + $0x152] sm:$0xff] }
 0x207   : > { %v6263_v47 = vpop.permute.xlu1 %1369  ;;  %v6265_v6 = vpop.permute.xlu0 %1375 }
 0x208   : > { %8505 = vst [vmem:[#allocation139_spill] sm:$0xff] %v6263_v47  ;;  %8506 = vst [vmem:[#allocation140_spill] sm:$0xff] %v6265_v6  ;;  %v654_v6 = vld [vmem:[#allocation2 + $0x172] sm:$0xff] }
 0x209   : > { %1631 = vrot.lane.b32.xlu1 %v649_v39, %s5028_s26  ;;  %1509 = vrot.lane.b32.xlu0 %v620_v32, %s5027_s20  ;;  %v621_v39 = vld [vmem:[#allocation2 + $0x169] sm:$0xff] }
 0x20b   : > { %v6269_v3 = vpop.permute.xlu1 %1373  ;;  %v6271_v27 = vpop.permute.xlu0 %1379 }
 0x20c   : > { %8507 = vst [vmem:[#allocation141_spill] sm:$0xff] %v6269_v3  ;;  %8508 = vst [vmem:[#allocation142_spill] sm:$0xff] %v6271_v27 }
 0x20d   : > { %1507 = vrot.lane.b32.xlu1 %v619_v41, %s5027_s20  ;;  %1637 = vrot.lane.b32.xlu0 %v652_v58, %s5028_s26  ;;  %v653_v41 = vld [vmem:[#allocation2 + $0x16a] sm:$0xff] }
 0x20f   : > { %v6275_v62 = vpop.permute.xlu1 %1377  ;;  %v6277_v47 = vpop.permute.xlu0 %1383 }
 0x210   : > { %8509 = vst [vmem:[#allocation143_spill] sm:$0xff] %v6275_v62  ;;  %8510 = vst [vmem:[#allocation144_spill] sm:$0xff] %v6277_v47  ;;  %v371_v47 = vld [vmem:[#allocation2 + $0x8] sm:$0xff]  ;;  %v8519_v62 = vld [vmem:[#allocation71_spill] sm:$0xff] }
 0x211   : > { %1635 = vrot.lane.b32.xlu1 %v651_v0, %s5028_s26  ;;  %1513 = vrot.lane.b32.xlu0 %v622_v15, %s5027_s20  ;;  %v370_v0 = vld [vmem:[#allocation2] sm:$0xff] }
 0x213   : > { %v6281_v32 = vpop.permute.xlu1 %1381  ;;  %v6283_v3 = vpop.permute.xlu0 %1387 }
 0x214   : > { %8511 = vst [vmem:[#allocation145_spill] sm:$0xff] %v6281_v32  ;;  %8512 = vst [vmem:[#allocation146_spill] sm:$0xff] %v6283_v3  ;;  %v8516_v3 = vld [vmem:[#allocation8_spill] sm:$0xff] }
 0x215   : > { %1511 = vrot.lane.b32.xlu1 %v621_v39, %s5027_s20  ;;  %1641 = vrot.lane.b32.xlu0 %v654_v6, %s5028_s26  ;;  %v1683_v39 = vsel %vm295_vm0, %v370_v0, %v8516_v3  ;;  %v8517_v6 = vld [vmem:[#allocation9_spill] sm:$0xff]  ;;  %v625_v0 = vld [vmem:[#allocation2 + $0x199] sm:$0xff] }
 0x217   : > { %v6287_v58 = vpop.permute.xlu1 %1385  ;;  %v6289_v27 = vpop.permute.xlu0 %1391 }
 0x218   : > { %8513 = vst [vmem:[#allocation147_spill] sm:$0xff] %v6287_v58  ;;  %8514 = vst [vmem:[#allocation148_spill] sm:$0xff] %v6289_v27  ;;  %v1684_v27 = vsel %vm295_vm0, %v371_v47, %v8517_v6  ;;  %v8520_v6 = vld [vmem:[#allocation11_spill] sm:$0xff] }
 0x219   : > { %1639 = vrot.lane.b32.xlu1 %v653_v41, %s5028_s26  ;;  %1517 = vrot.lane.b32.xlu0 %v5848_v60, %s5027_s20  ;;  %v8518_v41 = vld [vmem:[#allocation66_spill] sm:$0xff]  ;;  %v1717_v60 = vsel %vm1715_vm3, %v1684_v27, %v8519_v62 }
 0x21a   : > { %v1716_v58 = vsel %vm1715_vm3, %v1683_v39, %v8518_v41 }
 0x21b   : > { %v6294_v15 = vpop.permute.xlu1 %1389  ;;  %v1462_v32 = vpop.permute.xlu0 %1461 }
 0x21c   : > { %8515 = vst [vmem:[#allocation149_spill] sm:$0xff] %v6294_v15  ;;  %v1749_v15 = vsel %vm1748_vm5, %v1716_v58, %v5818_v52 }
 0x21d   : > { %1515 = vrot.lane.b32.xlu1 %v5834_v56, %s5027_s20  ;;  %1645 = vrot.lane.b32.xlu0 %v5980_v29, %s5028_s26  ;;  %v1750_v56 = vsel %vm1748_vm5, %v1717_v60, %v5832_v55  ;;  %v1782_v47 = vsel %vm1781_vm6, %v1749_v15, %v5950_v23  ;;  %v594_v23 = vld [vmem:[#allocation2 + $0x1a0] sm:$0xff] }
 0x21e   : > { %v1783_v39 = vsel %vm1781_vm6, %v1750_v56, %v5964_v33  ;;  %v1815_v27 = vsel %vm1814_vm7, %v1782_v47, %v6088_v12  ;;  %v657_v15 = vld [vmem:[#allocation2 + $0x19a] sm:$0xff]  ;;  %v8522_v47 = vld [vmem:[#allocation70_spill] sm:$0xff] }
 0x21f   : > { %v1460_v3 = vpop.permute.xlu1 %1459  ;;  %v1590_v52 = vpop.permute.xlu0 %1589  ;;  %v1816_v29 = vsel %vm1814_vm7, %v1783_v39, %v6108_v45  ;;  %v1848_v55 = vsel %vm1847_vm8, %v1815_v27, %v6199_v13  ;;  %v4926_v45 = vld [vmem:[#allocation2 + $0x18] sm:$0xff]  ;;  %v8523_v39 = vld [vmem:[#allocation74_spill] sm:$0xff] }
 0x220   : > { %v1849_v33 = vsel %vm1847_vm8, %v1816_v29, %v6209_v38  ;;  %v1881_v62 = vsel %vm1880_vm9, %v1848_v55, %v1460_v3  ;;  %v1685_v13 = vsel %vm295_vm0, %v4926_v45, %v8520_v6  ;;  %v4927_v38 = vld [vmem:[#allocation2 + $0x20] sm:$0xff]  ;;  %v8521_v3 = vld [vmem:[#allocation15_spill] sm:$0xff]  ;;  %v4928_v45 = vld [vmem:[#allocation2 + $0x30] sm:$0xff] }
 0x221   : > { %1643 = vrot.lane.b32.xlu1 %v5966_v22, %s5028_s26  ;;  %1519 = vrot.lane.b32.xlu0 %v625_v0, %s5027_s20  ;;  %v1882_v58 = vsel %vm1880_vm9, %v1849_v33, %v1462_v32  ;;  %v1686_v56 = vsel %vm295_vm0, %v4927_v38, %v8521_v3  ;;  %v1718_v32 = vsel %vm1715_vm3, %v1685_v13, %v8522_v47  ;;  %v626_v0 = vld [vmem:[#allocation2 + $0x1a1] sm:$0xff] }
 0x222   : > { %v1915_v41 = vsel %vm1913_vm10, %v1882_v58, %v1590_v52  ;;  %v1719_v27 = vsel %vm1715_vm3, %v1686_v56, %v8523_v39  ;;  %v1751_v52 = vsel %vm1748_vm5, %v1718_v32, %v5826_v54  ;;  %v8524_v6 = vld [vmem:[#allocation13_spill] sm:$0xff]  ;;  %v8527_v56 = vld [vmem:[#allocation76_spill] sm:$0xff] }
 0x223   : > { %v1588_v12 = vpop.permute.xlu1 %1587  ;;  %v1466_v60 = vpop.permute.xlu0 %1465  ;;  %v1752_v55 = vsel %vm1748_vm5, %v1719_v27, %v5842_v57  ;;  %v1687_v13 = vsel %vm295_vm0, %v4928_v45, %v8524_v6  ;;  %v8526_v3 = vld [vmem:[#allocation73_spill] sm:$0xff] }
 0x224   : > { %v1914_v22 = vsel %vm1913_vm10, %v1881_v62, %v1588_v12  ;;  %v1785_v33 = vsel %vm1781_vm6, %v1752_v55, %v5974_v36 }
 0x225   : > { %1393 = vrot.lane.b32.xlu1 %v594_v23, %s5026_s19  ;;  %4725 = vmatprep.mubr.msk.f32.mxu0 %vm1958_vm11, %v1914_v22  ;;  %v1784_v23 = vsel %vm1781_vm6, %v1751_v52, %v5958_v28  ;;  %v1818_v54 = vsel %vm1814_vm7, %v1785_v33, %v6118_v11  ;;  %v658_v22 = vld [vmem:[#allocation2 + $0x1a2] sm:$0xff] }
 0x226   : > { %4726 = vmatmul.mubr.msk.f32.vlgmr.msra.gmra.mrb[0].mxu0 %vm1958_vm11, %v1915_v41  ;;  %1647 = vrot.lane.b32.xlu0 %v657_v15, %s5028_s26  ;;  %v1817_v62 = vsel %vm1814_vm7, %v1784_v23, %v6102_v40  ;;  %v1851_v57 = vsel %vm1847_vm8, %v1818_v54, %v6215_v16  ;;  %v8525_v16 = vld [vmem:[#allocation18_spill] sm:$0xff]  ;;  %v8528_v54 = vld [vmem:[#allocation16_spill] sm:$0xff] }
 0x227   : > { %v1464_v29 = vpop.permute.xlu1 %1463  ;;  %v1594_v12 = vpop.permute.xlu0 %1593  ;;  %v1850_v58 = vsel %vm1847_vm8, %v1817_v62, %v6205_v48  ;;  %v1884_v36 = vsel %vm1880_vm9, %v1851_v57, %v1466_v60  ;;  %v4929_v48 = vld [vmem:[#allocation2 + $0x38] sm:$0xff]  ;;  %v1720_v60 = vsel %vm1715_vm3, %v1687_v13, %v8526_v3 }
 0x228   : > { %v1883_v28 = vsel %vm1880_vm9, %v1850_v58, %v1464_v29  ;;  %v1917_v11 = vsel %vm1913_vm10, %v1884_v36, %v1594_v12  ;;  %v1688_v38 = vsel %vm295_vm0, %v4929_v48, %v8525_v16  ;;  %v1753_v32 = vsel %vm1748_vm5, %v1720_v60, %v5836_v50  ;;  %v4930_v12 = vld [vmem:[#allocation2 + $0x48] sm:$0xff]  ;;  %v8530_v57 = vld [vmem:[#allocation75_spill] sm:$0xff] }
 0x229   : > { %1521 = vrot.lane.b32.xlu1 %v626_v0, %s5027_s20  ;;  %v1721_v47 = vsel %vm1715_vm3, %v1688_v38, %v8527_v56  ;;  %v1786_v27 = vsel %vm1781_vm6, %v1753_v32, %v5968_v19  ;;  %v4932_v38 = vld [vmem:[#allocation2 + $0x60] sm:$0xff]  ;;  %v8531_v3 = vld [vmem:[#allocation19_spill] sm:$0xff]  ;;  %s5030_s20 = smov 48  }
 0x22a   : > { %v1754_v39 = vsel %vm1748_vm5, %v1721_v47, %v5852_v61  ;;  %v1819_v29 = vsel %vm1814_vm7, %v1786_v27, %v6113_v9  ;;  %v1689_v9 = vsel %vm295_vm0, %v4930_v12, %v8528_v54  ;;  %v8532_v56 = vld [vmem:[#allocation24_spill] sm:$0xff]  ;;  %v8533_v47 = vld [vmem:[#allocation77_spill] sm:$0xff] }
 0x22b   : > { %v1592_v15 = vpop.permute.xlu1 %1591  ;;  %v1470_v41 = vpop.permute.xlu0 %1469  ;;  %v1787_v52 = vsel %vm1781_vm6, %v1754_v39, %v5984_v17  ;;  %v1852_v50 = vsel %vm1847_vm8, %v1819_v29, %v6211_v31  ;;  %v4931_v31 = vld [vmem:[#allocation2 + $0x50] sm:$0xff]  ;;  %v8535_v12 = vld [vmem:[#allocation28_spill] sm:$0xff] }
 0x22c   : > { %v1916_v40 = vsel %vm1913_vm10, %v1883_v28, %v1592_v15  ;;  %v1820_v23 = vsel %vm1814_vm7, %v1787_v52, %v6125_v43  ;;  %v1722_v28 = vsel %vm1715_vm3, %v1689_v9, %v8530_v57 }
 0x22d   : > { %1649 = vrot.lane.b32.xlu1 %v658_v22, %s5028_s26  ;;  %4728 = vmatprep.mubr.msk.f32.mxu0 %vm1958_vm11, %v1916_v40  ;;  %v1853_v33 = vsel %vm1847_vm8, %v1820_v23, %v6221_v8  ;;  %v8529_v22 = vld [vmem:[#allocation21_spill] sm:$0xff]  ;;  %v1755_v36 = vsel %vm1748_vm5, %v1722_v28, %v5844_v59  ;;  %v8536_v28 = vld [vmem:[#allocation55_spill] sm:$0xff] }
 0x22e   : > { %4729 = vmatmul.mubr.msk.f32.gmra.mrb[2].mxu0 %vm1958_vm11, %v1917_v11  ;;  %v1886_v19 = vsel %vm1880_vm9, %v1853_v33, %v1470_v41  ;;  %v1690_v8 = vsel %vm295_vm0, %v4931_v31, %v8529_v22  ;;  %v1788_v6 = vsel %vm1781_vm6, %v1755_v36, %v5976_v24  ;;  %v8538_v36 = vld [vmem:[#allocation131_spill] sm:$0xff] }
 0x22f   : > { %v1468_v0 = vpop.permute.xlu1 %1467  ;;  %v1598_v55 = vpop.permute.xlu0 %1597  ;;  %v1723_v15 = vsel %vm1715_vm3, %v1690_v8, %v5728_v4  ;;  %v1821_v11 = vsel %vm1814_vm7, %v1788_v6, %v6120_v14  ;;  %v1691_v14 = vsel %vm295_vm0, %v4932_v38, %v8531_v3  ;;  %v4936_v6 = vld [vmem:[#allocation2 + $0x90] sm:$0xff] }
 0x230   : > { %v1885_v61 = vsel %vm1880_vm9, %v1852_v50, %v1468_v0  ;;  %v1919_v58 = vsel %vm1913_vm10, %v1886_v19, %v1598_v55  ;;  %v1756_v45 = vsel %vm1748_vm5, %v1723_v15, %v5860_v63  ;;  %v1854_v59 = vsel %vm1847_vm8, %v1821_v11, %v6217_v1  ;;  %v4933_v1 = vld [vmem:[#allocation2 + $0x68] sm:$0xff]  ;;  %v8534_v19 = vld [vmem:[#allocation22_spill] sm:$0xff] }
 0x231   : > { %v1789_v13 = vsel %vm1781_vm6, %v1756_v45, %v5992_v46  ;;  %v1724_v32 = vsel %vm1715_vm3, %v1691_v14, %v8533_v47  ;;  %v8537_v15 = vld [vmem:[#allocation129_spill] sm:$0xff]  ;;  %v8543_v38 = vld [vmem:[#allocation98_spill] sm:$0xff] }
 0x232   : > { %v1822_v4 = vsel %vm1814_vm7, %v1789_v13, %v6131_v44  ;;  %v1757_v39 = vsel %vm1748_vm5, %v1724_v32, %v5854_v53  ;;  %v8539_v13 = vld [vmem:[#allocation26_spill] sm:$0xff]  ;;  %v8547_v32 = vld [vmem:[#allocation53_spill] sm:$0xff] }
 0x233   : > { %v1596_v62 = vpop.permute.xlu1 %1595  ;;  %v1474_v43 = vpop.permute.xlu0 %1473  ;;  %v1855_v48 = vsel %vm1847_vm8, %v1822_v4, %v6227_v30  ;;  %v1692_v30 = vsel %vm295_vm0, %v4933_v1, %v8532_v56  ;;  %v1790_v29 = vsel %vm1781_vm6, %v1757_v39, %v5986_v49  ;;  %v4937_v4 = vld [vmem:[#allocation2 + $0x98] sm:$0xff]  ;;  %v8545_v1 = vld [vmem:[#allocation10_spill] sm:$0xff] }
 0x234   : > { %v1918_v17 = vsel %vm1913_vm10, %v1885_v61, %v1596_v62  ;;  %v1888_v24 = vsel %vm1880_vm9, %v1855_v48, %v1474_v43  ;;  %v1725_v0 = vsel %vm1715_vm3, %v1692_v30, %v5736_v25  ;;  %v1823_v23 = vsel %vm1814_vm7, %v1790_v29, %v6127_v21  ;;  %v4934_v62 = vld [vmem:[#allocation2 + $0x78] sm:$0xff]  ;;  %v8546_v30 = vld [vmem:[#allocation14_spill] sm:$0xff] }
 0x235   : > { %4731 = vmatprep.mubr.msk.f32.mxu0 %vm1958_vm11, %v1918_v17  ;;  %v1758_v52 = vsel %vm1748_vm5, %v1725_v0, %v5868_v2  ;;  %v1856_v53 = vsel %vm1847_vm8, %v1823_v23, %v6223_v7  ;;  %v1693_v21 = vsel %vm295_vm0, %v4934_v62, %v8534_v19  ;;  %v4935_v7 = vld [vmem:[#allocation2 + $0x80] sm:$0xff]  ;;  %v8549_v29 = vld [vmem:[#allocation130_spill] sm:$0xff]  ;;  %v8550_v23 = vld [vmem:[#allocation133_spill] sm:$0xff] }
 0x236   : > { %4732 = vmatmul.mubr.msk.f32.gmra.mrb[4].mxu0 %vm1958_vm11, %v1919_v58  ;;  %v1791_v55 = vsel %vm1781_vm6, %v1758_v52, %v6000_v20  ;;  %v1726_v54 = vsel %vm1715_vm3, %v1693_v21, %v5730_v37  ;;  %v4939_v21 = vld [vmem:[#allocation2 + $0xb0] sm:$0xff] }
 0x237   : > { %v1472_v40 = vpop.permute.xlu1 %1471  ;;  %v1602_v41 = vpop.permute.xlu0 %1601  ;;  %v1824_v25 = vsel %vm1814_vm7, %v1791_v55, %v6137_v34  ;;  %v1759_v58 = vsel %vm1748_vm5, %v1726_v54, %v5862_v51 }
 0x238   : > { %v1887_v63 = vsel %vm1880_vm9, %v1854_v59, %v1472_v40  ;;  %v1921_v60 = vsel %vm1913_vm10, %v1888_v24, %v1602_v41  ;;  %v1857_v33 = vsel %vm1847_vm8, %v1824_v25, %v6233_v10  ;;  %v1694_v10 = vsel %vm295_vm0, %v4935_v7, %v8535_v12  ;;  %v8540_v59 = vld [vmem:[#allocation32_spill] sm:$0xff]  ;;  %v8553_v7 = vld [vmem:[#allocation79_spill] sm:$0xff] }
 0x239   : > { %v1727_v9 = vsel %vm1715_vm3, %v1694_v10, %v5744_v26  ;;  %v1792_v22 = vsel %vm1781_vm6, %v1759_v58, %v5994_v18  ;;  %v1696_v48 = vsel %vm295_vm0, %v4937_v4, %v8540_v59  ;;  %v8542_v24 = vld [vmem:[#allocation80_spill] sm:$0xff]  ;;  %v8554_v10 = vld [vmem:[#allocation82_spill] sm:$0xff] }
 0x23a   : > { %v1760_v31 = vsel %vm1748_vm5, %v1727_v9, %v5876_v5  ;;  %v1825_v37 = vsel %vm1814_vm7, %v1792_v22, %v6133_v42  ;;  %v1695_v42 = vsel %vm295_vm0, %v4936_v6, %v8539_v13  ;;  %v8555_v9 = vld [vmem:[#allocation99_spill] sm:$0xff]  ;;  %v8563_v4 = vld [vmem:[#allocation34_spill] sm:$0xff] }
 0x23b   : > { %v1600_v16 = vpop.permute.xlu1 %1599  ;;  %v1478_v44 = vpop.permute.xlu0 %1477  ;;  %v1793_v8 = vsel %vm1781_vm6, %v1760_v31, %v6008_v35  ;;  %v1858_v51 = vsel %vm1847_vm8, %v1825_v37, %v8537_v15  ;;  %v8556_v31 = vld [vmem:[#allocation102_spill] sm:$0xff] }
 0x23c   : > { %v1920_v46 = vsel %vm1913_vm10, %v1887_v63, %v1600_v16  ;;  %v1890_v49 = vsel %vm1880_vm9, %v1857_v33, %v1478_v44  ;;  %v1826_v26 = vsel %vm1814_vm7, %v1793_v8, %v8536_v28  ;;  %v8541_v63 = vld [vmem:[#allocation78_spill] sm:$0xff]  ;;  %v8557_v8 = vld [vmem:[#allocation12_spill] sm:$0xff] }
 0x23d   : > { %4734 = vmatprep.mubr.msk.f32.mxu0 %vm1958_vm11, %v1920_v46  ;;  %v1859_v40 = vsel %vm1847_vm8, %v1826_v26, %v8538_v36  ;;  %v1728_v16 = vsel %vm1715_vm3, %v1695_v42, %v8541_v63  ;;  %v1729_v46 = vsel %vm1715_vm3, %v1696_v48, %v8542_v24  ;;  %v8559_v26 = vld [vmem:[#allocation57_spill] sm:$0xff]  ;;  %v8560_v36 = vld [vmem:[#allocation63_spill] sm:$0xff]  ;;  %v8564_v24 = vld [vmem:[#allocation40_spill] sm:$0xff] }
 0x23e   : > { %4735 = vmatmul.mubr.msk.f32.gmra.mrb[6].mxu0 %vm1958_vm11, %v1921_v60  ;;  %v1761_v3 = vsel %vm1748_vm5, %v1728_v16, %v8543_v38  ;;  %v8544_v60 = vld [vmem:[#allocation100_spill] sm:$0xff]  ;;  %v4941_v16 = vld [vmem:[#allocation2 + $0xc8] sm:$0xff] }
 0x23f   : > { %v1476_v27 = vpop.permute.xlu1 %1475  ;;  %v1606_v50 = vpop.permute.xlu0 %1605  ;;  %v1762_v44 = vsel %vm1748_vm5, %v1729_v46, %v8544_v60  ;;  %v1794_v56 = vsel %vm1781_vm6, %v1761_v3, %v8545_v1  ;;  %v1700_v46 = vsel %vm295_vm0, %v4941_v16, %v8564_v24  ;;  %v8565_v38 = vld [vmem:[#allocation81_spill] sm:$0xff]  ;;  %v8587_v16 = vld [vmem:[#allocation42_spill] sm:$0xff] }
 0x240   : > { %v1889_v2 = vsel %vm1880_vm9, %v1856_v53, %v1476_v27  ;;  %v1923_v17 = vsel %vm1913_vm10, %v1890_v49, %v1606_v50  ;;  %v1795_v47 = vsel %vm1781_vm6, %v1762_v44, %v8546_v30  ;;  %v1827_v0 = vsel %vm1814_vm7, %v1794_v56, %v8547_v32  ;;  %v8548_v27 = vld [vmem:[#allocation59_spill] sm:$0xff]  ;;  %v8551_v49 = vld [vmem:[#allocation30_spill] sm:$0xff]  ;;  %v8567_v44 = vld [vmem:[#allocation101_spill] sm:$0xff] }
 0x241   : > { %v1828_v52 = vsel %vm1814_vm7, %v1795_v47, %v8548_v27  ;;  %v1860_v55 = vsel %vm1847_vm8, %v1827_v0, %v8549_v29  ;;  %v8568_v30 = vld [vmem:[#allocation104_spill] sm:$0xff]  ;;  %v8569_v32 = vld [vmem:[#allocation17_spill] sm:$0xff] }
 0x242   : > { %v1861_v50 = vsel %vm1847_vm8, %v1828_v52, %v8550_v23  ;;  %v8571_v52 = vld [vmem:[#allocation61_spill] sm:$0xff]  ;;  %v8572_v23 = vld [vmem:[#allocation67_spill] sm:$0xff] }
 0x243   : > { %v1604_v61 = vpop.permute.xlu1 %1603  ;;  %v1482_v34 = vpop.permute.xlu0 %1481 }
 0x244   : > { %v1922_v20 = vsel %vm1913_vm10, %v1889_v2, %v1604_v61  ;;  %v1892_v18 = vsel %vm1880_vm9, %v1859_v40, %v1482_v34  ;;  %v4938_v61 = vld [vmem:[#allocation2 + $0xa8] sm:$0xff] }
 0x245   : > { %4737 = vmatprep.mubr.msk.f32.mxu0 %vm1958_vm11, %v1922_v20  ;;  %v1697_v20 = vsel %vm295_vm0, %v4938_v61, %v8551_v49 }
 0x246   : > { %4738 = vmatmul.mubr.msk.f32.gmra.mrb[8].mxu0 %vm1958_vm11, %v1923_v17  ;;  %v8552_v17 = vld [vmem:[#allocation36_spill] sm:$0xff]  ;;  %v1730_v12 = vsel %vm1715_vm3, %v1697_v20, %v8553_v7 }
 0x247   : > { %v1480_v43 = vpop.permute.xlu1 %1479  ;;  %v1610_v57 = vpop.permute.xlu0 %1609  ;;  %v1698_v34 = vsel %vm295_vm0, %v4939_v21, %v8552_v17  ;;  %v1763_v58 = vsel %vm1748_vm5, %v1730_v12, %v8555_v9  ;;  %v8575_v21 = vld [vmem:[#allocation38_spill] sm:$0xff]  ;;  %v4943_v12 = vld [vmem:[#allocation2 + $0xe0] sm:$0xff]  ;;  %v8577_v9 = vld [vmem:[#allocation83_spill] sm:$0xff] }
 0x248   : > { %v1891_v5 = vsel %vm1880_vm9, %v1858_v51, %v1480_v43  ;;  %v1925_v11 = vsel %vm1913_vm10, %v1892_v18, %v1610_v57  ;;  %v1731_v54 = vsel %vm1715_vm3, %v1698_v34, %v8554_v10  ;;  %v1796_v37 = vsel %vm1781_vm6, %v1763_v58, %v8557_v8  ;;  %v8558_v57 = vld [vmem:[#allocation20_spill] sm:$0xff]  ;;  %v8562_v18 = vld [vmem:[#allocation135_spill] sm:$0xff] }
 0x249   : > { %v1764_v22 = vsel %vm1748_vm5, %v1731_v54, %v8556_v31  ;;  %v1829_v15 = vsel %vm1814_vm7, %v1796_v37, %v8559_v26  ;;  %v8576_v10 = vld [vmem:[#allocation44_spill] sm:$0xff]  ;;  %v8581_v26 = vld [vmem:[#allocation23_spill] sm:$0xff] }
 0x24a   : > { %v1797_v28 = vsel %vm1781_vm6, %v1764_v22, %v8558_v57  ;;  %v1702_v54 = vsel %vm295_vm0, %v4943_v12, %v8576_v10  ;;  %v8579_v22 = vld [vmem:[#allocation103_spill] sm:$0xff]  ;;  %v8580_v57 = vld [vmem:[#allocation106_spill] sm:$0xff] }
 0x24b   : > { %v1608_v45 = vpop.permute.xlu1 %1607  ;;  %v1486_v41 = vpop.permute.xlu0 %1485  ;;  %v1830_v40 = vsel %vm1814_vm7, %v1797_v28, %v8560_v36  ;;  %v8599_v12 = vld [vmem:[#allocation46_spill] sm:$0xff] }
 0x24c   : > { %v1924_v35 = vsel %vm1913_vm10, %v1891_v5, %v1608_v45  ;;  %v1894_v33 = vsel %vm1880_vm9, %v1861_v50, %v1486_v41  ;;  %v8561_v5 = vld [vmem:[#allocation132_spill] sm:$0xff] }
 0x24d   : > { %4740 = vmatprep.mubr.msk.f32.mxu0 %vm1958_vm11, %v1924_v35  ;;  %v1862_v45 = vsel %vm1847_vm8, %v1829_v15, %v8561_v5  ;;  %v1863_v35 = vsel %vm1847_vm8, %v1830_v40, %v8562_v18  ;;  %v4940_v41 = vld [vmem:[#allocation2 + $0xc0] sm:$0xff]  ;;  %v8583_v40 = vld [vmem:[#allocation65_spill] sm:$0xff] }
 0x24e   : > { %4741 = vmatmul.mubr.msk.f32.gmra.mrb[10].mxu0 %vm1958_vm11, %v1925_v11  ;;  %v1699_v59 = vsel %vm295_vm0, %v4940_v41, %v8563_v4  ;;  %v8584_v18 = vld [vmem:[#allocation72_spill] sm:$0xff] }
 0x24f   : > { %v1484_v14 = vpop.permute.xlu1 %1483  ;;  %v1614_v39 = vpop.permute.xlu0 %1613  ;;  %v1732_v3 = vsel %vm1715_vm3, %v1699_v59, %v8565_v38 }
 0x250   : > { %v1893_v25 = vsel %vm1880_vm9, %v1860_v55, %v1484_v14  ;;  %v1927_v62 = vsel %vm1913_vm10, %v1894_v33, %v1614_v39  ;;  %v8566_v14 = vld [vmem:[#allocation84_spill] sm:$0xff]  ;;  %v1765_v1 = vsel %vm1748_vm5, %v1732_v3, %v8567_v44  ;;  %v8570_v39 = vld [vmem:[#allocation25_spill] sm:$0xff]  ;;  %v4945_v3 = vld [vmem:[#allocation2 + $0xf8] sm:$0xff] }
 0x251   : > { %v1733_v60 = vsel %vm1715_vm3, %v1700_v46, %v8566_v14  ;;  %v1798_v0 = vsel %vm1781_vm6, %v1765_v1, %v8569_v32  ;;  %v8574_v33 = vld [vmem:[#allocation137_spill] sm:$0xff]  ;;  %v8588_v14 = vld [vmem:[#allocation48_spill] sm:$0xff] }
 0x252   : > { %v1766_v47 = vsel %vm1748_vm5, %v1733_v60, %v8568_v30  ;;  %v1831_v29 = vsel %vm1814_vm7, %v1798_v0, %v8571_v52  ;;  %v1704_v60 = vsel %vm295_vm0, %v4945_v3, %v8588_v14  ;;  %v8589_v44 = vld [vmem:[#allocation85_spill] sm:$0xff]  ;;  %v8593_v52 = vld [vmem:[#allocation27_spill] sm:$0xff]  ;;  %v4948_v3 = vld [vmem:[#allocation2 + $0x120] sm:$0xff] }
 0x253   : > { %v1612_v53 = vpop.permute.xlu1 %1611  ;;  %v1490_v19 = vpop.permute.xlu0 %1489  ;;  %v1799_v27 = vsel %vm1781_vm6, %v1766_v47, %v8570_v39  ;;  %v8591_v47 = vld [vmem:[#allocation105_spill] sm:$0xff]  ;;  %v8592_v39 = vld [vmem:[#allocation108_spill] sm:$0xff]  ;;  %v8612_v14 = vld [vmem:[#allocation50_spill] sm:$0xff] }
 0x254   : > { %v1926_v2 = vsel %vm1913_vm10, %v1893_v25, %v1612_v53  ;;  %v1896_v42 = vsel %vm1880_vm9, %v1863_v35, %v1490_v19  ;;  %v1832_v50 = vsel %vm1814_vm7, %v1799_v27, %v8572_v23  ;;  %v8573_v25 = vld [vmem:[#allocation134_spill] sm:$0xff]  ;;  %v4942_v19 = vld [vmem:[#allocation2 + $0xd8] sm:$0xff] }
 0x255   : > { %4743 = vmatprep.mubr.msk.f32.mxu0 %vm1958_vm11, %v1926_v2  ;;  %v1864_v53 = vsel %vm1847_vm8, %v1831_v29, %v8573_v25  ;;  %v1865_v2 = vsel %vm1847_vm8, %v1832_v50, %v8574_v33  ;;  %v1701_v17 = vsel %vm295_vm0, %v4942_v19, %v8575_v21  ;;  %v8595_v50 = vld [vmem:[#allocation69_spill] sm:$0xff]  ;;  %v8596_v33 = vld [vmem:[#allocation119_spill] sm:$0xff] }
 0x256   : > { %4744 = vmatmul.mubr.msk.f32.gmra.mrb[12].mxu0 %vm1958_vm11, %v1927_v62  ;;  %v1734_v58 = vsel %vm1715_vm3, %v1701_v17, %v8577_v9 }
 0x257   : > { %v1488_v43 = vpop.permute.xlu1 %1487  ;;  %v1618_v51 = vpop.permute.xlu0 %1617  ;;  %v1767_v8 = vsel %vm1748_vm5, %v1734_v58, %v8579_v22  ;;  %v4947_v58 = vld [vmem:[#allocation2 + $0x110] sm:$0xff]  ;;  %v8601_v22 = vld [vmem:[#allocation87_spill] sm:$0xff] }
 0x258   : > { %v1895_v6 = vsel %vm1880_vm9, %v1862_v45, %v1488_v43  ;;  %v1929_v48 = vsel %vm1913_vm10, %v1896_v42, %v1618_v51  ;;  %v8578_v43 = vld [vmem:[#allocation86_spill] sm:$0xff]  ;;  %v1800_v15 = vsel %vm1781_vm6, %v1767_v8, %v8581_v26  ;;  %v8582_v51 = vld [vmem:[#allocation29_spill] sm:$0xff]  ;;  %v8586_v42 = vld [vmem:[#allocation139_spill] sm:$0xff] }
 0x259   : > { %v1735_v31 = vsel %vm1715_vm3, %v1702_v54, %v8578_v43  ;;  %v1833_v5 = vsel %vm1814_vm7, %v1800_v15, %v8583_v40  ;;  %v8600_v43 = vld [vmem:[#allocation52_spill] sm:$0xff]  ;;  %v8605_v40 = vld [vmem:[#allocation31_spill] sm:$0xff] }
 0x25a   : > { %v1768_v28 = vsel %vm1748_vm5, %v1735_v31, %v8580_v57  ;;  %v1706_v31 = vsel %vm295_vm0, %v4947_v58, %v8600_v43 }
 0x25b   : > { %v1616_v13 = vpop.permute.xlu1 %1615  ;;  %v1494_v63 = vpop.permute.xlu0 %1493  ;;  %v1801_v36 = vsel %vm1781_vm6, %v1768_v28, %v8582_v51  ;;  %v8603_v28 = vld [vmem:[#allocation107_spill] sm:$0xff]  ;;  %v8604_v51 = vld [vmem:[#allocation110_spill] sm:$0xff] }
 0x25c   : > { %v1928_v11 = vsel %vm1913_vm10, %v1895_v6, %v1616_v13  ;;  %v1898_v20 = vsel %vm1880_vm9, %v1865_v2, %v1494_v63  ;;  %v1834_v35 = vsel %vm1814_vm7, %v1801_v36, %v8584_v18  ;;  %v8585_v6 = vld [vmem:[#allocation136_spill] sm:$0xff]  ;;  %v4944_v63 = vld [vmem:[#allocation2 + $0xf0] sm:$0xff] }
 0x25d   : > { %4746 = vmatprep.mubr.msk.f32.mxu0 %vm1958_vm11, %v1928_v11  ;;  %v1866_v13 = vsel %vm1847_vm8, %v1833_v5, %v8585_v6  ;;  %v1867_v11 = vsel %vm1847_vm8, %v1834_v35, %v8586_v42  ;;  %v1703_v24 = vsel %vm295_vm0, %v4944_v63, %v8587_v16  ;;  %v8607_v35 = vld [vmem:[#allocation118_spill] sm:$0xff]  ;;  %v8608_v42 = vld [vmem:[#allocation121_spill] sm:$0xff] }
 0x25e   : > { %4747 = vmatmul.mubr.msk.f32.gmra.mrb[14].mxu0 %vm1958_vm11, %v1929_v48  ;;  %v1736_v1 = vsel %vm1715_vm3, %v1703_v24, %v8589_v44 }
 0x25f   : > { %v1492_v56 = vpop.permute.xlu1 %1491  ;;  %v1622_v55 = vpop.permute.xlu0 %1621  ;;  %v1769_v32 = vsel %vm1748_vm5, %v1736_v1, %v8591_v47 }
 0x260   : > { %v1897_v61 = vsel %vm1880_vm9, %v1864_v53, %v1492_v56  ;;  %v1931_v34 = vsel %vm1913_vm10, %v1898_v20, %v1622_v55  ;;  %v8590_v56 = vld [vmem:[#allocation88_spill] sm:$0xff]  ;;  %v1802_v29 = vsel %vm1781_vm6, %v1769_v32, %v8593_v52  ;;  %v8594_v55 = vld [vmem:[#allocation33_spill] sm:$0xff] }
 0x261   : > { %v1737_v30 = vsel %vm1715_vm3, %v1704_v60, %v8590_v56  ;;  %v1835_v25 = vsel %vm1814_vm7, %v1802_v29, %v8595_v50  ;;  %v8598_v20 = vld [vmem:[#allocation141_spill] sm:$0xff]  ;;  %v1707_v60 = vsel %vm295_vm0, %v4948_v3, %v8612_v14  ;;  %v8635_v3 = vld [vmem:[#allocation147_spill] sm:$0xff] }
 0x262   : > { %v1770_v27 = vsel %vm1748_vm5, %v1737_v30, %v8592_v39  ;;  %v4949_v56 = vld [vmem:[#allocation2 + $0x128] sm:$0xff]  ;;  %v8613_v30 = vld [vmem:[#allocation56_spill] sm:$0xff] }
 0x263   : > { %v1620_v49 = vpop.permute.xlu1 %1619  ;;  %v1498_v7 = vpop.permute.xlu0 %1497  ;;  %v1803_v23 = vsel %vm1781_vm6, %v1770_v27, %v8594_v55  ;;  %v1708_v47 = vsel %vm295_vm0, %v4949_v56, %v8613_v30  ;;  %v8614_v32 = vld [vmem:[#allocation89_spill] sm:$0xff]  ;;  %v8615_v39 = vld [vmem:[#allocation92_spill] sm:$0xff]  ;;  %v4952_v30 = vld [vmem:[#allocation2 + $0x150] sm:$0xff] }
 0x264   : > { %v1930_v62 = vsel %vm1913_vm10, %v1897_v61, %v1620_v49  ;;  %v1900_v59 = vsel %vm1880_vm9, %v1867_v11, %v1498_v7  ;;  %v1836_v2 = vsel %vm1814_vm7, %v1803_v23, %v8596_v33  ;;  %v8597_v61 = vld [vmem:[#allocation138_spill] sm:$0xff]  ;;  %v4946_v7 = vld [vmem:[#allocation2 + $0x108] sm:$0xff]  ;;  %v1741_v27 = vsel %vm1715_vm3, %v1708_v47, %v8615_v39  ;;  %v8617_v23 = vld [vmem:[#allocation112_spill] sm:$0xff] }
 0x265   : > { %4749 = vmatprep.mubr.msk.f32.mxu0 %vm1958_vm11, %v1930_v62  ;;  %v1868_v49 = vsel %vm1847_vm8, %v1835_v25, %v8597_v61  ;;  %v1869_v62 = vsel %vm1847_vm8, %v1836_v2, %v8598_v20  ;;  %v1705_v10 = vsel %vm295_vm0, %v4946_v7, %v8599_v12  ;;  %v8616_v52 = vld [vmem:[#allocation109_spill] sm:$0xff]  ;;  %v1774_v50 = vsel %vm1748_vm5, %v1741_v27, %v8617_v23  ;;  %v8618_v25 = vld [vmem:[#allocation35_spill] sm:$0xff]  ;;  %v8620_v61 = vld [vmem:[#allocation120_spill] sm:$0xff] }
 0x266   : > { %4750 = vmatmul.mubr.msk.f32.gmra.mrb[16].mxu0 %vm1958_vm11, %v1931_v34  ;;  %v1738_v8 = vsel %vm1715_vm3, %v1705_v10, %v8601_v22  ;;  %v8619_v33 = vld [vmem:[#allocation41_spill] sm:$0xff]  ;;  %v2422_v7 = vld [vmem:[#allocation3 + $0x1] sm:$0xff] }
 0x267   : > { %v1496_v37 = vpop.permute.xlu1 %1495  ;;  %v1626_v45 = vpop.permute.xlu0 %1625  ;;  %v1771_v26 = vsel %vm1748_vm5, %v1738_v8, %v8603_v28  ;;  %v1807_v2 = vsel %vm1781_vm6, %v1774_v50, %v8619_v33  ;;  %v8623_v12 = vld [vmem:[#allocation145_spill] sm:$0xff]  ;;  %2711 = vrot.lane.b32.xlu0 %v2422_v7, %s5022_s15  ;;  %v8624_v22 = vld [vmem:[#allocation54_spill] sm:$0xff]  ;;  %v4951_v28 = vld [vmem:[#allocation2 + $0x140] sm:$0xff] }
 0x268   : > { %v1899_v41 = vsel %vm1880_vm9, %v1866_v13, %v1496_v37  ;;  %v1933_v46 = vsel %vm1913_vm10, %v1900_v59, %v1626_v45  ;;  %v8602_v37 = vld [vmem:[#allocation90_spill] sm:$0xff]  ;;  %v1804_v5 = vsel %vm1781_vm6, %v1771_v26, %v8605_v40  ;;  %v8606_v45 = vld [vmem:[#allocation37_spill] sm:$0xff]  ;;  %v8610_v59 = vmov 0.0   ;;  %v8625_v26 = vld [vmem:[#allocation60_spill] sm:$0xff] }
 0x269   : > { %v1739_v57 = vsel %vm1715_vm3, %v1706_v31, %v8602_v37  ;;  %v1837_v6 = vsel %vm1814_vm7, %v1804_v5, %v8607_v35  ;;  %2319 = vst.msk [vmem:[#allocation3 + $0x10] sm:$0x3] %vm2318_vm12, %v8610_v59  ;;  %2323 = vst.msk [vmem:[#allocation3 + $0x1a8] sm:$0x3] %vm2318_vm12, %v8610_v59  ;;  %v4950_v31 = vld [vmem:[#allocation2 + $0x138] sm:$0xff]  ;;  %v8627_v40 = vld [vmem:[#allocation94_spill] sm:$0xff] }
 0x26a   : > { %v1772_v36 = vsel %vm1748_vm5, %v1739_v57, %v8604_v51  ;;  %2326 = vst.msk [vmem:[#allocation3 + $0x18] sm:$0x1] %vm2325_vm13, %v8610_v59  ;;  %2327 = vst.msk [vmem:[#allocation3 + $0x30] sm:$0x1] %vm2325_vm13, %v8610_v59  ;;  %v1709_v8 = vsel %vm295_vm0, %v4950_v31, %v8624_v22  ;;  %v8626_v51 = vld [vmem:[#allocation91_spill] sm:$0xff]  ;;  %v8636_v47 = vld [vmem:[#allocation58_spill] sm:$0xff] }
 0x26b   : > { %v1624_v4 = vpop.permute.xlu1 %1623  ;;  %v1502_v38 = vpop.permute.xlu0 %1501  ;;  %v1805_v18 = vsel %vm1781_vm6, %v1772_v36, %v8606_v45  ;;  %2328 = vst.msk [vmem:[#allocation3 + $0x48] sm:$0x1] %vm2325_vm13, %v8610_v59  ;;  %2329 = vst.msk [vmem:[#allocation3 + $0x60] sm:$0x1] %vm2325_vm13, %v8610_v59  ;;  %v1742_v36 = vsel %vm1715_vm3, %v1709_v8, %v8626_v51  ;;  %v8628_v45 = vld [vmem:[#allocation111_spill] sm:$0xff]  ;;  %v8639_v50 = vld [vmem:[#allocation96_spill] sm:$0xff] }
 0x26c   : > { %v1932_v48 = vsel %vm1913_vm10, %v1899_v41, %v1624_v4  ;;  %v1902_v17 = vsel %vm1880_vm9, %v1869_v62, %v1502_v38  ;;  %v1838_v11 = vsel %vm1814_vm7, %v1805_v18, %v8608_v42  ;;  %v8609_v41 = vld [vmem:[#allocation140_spill] sm:$0xff]  ;;  %2330 = vst.msk [vmem:[#allocation3 + $0x78] sm:$0x1] %vm2325_vm13, %v8610_v59  ;;  %2331 = vst.msk [vmem:[#allocation3 + $0x90] sm:$0x1] %vm2325_vm13, %v8610_v59  ;;  %v8630_v42 = vld [vmem:[#allocation39_spill] sm:$0xff] }
 0x26d   : > { %4752 = vmatprep.mubr.msk.f32.mxu0 %vm1958_vm11, %v1932_v48  ;;  %v1870_v4 = vsel %vm1847_vm8, %v1837_v6, %v8609_v41  ;;  %v8611_v48 = vld [vmem:[#allocation143_spill] sm:$0xff]  ;;  %2332 = vst.msk [vmem:[#allocation3 + $0xa8] sm:$0x1] %vm2325_vm13, %v8610_v59  ;;  %2333 = vst.msk [vmem:[#allocation3 + $0xc0] sm:$0x1] %vm2325_vm13, %v8610_v59  ;;  %v1775_v18 = vsel %vm1748_vm5, %v1742_v36, %v8628_v45  ;;  %v8629_v6 = vld [vmem:[#allocation114_spill] sm:$0xff] }
 0x26e   : > { %4753 = vmatmul.mubr.msk.f32.gmra.mrb[18].mxu0 %vm1958_vm11, %v1933_v46  ;;  %v1871_v63 = vsel %vm1847_vm8, %v1838_v11, %v8611_v48  ;;  %2334 = vst.msk [vmem:[#allocation3 + $0xd8] sm:$0x1] %vm2325_vm13, %v8610_v59  ;;  %2335 = vst.msk [vmem:[#allocation3 + $0xf0] sm:$0x1] %vm2325_vm13, %v8610_v59  ;;  %v1808_v11 = vsel %vm1781_vm6, %v1775_v18, %v8630_v42  ;;  %v8631_v41 = vld [vmem:[#allocation45_spill] sm:$0xff]  ;;  %v4953_v27 = vld [vmem:[#allocation2 + $0x158] sm:$0xff] }
 0x26f   : > { %v1500_v0 = vpop.permute.xlu1 %1499  ;;  %v1630_v53 = vpop.permute.xlu0 %1629  ;;  %2336 = vst.msk [vmem:[#allocation3 + $0x108] sm:$0x1] %vm2325_vm13, %v8610_v59  ;;  %2337 = vst.msk [vmem:[#allocation3 + $0x120] sm:$0x1] %vm2325_vm13, %v8610_v59  ;;  %v8648_v22 = vld [vmem:[#allocation149_spill] sm:$0xff]  ;;  %v8650_v36 = vld [vmem:[#allocation115_spill] sm:$0xff] }
 0x270   : > { %v1901_v19 = vsel %vm1880_vm9, %v1868_v49, %v1500_v0  ;;  %v1935_v54 = vsel %vm1913_vm10, %v1902_v17, %v1630_v53  ;;  %v1740_v0 = vsel %vm1715_vm3, %v1707_v60, %v8614_v32  ;;  %2338 = vst.msk [vmem:[#allocation3 + $0x138] sm:$0x1] %vm2325_vm13, %v8610_v59  ;;  %2339 = vst.msk [vmem:[#allocation3 + $0x150] sm:$0x1] %vm2325_vm13, %v8610_v59  ;;  %v2423_v62 = vld [vmem:[#allocation3 + $0x9] sm:$0xff]  ;;  %v8622_v17 = vld [vmem:[#allocation142_spill] sm:$0xff] }
 0x271   : > { %2340 = vst.msk [vmem:[#allocation3 + $0x168] sm:$0x1] %vm2325_vm13, %v8610_v59  ;;  %2341 = vst.msk [vmem:[#allocation3 + $0x180] sm:$0x1] %vm2325_vm13, %v8610_v59  ;;  %v1773_v29 = vsel %vm1748_vm5, %v1740_v0, %v8616_v52  ;;  %2713 = vrot.lane.b32.xlu1 %v2423_v62, %s5022_s15  ;;  %v1711_v32 = vsel %vm295_vm0, %v4952_v30, %v8636_v47  ;;  %v8637_v52 = vld [vmem:[#allocation64_spill] sm:$0xff]  ;;  %v8651_v18 = vld [vmem:[#allocation47_spill] sm:$0xff] }
 0x272   : > { %2342 = vst.msk [vmem:[#allocation3 + $0x29] sm:$0x1] %vm2325_vm13, %v8610_v59  ;;  %2343 = vst.msk [vmem:[#allocation3 + $0x41] sm:$0x1] %vm2325_vm13, %v8610_v59  ;;  %v1806_v53 = vsel %vm1781_vm6, %v1773_v29, %v8618_v25  ;;  %v1712_v29 = vsel %vm295_vm0, %v4953_v27, %v8637_v52  ;;  %v6857_v27 = vld [vmem:[%s8270_s2] ss:$0 sm:$0xff] }
 0x273   : > { %v1628_v21 = vpop.permute.xlu1 %1627  ;;  %v1506_v9 = vpop.permute.xlu0 %1505  ;;  %2344 = vst.msk [vmem:[#allocation3 + $0x59] sm:$0x1] %vm2325_vm13, %v8610_v59  ;;  %2345 = vst.msk [vmem:[#allocation3 + $0x71] sm:$0x1] %vm2325_vm13, %v8610_v59  ;;  %v1839_v49 = vsel %vm1814_vm7, %v1806_v53, %v8620_v61  ;;  %v1745_v25 = vsel %vm1715_vm3, %v1712_v29, %v8639_v50  ;;  %v8640_v53 = vld [vmem:[#allocation113_spill] sm:$0xff]  ;;  %v8641_v61 = vld [vmem:[#allocation116_spill] sm:$0xff] }
 0x274   : > { %v1934_v34 = vsel %vm1913_vm10, %v1901_v19, %v1628_v21  ;;  %v1904_v46 = vsel %vm1880_vm9, %v1871_v63, %v1506_v9  ;;  %2346 = vst.msk [vmem:[#allocation3 + $0x89] sm:$0x1] %vm2325_vm13, %v8610_v59  ;;  %2347 = vst.msk [vmem:[#allocation3 + $0xa1] sm:$0x1] %vm2325_vm13, %v8610_v59  ;;  %v8621_v19 = vld [vmem:[#allocation123_spill] sm:$0xff] }
 0x275   : > { %4755 = vmatprep.mubr.msk.f32.mxu0 %vm1958_vm11, %v1934_v34  ;;  %2348 = vst.msk [vmem:[#allocation3 + $0xb9] sm:$0x1] %vm2325_vm13, %v8610_v59  ;;  %2349 = vst.msk [vmem:[#allocation3 + $0xd1] sm:$0x1] %vm2325_vm13, %v8610_v59  ;;  %v1840_v21 = vsel %vm1814_vm7, %v1807_v2, %v8621_v19  ;;  %v1872_v34 = vsel %vm1847_vm8, %v1839_v49, %v8622_v17  ;;  %v1778_v49 = vsel %vm1748_vm5, %v1745_v25, %v8641_v61  ;;  %v8643_v19 = vld [vmem:[#allocation49_spill] sm:$0xff]  ;;  %v8644_v17 = vld [vmem:[#allocation124_spill] sm:$0xff] }
 0x276   : > { %4756 = vmatmul.mubr.msk.f32.gmra.mrb[20].mxu0 %vm1958_vm11, %v1935_v54  ;;  %2350 = vst.msk [vmem:[#allocation3 + $0xe9] sm:$0x1] %vm2325_vm13, %v8610_v59  ;;  %2351 = vst.msk [vmem:[#allocation3 + $0x101] sm:$0x1] %vm2325_vm13, %v8610_v59  ;;  %v1873_v10 = vsel %vm1847_vm8, %v1840_v21, %v8623_v12  ;;  %v1811_v21 = vsel %vm1781_vm6, %v1778_v49, %v8643_v19  ;;  %v8645_v12 = vld [vmem:[#allocation127_spill] sm:$0xff] }
 0x277   : > { %v1504_v15 = vpop.permute.xlu1 %1503  ;;  %v1634_v13 = vpop.permute.xlu0 %1633  ;;  %2352 = vst.msk [vmem:[#allocation3 + $0x119] sm:$0x1] %vm2325_vm13, %v8610_v59  ;;  %2353 = vst.msk [vmem:[#allocation3 + $0x131] sm:$0x1] %vm2325_vm13, %v8610_v59 }
 0x278   : > { %v1903_v16 = vsel %vm1880_vm9, %v1870_v4, %v1504_v15  ;;  %v1937_v44 = vsel %vm1913_vm10, %v1904_v46, %v1634_v13  ;;  %2354 = vst.msk [vmem:[#allocation3 + $0x149] sm:$0x1] %vm2325_vm13, %v8610_v59  ;;  %2355 = vst.msk [vmem:[#allocation3 + $0x161] sm:$0x1] %vm2325_vm13, %v8610_v59  ;;  %v1710_v15 = vsel %vm295_vm0, %v4951_v28, %v8625_v26  ;;  %v8634_v46 = vld [vmem:[#allocation144_spill] sm:$0xff]  ;;  %v8649_v28 = vld [vmem:[#allocation95_spill] sm:$0xff] }
 0x279   : > { %2356 = vst.msk [vmem:[#allocation3 + $0x179] sm:$0x1] %vm2325_vm13, %v8610_v59  ;;  %2357 = vst.msk [vmem:[#allocation3 + $0x191] sm:$0x1] %vm2325_vm13, %v8610_v59  ;;  %v1743_v5 = vsel %vm1715_vm3, %v1710_v15, %v8627_v40  ;;  %v8632_v59 = vld [vmem:[#allocation122_spill] sm:$0xff] }
 0x27a   : > { %v1776_v13 = vsel %vm1748_vm5, %v1743_v5, %v8629_v6  ;;  %v1841_v48 = vsel %vm1814_vm7, %v1808_v11, %v8632_v59  ;;  %v8652_v6 = vld [vmem:[#allocation126_spill] sm:$0xff]  ;;  %v8653_v11 = vld [vmem:[#allocation148_spill] sm:$0xff] }
 0x27b   : > { %v1632_v24 = vpop.permute.xlu1 %1631  ;;  %v1510_v1 = vpop.permute.xlu0 %1509  ;;  %v1809_v4 = vsel %vm1781_vm6, %v1776_v13, %v8631_v41  ;;  %v8654_v59 = vld [vmem:[#allocation68_spill] sm:$0xff] }
 0x27c   : > { %v1936_v38 = vsel %vm1913_vm10, %v1903_v16, %v1632_v24  ;;  %v1906_v58 = vsel %vm1880_vm9, %v1873_v10, %v1510_v1  ;;  %v8633_v16 = vld [vmem:[#allocation125_spill] sm:$0xff]  ;;  %v1844_v10 = vsel %vm1814_vm7, %v1811_v21, %v8645_v12 }
 0x27d   : > { %4758 = vmatprep.mubr.msk.f32.mxu0 %vm1958_vm11, %v1936_v38  ;;  %v1842_v24 = vsel %vm1814_vm7, %v1809_v4, %v8633_v16  ;;  %v1874_v38 = vsel %vm1847_vm8, %v1841_v48, %v8634_v46  ;;  %v1877_v8 = vsel %vm1847_vm8, %v1844_v10, %v8648_v22  ;;  %v4955_v4 = vld [vmem:[#allocation2 + $0x170] sm:$0xff] }
 0x27e   : > { %4759 = vmatmul.mubr.msk.f32.gmra.mrb[22].mxu0 %vm1958_vm11, %v1937_v44  ;;  %v1875_v14 = vsel %vm1847_vm8, %v1842_v24, %v8635_v3  ;;  %v1714_v48 = vsel %vm295_vm0, %v4955_v4, %v8654_v59  ;;  %v8655_v24 = vld [vmem:[#allocation97_spill] sm:$0xff] }
 0x27f   : > { %v1508_v55 = vpop.permute.xlu1 %1507  ;;  %v1638_v20 = vpop.permute.xlu0 %1637  ;;  %v1747_v46 = vsel %vm1715_vm3, %v1714_v48, %v8655_v24  ;;  %v8656_v3 = vld [vmem:[#allocation117_spill] sm:$0xff] }
 0x280   : > { %v1905_v54 = vsel %vm1880_vm9, %v1872_v34, %v1508_v55  ;;  %v1939_v37 = vsel %vm1913_vm10, %v1906_v58, %v1638_v20  ;;  %v8638_v55 = vld [vmem:[#allocation93_spill] sm:$0xff]  ;;  %v8642_v20 = vld [vmem:[#allocation43_spill] sm:$0xff] }
 0x281   : > { %v1744_v23 = vsel %vm1715_vm3, %v1711_v32, %v8638_v55  ;;  %v4954_v58 = vld [vmem:[#allocation2 + $0x168] sm:$0xff] }
 0x282   : > { %v1777_v33 = vsel %vm1748_vm5, %v1744_v23, %v8640_v53 }
 0x283   : > { %v1636_v9 = vpop.permute.xlu1 %1635  ;;  %v1514_v57 = vpop.permute.xlu0 %1513  ;;  %v1810_v62 = vsel %vm1781_vm6, %v1777_v33, %v8642_v20 }
 0x284   : > { %v1938_v43 = vsel %vm1913_vm10, %v1905_v54, %v1636_v9  ;;  %v1908_v1 = vsel %vm1880_vm9, %v1875_v14, %v1514_v57  ;;  %v1843_v34 = vsel %vm1814_vm7, %v1810_v62, %v8644_v17  ;;  %v8646_v54 = vld [vmem:[#allocation146_spill] sm:$0xff]  ;;  %v1780_v14 = vsel %vm1748_vm5, %v1747_v46, %v8656_v3 }
 0x285   : > { %4761 = vmatprep.mubr.msk.f32.mxu0 %vm1958_vm11, %v1938_v43  ;;  %v1876_v9 = vsel %vm1847_vm8, %v1843_v34, %v8646_v54  ;;  %v8647_v43 = vld [vmem:[#allocation62_spill] sm:$0xff] }
 0x286   : > { %4762 = vmatmul.mubr.msk.f32.gmra.mrb[24].mxu0 %vm1958_vm11, %v1939_v37  ;;  %v1713_v31 = vsel %vm295_vm0, %v4954_v58, %v8647_v43  ;;  %vm3897_vm0 = vcmask 457728  }
 0x287   : > { %v1512_v35 = vpop.permute.xlu1 %1511  ;;  %v1642_v63 = vpop.permute.xlu0 %1641  ;;  %v1746_v26 = vsel %vm1715_vm3, %v1713_v31, %v8649_v28 }
 0x288   : > { %v1907_v60 = vsel %vm1880_vm9, %v1874_v38, %v1512_v35  ;;  %v1941_v0 = vsel %vm1913_vm10, %v1908_v1, %v1642_v63  ;;  %v1779_v40 = vsel %vm1748_vm5, %v1746_v26, %v8650_v36 }
 0x289   : > { %v1812_v35 = vsel %vm1781_vm6, %v1779_v40, %v8651_v18 }
 0x28a   : > { %v1845_v13 = vsel %vm1814_vm7, %v1812_v35, %v8652_v6 }
 0x28b   : > { %v1640_v44 = vpop.permute.xlu1 %1639  ;;  %v1518_v39 = vpop.permute.xlu0 %1517  ;;  %v1878_v41 = vsel %vm1847_vm8, %v1845_v13, %v8653_v11 }
 0x28c   : > { %v1940_v56 = vsel %vm1913_vm10, %v1907_v60, %v1640_v44  ;;  %v1910_v15 = vsel %vm1880_vm9, %v1877_v8, %v1518_v39  ;;  %v8657_v44 = vld [vmem:[#allocation51_spill] sm:$0xff] }
 0x28d   : > { %4764 = vmatprep.mubr.msk.f32.mxu0 %vm1958_vm11, %v1940_v56  ;;  %v1813_v1 = vsel %vm1781_vm6, %v1780_v14, %v8657_v44  ;;  %v8658_v56 = vld [vmem:[#allocation128_spill] sm:$0xff] }
 0x28e   : > { %4765 = vmatmul.mubr.msk.f32.gmra.mrb[26].mxu0 %vm1958_vm11, %v1941_v0  ;;  %v1846_v30 = vsel %vm1814_vm7, %v1813_v1, %v8658_v56 }
 0x28f   : > { %v1516_v2 = vpop.permute.xlu1 %1515  ;;  %v1646_v7 = vpop.permute.xlu0 %1645 }
 0x290   : > { %v1909_v37 = vsel %vm1880_vm9, %v1876_v9, %v1516_v2  ;;  %v1943_v5 = vsel %vm1913_vm10, %v1910_v15, %v1646_v7 }
 0x293   : > { %v1644_v57 = vpop.permute.xlu1 %1643  ;;  %v1520_v45 = vpop.permute.xlu0 %1519 }
 0x294   : > { %v1942_v51 = vsel %vm1913_vm10, %v1909_v37, %v1644_v57  ;;  %v1911_v63 = vsel %vm1880_vm9, %v1878_v41, %v1520_v45 }
 0x295   : > { %4767 = vmatprep.mubr.msk.f32.mxu0 %vm1958_vm11, %v1942_v51 }
 0x296   : > { %4768 = vmatmul.mubr.msk.f32.gmra.mrb[28].mxu0 %vm1958_vm11, %v1943_v5 }
 0x297   : > { %v1394_v42 = vpop.permute.xlu1 %1393 }
 0x298   : > { %v1648_v16 = vpop.permute.xlu0 %1647  ;;  %v1879_v47 = vsel %vm1847_vm8, %v1846_v30, %v1394_v42 }
 0x299   : > { %v1944_v38 = vsel %vm1913_vm10, %v1911_v63, %v1648_v16 }
 0x29a   : > { %4770 = vmatprep.mubr.msk.f32.mxu0 %vm1958_vm11, %v1944_v38 }
 0x29b   : > { %v1522_v60 = vpop.permute.xlu1 %1521 }
 0x29c   : > { %v1912_v32 = vsel %vm1880_vm9, %v1879_v47, %v1522_v60 }
 0x29f   : > { %v1650_v0 = vpop.permute.xlu1 %1649 }
 0x2a0   : > { %v1945_v39 = vsel %vm1913_vm10, %v1912_v32, %v1650_v0 }
 0x2a1   : > { %4771 = vmatmul.mubr.msk.f32.gmra.mrb[30].mxu0 %vm1958_vm11, %v1945_v39 }
 0x2f9   : > { %v4727_v52 = vpop.f32.mrb[0].mxu0 }
 0x2fa   : > { %v2131_v29 = vadd.f32 %v4727_v52, %v6857_v27  ;;  %v2125_v55 = vpop.f32.mrb[1].mxu0 }
 0x2fb   : > { %v2126_v23 = vadd.f32 %v6857_v27, %v2125_v55 }
 0x2fc   : > { %v2285_v50 = vmax.f32 %v2131_v29, 0.0 }
 0x2fd   : > { %v2284_v25 = vmax.f32 %v2126_v23, 0.0 }
 0x2fe   : > { %2359 = vst.msk [vmem:[#allocation3 + $0x21] sm:$0xff] %vm1715_vm3, %v2285_v50 }
 0x2ff   : > { %2358 = vst.msk [vmem:[#allocation3 + $0x19] sm:$0xff] %vm1715_vm3, %v2284_v25 }
 0x301   : > { %v4730_v53 = vpop.f32.mrb[2].mxu0 }
 0x302   : > { %v2141_v33 = vadd.f32 %v4730_v53, %v6857_v27  ;;  %v2135_v2 = vpop.f32.mrb[3].mxu0 }
 0x303   : > { %v2136_v61 = vadd.f32 %v6857_v27, %v2135_v2 }
 0x304   : > { %v2287_v49 = vmax.f32 %v2141_v33, 0.0 }
 0x305   : > { %v2286_v20 = vmax.f32 %v2136_v61, 0.0  ;;  %v2425_v62 = vld [vmem:[#allocation3 + $0x21] sm:$0xff] }
 0x306   : > { %2361 = vst.msk [vmem:[#allocation3 + $0x39] sm:$0xff] %vm1715_vm3, %v2287_v49  ;;  %2717 = vrot.lane.b32.xlu1 %v2425_v62, %s5022_s15  ;;  %v2424_v19 = vld [vmem:[#allocation3 + $0x19] sm:$0xff] }
 0x307   : > { %2360 = vst.msk [vmem:[#allocation3 + $0x31] sm:$0xff] %vm1715_vm3, %v2286_v20  ;;  %2715 = vrot.lane.b32.xlu0 %v2424_v19, %s5022_s15 }
 0x309   : > { %v4733_v21 = vpop.f32.mrb[4].mxu0 }
 0x30a   : > { %v2151_v17 = vadd.f32 %v4733_v21, %v6857_v27  ;;  %v2145_v34 = vpop.f32.mrb[5].mxu0 }
 0x30b   : > { %v2146_v7 = vadd.f32 %v6857_v27, %v2145_v34 }
 0x30c   : > { %v2289_v12 = vmax.f32 %v2151_v17, 0.0 }
 0x30d   : > { %v2288_v10 = vmax.f32 %v2146_v7, 0.0  ;;  %v6871_v54 = vld [vmem:[#allocation3 + $0x39] sm:$0xff] }
 0x30e   : > { %2363 = vst.msk [vmem:[#allocation3 + $0x51] sm:$0xff] %vm1715_vm3, %v2289_v12  ;;  %2721 = vrot.lane.b32.xlu1 %v6871_v54, %s5022_s15  ;;  %v6876_v9 = vld [vmem:[#allocation3 + $0x31] sm:$0xff] }
 0x30f   : > { %2362 = vst.msk [vmem:[#allocation3 + $0x49] sm:$0xff] %vm1715_vm3, %v2288_v10  ;;  %2719 = vrot.lane.b32.xlu0 %v6876_v9, %s5022_s15 }
 0x311   : > { %v4736_v58 = vpop.f32.mrb[6].mxu0 }
 0x312   : > { %v2161_v43 = vadd.f32 %v4736_v58, %v6857_v27  ;;  %v2155_v31 = vpop.f32.mrb[7].mxu0 }
 0x313   : > { %v2156_v22 = vadd.f32 %v6857_v27, %v2155_v31 }
 0x314   : > { %v2291_v8 = vmax.f32 %v2161_v43, 0.0 }
 0x315   : > { %v2290_v37 = vmax.f32 %v2156_v22, 0.0  ;;  %v6883_v57 = vld [vmem:[#allocation3 + $0x51] sm:$0xff] }
 0x316   : > { %2365 = vst.msk [vmem:[#allocation3 + $0x69] sm:$0xff] %vm1715_vm3, %v2291_v8  ;;  %2725 = vrot.lane.b32.xlu1 %v6883_v57, %s5022_s15  ;;  %v6888_v28 = vld [vmem:[#allocation3 + $0x49] sm:$0xff] }
 0x317   : > { %2364 = vst.msk [vmem:[#allocation3 + $0x61] sm:$0xff] %vm1715_vm3, %v2290_v37  ;;  %2723 = vrot.lane.b32.xlu0 %v6888_v28, %s5022_s15 }
 0x319   : > { %v4739_v26 = vpop.f32.mrb[8].mxu0 }
 0x31a   : > { %v2171_v15 = vadd.f32 %v4739_v26, %v6857_v27  ;;  %v2165_v51 = vpop.f32.mrb[9].mxu0 }
 0x31b   : > { %v2166_v36 = vadd.f32 %v6857_v27, %v2165_v51 }
 0x31c   : > { %v2293_v40 = vmax.f32 %v2171_v15, 0.0 }
 0x31d   : > { %v2292_v5 = vmax.f32 %v2166_v36, 0.0  ;;  %v6895_v45 = vld [vmem:[#allocation3 + $0x69] sm:$0xff] }
 0x31e   : > { %2367 = vst.msk [vmem:[#allocation3 + $0x81] sm:$0xff] %vm1715_vm3, %v2293_v40  ;;  %2729 = vrot.lane.b32.xlu1 %v6895_v45, %s5022_s15  ;;  %v6900_v18 = vld [vmem:[#allocation3 + $0x61] sm:$0xff] }
 0x31f   : > { %2366 = vst.msk [vmem:[#allocation3 + $0x79] sm:$0xff] %vm1715_vm3, %v2292_v5  ;;  %2727 = vrot.lane.b32.xlu0 %v6900_v18, %s5022_s15 }
 0x321   : > { %v4742_v35 = vpop.f32.mrb[10].mxu0 }
 0x322   : > { %v2181_v6 = vadd.f32 %v4742_v35, %v6857_v27  ;;  %v2175_v13 = vpop.f32.mrb[11].mxu0 }
 0x323   : > { %v2176_v42 = vadd.f32 %v6857_v27, %v2175_v13 }
 0x324   : > { %v2295_v11 = vmax.f32 %v2181_v6, 0.0 }
 0x325   : > { %v2294_v41 = vmax.f32 %v2176_v42, 0.0  ;;  %v6907_v4 = vld [vmem:[#allocation3 + $0x81] sm:$0xff] }
 0x326   : > { %2369 = vst.msk [vmem:[#allocation3 + $0x99] sm:$0xff] %vm1715_vm3, %v2295_v11  ;;  %2733 = vrot.lane.b32.xlu1 %v6907_v4, %s5022_s15  ;;  %v6912_v59 = vld [vmem:[#allocation3 + $0x79] sm:$0xff] }
 0x327   : > { %2368 = vst.msk [vmem:[#allocation3 + $0x91] sm:$0xff] %vm1715_vm3, %v2294_v41  ;;  %2731 = vrot.lane.b32.xlu0 %v6912_v59, %s5022_s15 }
 0x329   : > { %v4745_v48 = vpop.f32.mrb[12].mxu0 }
 0x32a   : > { %v2191_v63 = vadd.f32 %v4745_v48, %v6857_v27  ;;  %v2185_v16 = vpop.f32.mrb[13].mxu0 }
 0x32b   : > { %v2186_v24 = vadd.f32 %v6857_v27, %v2185_v16 }
 0x32c   : > { %v2297_v46 = vmax.f32 %v2191_v63, 0.0 }
 0x32d   : > { %v2296_v38 = vmax.f32 %v2186_v24, 0.0  ;;  %v6919_v3 = vld [vmem:[#allocation3 + $0x99] sm:$0xff] }
 0x32e   : > { %2371 = vst.msk [vmem:[#allocation3 + $0xb1] sm:$0xff] %vm1715_vm3, %v2297_v46  ;;  %2737 = vrot.lane.b32.xlu1 %v6919_v3, %s5022_s15  ;;  %v6924_v14 = vld [vmem:[#allocation3 + $0x91] sm:$0xff] }
 0x32f   : > { %2370 = vst.msk [vmem:[#allocation3 + $0xa9] sm:$0xff] %vm1715_vm3, %v2296_v38  ;;  %2735 = vrot.lane.b32.xlu0 %v6924_v14, %s5022_s15 }
 0x331   : > { %v4748_v60 = vpop.f32.mrb[14].mxu0 }
 0x332   : > { %v2201_v44 = vadd.f32 %v4748_v60, %v6857_v27  ;;  %v2195_v1 = vpop.f32.mrb[15].mxu0 }
 0x333   : > { %v2196_v56 = vadd.f32 %v6857_v27, %v2195_v1 }
 0x334   : > { %v2299_v30 = vmax.f32 %v2201_v44, 0.0 }
 0x335   : > { %v2298_v47 = vmax.f32 %v2196_v56, 0.0  ;;  %v6931_v32 = vld [vmem:[#allocation3 + $0xb1] sm:$0xff] }
 0x336   : > { %2373 = vst.msk [vmem:[#allocation3 + $0xc9] sm:$0xff] %vm1715_vm3, %v2299_v30  ;;  %2741 = vrot.lane.b32.xlu1 %v6931_v32, %s5022_s15  ;;  %v6936_v0 = vld [vmem:[#allocation3 + $0xa9] sm:$0xff] }
 0x337   : > { %2372 = vst.msk [vmem:[#allocation3 + $0xc1] sm:$0xff] %vm1715_vm3, %v2298_v47  ;;  %2739 = vrot.lane.b32.xlu0 %v6936_v0, %s5022_s15 }
 0x339   : > { %v4751_v39 = vpop.f32.mrb[16].mxu0 }
 0x33a   : > { %v2211_v52 = vadd.f32 %v4751_v39, %v6857_v27  ;;  %v2205_v29 = vpop.f32.mrb[17].mxu0 }
 0x33b   : > { %v2206_v55 = vadd.f32 %v6857_v27, %v2205_v29 }
 0x33c   : > { %v2301_v23 = vmax.f32 %v2211_v52, 0.0 }
 0x33d   : > { %v2300_v50 = vmax.f32 %v2206_v55, 0.0  ;;  %v2439_v25 = vld [vmem:[#allocation3 + $0xc9] sm:$0xff] }
 0x33e   : > { %2375 = vst.msk [vmem:[#allocation3 + $0xe1] sm:$0xff] %vm1715_vm3, %v2301_v23  ;;  %2745 = vrot.lane.b32.xlu1 %v2439_v25, %s5022_s15  ;;  %v2438_v53 = vld [vmem:[#allocation3 + $0xc1] sm:$0xff] }
 0x33f   : > { %2374 = vst.msk [vmem:[#allocation3 + $0xd9] sm:$0xff] %vm1715_vm3, %v2300_v50  ;;  %2743 = vrot.lane.b32.xlu0 %v2438_v53, %s5022_s15 }
 0x341   : > { %v4754_v33 = vpop.f32.mrb[18].mxu0 }
 0x342   : > { %v2221_v2 = vadd.f32 %v4754_v33, %v6857_v27  ;;  %v2215_v61 = vpop.f32.mrb[19].mxu0 }
 0x343   : > { %v2216_v49 = vadd.f32 %v6857_v27, %v2215_v61 }
 0x344   : > { %v2303_v20 = vmax.f32 %v2221_v2, 0.0 }
 0x345   : > { %v2302_v62 = vmax.f32 %v2216_v49, 0.0  ;;  %v2441_v19 = vld [vmem:[#allocation3 + $0xe1] sm:$0xff] }
 0x346   : > { %2377 = vst.msk [vmem:[#allocation3 + $0xf9] sm:$0xff] %vm1715_vm3, %v2303_v20  ;;  %2749 = vrot.lane.b32.xlu1 %v2441_v19, %s5022_s15  ;;  %v2440_v21 = vld [vmem:[#allocation3 + $0xd9] sm:$0xff]  ;;  %v2455_v20 = vld [vmem:[#allocation3 + $0xa] sm:$0xff]  ;;  %v2454_v19 = vld [vmem:[#allocation3 + $0x2] sm:$0xff] }
 0x347   : > { %2376 = vst.msk [vmem:[#allocation3 + $0xf1] sm:$0xff] %vm1715_vm3, %v2302_v62  ;;  %2747 = vrot.lane.b32.xlu0 %v2440_v21, %s5022_s15  ;;  %v2457_v21 = vld [vmem:[#allocation3 + $0x22] sm:$0xff] }
 0x349   : > { %v4757_v17 = vpop.f32.mrb[20].mxu0 }
 0x34a   : > { %v2231_v34 = vadd.f32 %v4757_v17, %v6857_v27  ;;  %v2225_v7 = vpop.f32.mrb[21].mxu0  ;;  %v6993_v17 = vld [vmem:[#allocation3 + $0x3a] sm:$0xff] }
 0x34b   : > { %v2226_v12 = vadd.f32 %v6857_v27, %v2225_v7  ;;  %v7001_v7 = vld [vmem:[#allocation3 + $0x52] sm:$0xff] }
 0x34c   : > { %v2305_v10 = vmax.f32 %v2231_v34, 0.0  ;;  %v6997_v34 = vld [vmem:[#allocation3 + $0x32] sm:$0xff] }
 0x34d   : > { %v2304_v58 = vmax.f32 %v2226_v12, 0.0  ;;  %v2443_v43 = vld [vmem:[#allocation3 + $0xf9] sm:$0xff]  ;;  %v7005_v12 = vld [vmem:[#allocation3 + $0x4a] sm:$0xff] }
 0x34e   : > { %2379 = vst.msk [vmem:[#allocation3 + $0x111] sm:$0xff] %vm1715_vm3, %v2305_v10  ;;  %2753 = vrot.lane.b32.xlu1 %v2443_v43, %s5022_s15  ;;  %v2442_v31 = vld [vmem:[#allocation3 + $0xf1] sm:$0xff]  ;;  %v7017_v43 = vld [vmem:[#allocation3 + $0x82] sm:$0xff] }
 0x34f   : > { %2378 = vst.msk [vmem:[#allocation3 + $0x109] sm:$0xff] %vm1715_vm3, %v2304_v58  ;;  %2751 = vrot.lane.b32.xlu0 %v2442_v31, %s5022_s15  ;;  %v7009_v10 = vld [vmem:[#allocation3 + $0x6a] sm:$0xff]  ;;  %v7013_v58 = vld [vmem:[#allocation3 + $0x62] sm:$0xff]  ;;  %v7021_v31 = vld [vmem:[#allocation3 + $0x7a] sm:$0xff] }
 0x351   : > { %v4760_v22 = vpop.f32.mrb[22].mxu0 }
 0x352   : > { %v2241_v8 = vadd.f32 %v4760_v22, %v6857_v27  ;;  %v2235_v37 = vpop.f32.mrb[23].mxu0  ;;  %v7025_v22 = vld [vmem:[#allocation3 + $0x9a] sm:$0xff] }
 0x353   : > { %v2236_v26 = vadd.f32 %v6857_v27, %v2235_v37  ;;  %v7033_v37 = vld [vmem:[#allocation3 + $0xb2] sm:$0xff] }
 0x354   : > { %v2307_v15 = vmax.f32 %v2241_v8, 0.0  ;;  %v7029_v8 = vld [vmem:[#allocation3 + $0x92] sm:$0xff] }
 0x355   : > { %v2306_v51 = vmax.f32 %v2236_v26, 0.0  ;;  %v2445_v36 = vld [vmem:[#allocation3 + $0x111] sm:$0xff] }
 0x356   : > { %2381 = vst.msk [vmem:[#allocation3 + $0x129] sm:$0xff] %vm1715_vm3, %v2307_v15  ;;  %2757 = vrot.lane.b32.xlu1 %v2445_v36, %s5022_s15  ;;  %v2444_v40 = vld [vmem:[#allocation3 + $0x109] sm:$0xff] }
 0x357   : > { %2380 = vst.msk [vmem:[#allocation3 + $0x121] sm:$0xff] %vm1715_vm3, %v2306_v51  ;;  %2755 = vrot.lane.b32.xlu0 %v2444_v40, %s5022_s15  ;;  %v7037_v26 = vld [vmem:[#allocation3 + $0xaa] sm:$0xff]  ;;  %v7045_v51 = vld [vmem:[#allocation3 + $0xc2] sm:$0xff]  ;;  %v7053_v40 = vld [vmem:[#allocation3 + $0xda] sm:$0xff] }
 0x358   : > { %v7041_v15 = vld [vmem:[#allocation3 + $0xca] sm:$0xff]  ;;  %v7049_v36 = vld [vmem:[#allocation3 + $0xe2] sm:$0xff] }
 0x359   : > { %v4763_v5 = vpop.f32.mrb[24].mxu0 }
 0x35a   : > { %v2251_v35 = vadd.f32 %v4763_v5, %v6857_v27  ;;  %v2245_v6 = vpop.f32.mrb[25].mxu0  ;;  %v7057_v5 = vld [vmem:[#allocation3 + $0xfa] sm:$0xff] }
 0x35b   : > { %v2246_v13 = vadd.f32 %v6857_v27, %v2245_v6  ;;  %v2477_v6 = vld [vmem:[#allocation3 + $0x112] sm:$0xff] }
 0x35c   : > { %v2309_v42 = vmax.f32 %v2251_v35, 0.0  ;;  %v7061_v35 = vld [vmem:[#allocation3 + $0xf2] sm:$0xff] }
 0x35d   : > { %v2308_v11 = vmax.f32 %v2246_v13, 0.0  ;;  %v2447_v41 = vld [vmem:[#allocation3 + $0x129] sm:$0xff] }
 0x35e   : > { %2383 = vst.msk [vmem:[#allocation3 + $0x141] sm:$0xff] %vm1715_vm3, %v2309_v42  ;;  %2761 = vrot.lane.b32.xlu1 %v2447_v41, %s5022_s15  ;;  %v2446_v48 = vld [vmem:[#allocation3 + $0x121] sm:$0xff]  ;;  %v7066_v13 = vld [vmem:[#allocation3 + $0x10a] sm:$0xff] }
 0x35f   : > { %2382 = vst.msk [vmem:[#allocation3 + $0x139] sm:$0xff] %vm1715_vm3, %v2308_v11  ;;  %2759 = vrot.lane.b32.xlu0 %v2446_v48, %s5022_s15  ;;  %v2479_v42 = vld [vmem:[#allocation3 + $0x12a] sm:$0xff]  ;;  %v7070_v11 = vpop.permute.xlu1 %2713  ;;  %v2478_v41 = vld [vmem:[#allocation3 + $0x122] sm:$0xff]  ;;  %v7073_v48 = vpop.permute.xlu0 %2711 }
 0x360   : > { %8659 = vst [vmem:[#allocation8_spill] sm:$0xff] %v7070_v11  ;;  %8660 = vst [vmem:[#allocation9_spill] sm:$0xff] %v7073_v48  ;;  %v7168_v11 = vld [vmem:[#allocation3 + $0xa8] sm:$0xff]  ;;  %v3963_v48 = vld [vmem:[%s8271_s3] sm:$0xff] }
 0x361   : > { %v4766_v63 = vpop.f32.mrb[26].mxu0  ;;  %8671 = vst [vmem:[#allocation16_spill] sm:$0xff] %v7168_v11 }
 0x362   : > { %v2261_v16 = vadd.f32 %v4766_v63, %v6857_v27  ;;  %v2255_v24 = vpop.f32.mrb[27].mxu0 }
 0x363   : > { %v2256_v46 = vadd.f32 %v6857_v27, %v2255_v24 }
 0x364   : > { %v2311_v38 = vmax.f32 %v2261_v16, 0.0 }
 0x365   : > { %v2310_v60 = vmax.f32 %v2256_v46, 0.0  ;;  %v2449_v44 = vld [vmem:[#allocation3 + $0x141] sm:$0xff] }
 0x366   : > { %2385 = vst.msk [vmem:[#allocation3 + $0x159] sm:$0xff] %vm1715_vm3, %v2311_v38  ;;  %2765 = vrot.lane.b32.xlu1 %v2449_v44, %s5022_s15  ;;  %v2448_v1 = vld [vmem:[#allocation3 + $0x139] sm:$0xff]  ;;  %v2481_v63 = vld [vmem:[#allocation3 + $0x142] sm:$0xff] }
 0x367   : > { %2384 = vst.msk [vmem:[#allocation3 + $0x151] sm:$0xff] %vm1715_vm3, %v2310_v60  ;;  %2763 = vrot.lane.b32.xlu0 %v2448_v1, %s5022_s15  ;;  %v2480_v16 = vld [vmem:[#allocation3 + $0x13a] sm:$0xff] }
 0x369   : > { %v4769_v56 = vpop.f32.mrb[28].mxu0 }
 0x36a   : > { %v2271_v30 = vadd.f32 %v4769_v56, %v6857_v27  ;;  %v2265_v47 = vpop.f32.mrb[29].mxu0 }
 0x36b   : > { %v2266_v39 = vadd.f32 %v6857_v27, %v2265_v47 }
 0x36c   : > { %v2313_v52 = vmax.f32 %v2271_v30, 0.0 }
 0x36d   : > { %v2312_v29 = vmax.f32 %v2266_v39, 0.0  ;;  %v2451_v55 = vld [vmem:[#allocation3 + $0x159] sm:$0xff] }
 0x36e   : > { %2387 = vst.msk [vmem:[#allocation3 + $0x171] sm:$0xff] %vm1715_vm3, %v2313_v52  ;;  %2769 = vrot.lane.b32.xlu1 %v2451_v55, %s5022_s15  ;;  %v2450_v23 = vld [vmem:[#allocation3 + $0x151] sm:$0xff]  ;;  %v2483_v38 = vld [vmem:[#allocation3 + $0x15a] sm:$0xff] }
 0x36f   : > { %2386 = vst.msk [vmem:[#allocation3 + $0x169] sm:$0xff] %vm1715_vm3, %v2312_v29  ;;  %2767 = vrot.lane.b32.xlu0 %v2450_v23, %s5022_s15  ;;  %v2482_v60 = vld [vmem:[#allocation3 + $0x152] sm:$0xff]  ;;  %v7092_v39 = vld [vmem:[#allocation3 + $0x20] sm:$0xff] }
 0x370   : > { %v7096_v29 = vld [vmem:[#allocation3 + $0x18] sm:$0xff] }
 0x371   : > { %v7104_v23 = vld [vmem:[#allocation3 + $0x38] sm:$0xff] }
 0x374   : > { %v4772_v50 = vpop.f32.mrb[30].mxu0 }
 0x375   : > { %v2281_v25 = vadd.f32 %v4772_v50, %v6857_v27  ;;  %v2275_v53 = vpop.f32.mrb[31].mxu0  ;;  %v2453_v33 = vld [vmem:[#allocation3 + $0x171] sm:$0xff] }
 0x376   : > { %v2276_v2 = vadd.f32 %v6857_v27, %v2275_v53  ;;  %2773 = vrot.lane.b32.xlu1 %v2453_v33, %s5022_s15  ;;  %v2452_v61 = vld [vmem:[#allocation3 + $0x169] sm:$0xff]  ;;  %v2456_v27 = vld [vmem:[#allocation3 + $0x1a] sm:$0xff]  ;;  %v2485_v56 = vld [vmem:[#allocation3 + $0x172] sm:$0xff] }
 0x377   : > { %v2315_v49 = vmax.f32 %v2281_v25, 0.0  ;;  %2771 = vrot.lane.b32.xlu0 %v2452_v61, %s5022_s15  ;;  %v2484_v30 = vld [vmem:[#allocation3 + $0x16a] sm:$0xff] }
 0x378   : > { %v2314_v62 = vmax.f32 %v2276_v2, 0.0  ;;  %v7078_v24 = vpop.permute.xlu1 %2717  ;;  %v7108_v25 = vld [vmem:[#allocation3 + $0x30] sm:$0xff]  ;;  %v7120_v61 = vld [vmem:[#allocation3 + $0x48] sm:$0xff] }
 0x379   : > { %2389 = vst.msk [vmem:[#allocation3 + $0x189] sm:$0xff] %vm1715_vm3, %v2315_v49  ;;  %v7080_v46 = vpop.permute.xlu0 %2715  ;;  %v7116_v33 = vld [vmem:[#allocation3 + $0x50] sm:$0xff] }
 0x37a   : > { %2388 = vst.msk [vmem:[#allocation3 + $0x181] sm:$0xff] %vm1715_vm3, %v2314_v62  ;;  %2841 = vrot.lane.b32.xlu1 %v2455_v20, %s5024_s17  ;;  %v7128_v20 = vld [vmem:[#allocation3 + $0x68] sm:$0xff] }
 0x37b   : > { %2839 = vrot.lane.b32.xlu0 %v2454_v19, %s5024_s17  ;;  %v7132_v19 = vld [vmem:[#allocation3 + $0x60] sm:$0xff] }
 0x37e   : > { %2845 = vrot.lane.b32.xlu1 %v2457_v21, %s5024_s17 }
 0x37f   : > { %2843 = vrot.lane.b32.xlu0 %v2456_v27, %s5024_s17  ;;  %v7140_v27 = vld [vmem:[#allocation3 + $0x80] sm:$0xff] }
 0x380   : > { %v7084_v44 = vpop.permute.xlu1 %2721 }
 0x381   : > { %v7086_v1 = vpop.permute.xlu0 %2719 }
 0x382   : > { %2849 = vrot.lane.b32.xlu1 %v6993_v17, %s5024_s17 }
 0x383   : > { %2847 = vrot.lane.b32.xlu0 %v6997_v34, %s5024_s17 }
 0x386   : > { %2853 = vrot.lane.b32.xlu1 %v7001_v7, %s5024_s17 }
 0x387   : > { %2851 = vrot.lane.b32.xlu0 %v7005_v12, %s5024_s17 }
 0x388   : > { %v7090_v47 = vpop.permute.xlu1 %2725 }
 0x389   : > { %v7094_v52 = vpop.permute.xlu0 %2723 }
 0x38a   : > { %2857 = vrot.lane.b32.xlu1 %v7009_v10, %s5024_s17 }
 0x38b   : > { %2855 = vrot.lane.b32.xlu0 %v7013_v58, %s5024_s17 }
 0x38e   : > { %2861 = vrot.lane.b32.xlu1 %v7017_v43, %s5024_s17 }
 0x38f   : > { %2859 = vrot.lane.b32.xlu0 %v7021_v31, %s5024_s17 }
 0x390   : > { %v7102_v55 = vpop.permute.xlu1 %2729 }
 0x391   : > { %v7106_v50 = vpop.permute.xlu0 %2727 }
 0x392   : > { %2865 = vrot.lane.b32.xlu1 %v7025_v22, %s5024_s17 }
 0x393   : > { %2863 = vrot.lane.b32.xlu0 %v7029_v8, %s5024_s17 }
 0x396   : > { %2869 = vrot.lane.b32.xlu1 %v7033_v37, %s5024_s17 }
 0x397   : > { %2867 = vrot.lane.b32.xlu0 %v7037_v26, %s5024_s17 }
 0x398   : > { %v7114_v53 = vpop.permute.xlu1 %2733 }
 0x399   : > { %8661 = vst [vmem:[#allocation66_spill] sm:$0xff] %v7114_v53  ;;  %v7118_v2 = vpop.permute.xlu0 %2731  ;;  %v3967_v53 = vld [vmem:[%s8271_s3 + $0x20] sm:$0xff] }
 0x39a   : > { %2873 = vrot.lane.b32.xlu1 %v7041_v15, %s5024_s17 }
 0x39b   : > { %2871 = vrot.lane.b32.xlu0 %v7045_v51, %s5024_s17 }
 0x39e   : > { %2877 = vrot.lane.b32.xlu1 %v7049_v36, %s5024_s17 }
 0x39f   : > { %2875 = vrot.lane.b32.xlu0 %v7053_v40, %s5024_s17 }
 0x3a0   : > { %v7126_v49 = vpop.permute.xlu1 %2737 }
 0x3a1   : > { %8662 = vst [vmem:[#allocation71_spill] sm:$0xff] %v7126_v49  ;;  %v7130_v62 = vpop.permute.xlu0 %2735  ;;  %v3965_v49 = vld [vmem:[%s8271_s3 + $0x10] sm:$0xff] }
 0x3a2   : > { %2881 = vrot.lane.b32.xlu1 %v7057_v5, %s5024_s17  ;;  %8663 = vst [vmem:[#allocation11_spill] sm:$0xff] %v7130_v62  ;;  %v7202_v62 = vld [vmem:[#allocation3 + $0xd8] sm:$0xff] }
 0x3a3   : > { %2879 = vrot.lane.b32.xlu0 %v7061_v35, %s5024_s17  ;;  %8678 = vst [vmem:[#allocation28_spill] sm:$0xff] %v7202_v62 }
 0x3a6   : > { %2885 = vrot.lane.b32.xlu1 %v2477_v6, %s5024_s17 }
 0x3a7   : > { %2883 = vrot.lane.b32.xlu0 %v7066_v13, %s5024_s17 }
 0x3a8   : > { %v7138_v21 = vpop.permute.xlu1 %2741 }
 0x3a9   : > { %8664 = vst [vmem:[#allocation15_spill] sm:$0xff] %v7138_v21  ;;  %v7142_v6 = vpop.permute.xlu0 %2739 }
 0x3aa   : > { %2889 = vrot.lane.b32.xlu1 %v2479_v42, %s5024_s17  ;;  %8665 = vst [vmem:[#allocation70_spill] sm:$0xff] %v7142_v6  ;;  %v7144_v42 = vld [vmem:[#allocation3 + $0x78] sm:$0xff]  ;;  %v7186_v6 = vld [vmem:[#allocation3 + $0xc0] sm:$0xff] }
 0x3ab   : > { %2887 = vrot.lane.b32.xlu0 %v2478_v41, %s5024_s17  ;;  %8675 = vst [vmem:[#allocation24_spill] sm:$0xff] %v7186_v6 }
 0x3ae   : > { %2893 = vrot.lane.b32.xlu1 %v2481_v63, %s5024_s17  ;;  %v7152_v63 = vld [vmem:[#allocation3 + $0x98] sm:$0xff] }
 0x3af   : > { %2891 = vrot.lane.b32.xlu0 %v2480_v16, %s5024_s17 }
 0x3b0   : > { %v7150_v41 = vpop.permute.xlu1 %2745 }
 0x3b1   : > { %8666 = vst [vmem:[#allocation74_spill] sm:$0xff] %v7150_v41  ;;  %v7154_v16 = vpop.permute.xlu0 %2743  ;;  %v3964_v41 = vld [vmem:[%s8271_s3 + $0x8] sm:$0xff] }
 0x3b2   : > { %2897 = vrot.lane.b32.xlu1 %v2483_v38, %s5024_s17  ;;  %8667 = vst [vmem:[#allocation13_spill] sm:$0xff] %v7154_v16  ;;  %v7156_v38 = vld [vmem:[#allocation3 + $0x90] sm:$0xff] }
 0x3b3   : > { %2895 = vrot.lane.b32.xlu0 %v2482_v60, %s5024_s17 }
 0x3b6   : > { %2901 = vrot.lane.b32.xlu1 %v2485_v56, %s5024_s17  ;;  %v7164_v56 = vld [vmem:[#allocation3 + $0xb0] sm:$0xff] }
 0x3b7   : > { %2899 = vrot.lane.b32.xlu0 %v2484_v30, %s5024_s17  ;;  %8669 = vst [vmem:[#allocation73_spill] sm:$0xff] %v7164_v56  ;;  %s5031_s17 = smov 56  }
 0x3b8   : > { %v7162_v60 = vpop.permute.xlu1 %2749 }
 0x3b9   : > { %8668 = vst [vmem:[#allocation18_spill] sm:$0xff] %v7162_v60  ;;  %v7166_v30 = vpop.permute.xlu0 %2747  ;;  %v4847_v60 = vpack.c.bf16 %v3964_v41, %v3963_v48  ;;  %v3966_v48 = vld [vmem:[%s8271_s3 + $0x18] sm:$0xff] }
 0x3ba   : > { %2969 = vrot.lane.b32.xlu1 %v7092_v39, %s5026_s19  ;;  %8670 = vst [vmem:[#allocation76_spill] sm:$0xff] %v7166_v30  ;;  %v7182_v30 = vld [vmem:[#allocation3 + $0xc8] sm:$0xff]  ;;  %v4851_v41 = vpack.c.bf16 %v3966_v48, %v3965_v49  ;;  %v3968_v49 = vld [vmem:[%s8271_s3 + $0x28] sm:$0xff] }
 0x3bb   : > { %2967 = vrot.lane.b32.xlu0 %v7096_v29, %s5026_s19  ;;  %8673 = vst [vmem:[#allocation75_spill] sm:$0xff] %v7182_v30  ;;  %4863 = vmatprep.subr.bf16.mxu1 %v4847_v60 }
 0x3bc   : > { %4848 = vmatprep.subr.bf16.mxu0 %v4847_v60  ;;  %4868 = vmatpush3.bf16.msra.mxu1 %v4847_v60 }
 0x3bd   : > { %4850 = vmatpush3.bf16.msra.mxu0 %v4847_v60  ;;  %4864 = vmatprep.subr.bf16.mxu1 %v4851_v41  ;;  %v4855_v60 = vpack.c.bf16 %v3968_v49, %v3967_v53  ;;  %v3970_v53 = vld [vmem:[%s8271_s3 + $0x38] sm:$0xff] }
 0x3be   : > { %2973 = vrot.lane.b32.xlu1 %v7104_v23, %s5026_s19  ;;  %4852 = vmatprep.subr.bf16.mxu0 %v4851_v41 }
 0x3bf   : > { %2971 = vrot.lane.b32.xlu0 %v7108_v25, %s5026_s19 }
 0x3c0   : > { %v7180_v16 = vpop.permute.xlu1 %2753  ;;  %4869 = vmatpush3.bf16.msra.mxu1 %v4851_v41 }
 0x3c1   : > { %8672 = vst [vmem:[#allocation21_spill] sm:$0xff] %v7180_v16  ;;  %v7184_v21 = vpop.permute.xlu0 %2751  ;;  %4854 = vmatpush3.bf16.msra.mxu0 %v4851_v41  ;;  %4865 = vmatprep.subr.bf16.mxu1 %v4855_v60 }
 0x3c2   : > { %2977 = vrot.lane.b32.xlu1 %v7116_v33, %s5026_s19  ;;  %8674 = vst [vmem:[#allocation19_spill] sm:$0xff] %v7184_v21  ;;  %4856 = vmatprep.subr.bf16.mxu0 %v4855_v60 }
 0x3c3   : > { %2975 = vrot.lane.b32.xlu0 %v7120_v61, %s5026_s19 }
 0x3c4   : > { %4870 = vmatpush3.bf16.msra.mxu1 %v4855_v60 }
 0x3c5   : > { %4858 = vmatpush3.bf16.msra.mxu0 %v4855_v60 }
 0x3c6   : > { %2981 = vrot.lane.b32.xlu1 %v7128_v20, %s5026_s19 }
 0x3c7   : > { %2979 = vrot.lane.b32.xlu0 %v7132_v19, %s5026_s19 }
 0x3c8   : > { %v7198_v16 = vpop.permute.xlu1 %2757 }
 0x3c9   : > { %8676 = vst [vmem:[#allocation77_spill] sm:$0xff] %v7198_v16  ;;  %v7200_v21 = vpop.permute.xlu0 %2755 }
 0x3ca   : > { %2985 = vrot.lane.b32.xlu1 %v7140_v27, %s5026_s19  ;;  %8677 = vst [vmem:[#allocation22_spill] sm:$0xff] %v7200_v21 }
 0x3cb   : > { %2983 = vrot.lane.b32.xlu0 %v7144_v42, %s5026_s19 }
 0x3ce   : > { %2989 = vrot.lane.b32.xlu1 %v7152_v63, %s5026_s19 }
 0x3cf   : > { %2987 = vrot.lane.b32.xlu0 %v7156_v38, %s5026_s19 }
 0x3d0   : > { %v7214_v48 = vpop.permute.xlu1 %2761 }
 0x3d1   : > { %8679 = vst [vmem:[#allocation55_spill] sm:$0xff] %v7214_v48  ;;  %v7216_v16 = vpop.permute.xlu0 %2759 }
 0x3d2   : > { %2993 = vrot.lane.b32.xlu1 %v7164_v56, %s5026_s19  ;;  %8680 = vst [vmem:[#allocation129_spill] sm:$0xff] %v7216_v16 }
 0x3d3   : > { %2991 = vrot.lane.b32.xlu0 %v7168_v11, %s5026_s19 }
 0x3d6   : > { %2997 = vrot.lane.b32.xlu1 %v7182_v30, %s5026_s19 }
 0x3d7   : > { %2995 = vrot.lane.b32.xlu0 %v7186_v6, %s5026_s19 }
 0x3d8   : > { %v7228_v49 = vpop.permute.xlu1 %2765 }
 0x3d9   : > { %8681 = vst [vmem:[#allocation131_spill] sm:$0xff] %v7228_v49  ;;  %v7230_v48 = vpop.permute.xlu0 %2763 }
 0x3da   : > { %3099 = vrot.lane.b32.xlu1 %v6876_v9, %s5028_s26  ;;  %v3969_v9 = vld [vmem:[%s8271_s3 + $0x30] sm:$0xff]  ;;  %8682 = vst [vmem:[#allocation26_spill] sm:$0xff] %v7230_v48 }
 0x3db   : > { %2999 = vrot.lane.b32.xlu0 %v7202_v62, %s5026_s19  ;;  %v4859_v41 = vpack.c.bf16 %v3970_v53, %v3969_v9 }
 0x3dd   : > { %4866 = vmatprep.subr.bf16.mxu1 %v4859_v41  ;;  %4860 = vmatprep.subr.bf16.mxu0 %v4859_v41 }
 0x3de   : > { %3227 = vrot.lane.b32.xlu1 %v6997_v34, %s5029_s12  ;;  %4871 = vmatpush3.bf16.msra.mxu1 %v4859_v41 }
 0x3df   : > { %3101 = vrot.lane.b32.xlu0 %v6871_v54, %s5028_s26  ;;  %v3971_v54 = vld [vmem:[%s8271_s3 + $0x40] sm:$0xff]  ;;  %4862 = vmatpush3.bf16.msra.mxu0 %v4859_v41 }
 0x3e0   : > { %v7239_v34 = vpop.permute.xlu1 %2769  ;;  %4867 = vmatprep.subr.mxu1 %v3971_v54  ;;  %4789 = vmatprep.subr.mxu0 %v3971_v54 }
 0x3e1   : > { %8683 = vst [vmem:[#allocation32_spill] sm:$0xff] %v7239_v34  ;;  %v7241_v60 = vpop.permute.xlu0 %2767 }
 0x3e2   : > { %3355 = vrot.lane.b32.xlu1 %v7120_v61, %s5030_s20  ;;  %8684 = vst [vmem:[#allocation78_spill] sm:$0xff] %v7241_v60  ;;  %4872 = vmatpush3.msra.mxu1 %v3971_v54 }
 0x3e3   : > { %3229 = vrot.lane.b32.xlu0 %v6993_v17, %s5029_s12  ;;  %4790 = vmatpush3.msra.mxu0 %v3971_v54 }
 0x3e6   : > { %3483 = vrot.lane.b32.xlu1 %v6888_v28, %s5031_s17 }
 0x3e7   : > { %3357 = vrot.lane.b32.xlu0 %v7116_v33, %s5030_s20 }
 0x3e8   : > { %v7247_v17 = vpop.permute.xlu1 %2773 }
 0x3e9   : > { %8685 = vst [vmem:[#allocation80_spill] sm:$0xff] %v7247_v17  ;;  %v7249_v9 = vpop.permute.xlu0 %2771 }
 0x3ea   : > { %8686 = vst [vmem:[#allocation98_spill] sm:$0xff] %v7249_v9  ;;  %3485 = vrot.lane.b32.xlu1 %v6883_v57, %s5031_s17 }
 0x3eb   : > { %3103 = vrot.lane.b32.xlu0 %v6888_v28, %s5028_s26 }
 0x3ec   : > { %v7255_v53 = vpop.permute.xlu1 %2841 }
 0x3ed   : > { %8687 = vst [vmem:[#allocation100_spill] sm:$0xff] %v7255_v53  ;;  %v7257_v41 = vpop.permute.xlu0 %2839 }
 0x3ee   : > { %8688 = vst [vmem:[#allocation10_spill] sm:$0xff] %v7257_v41  ;;  %3105 = vrot.lane.b32.xlu1 %v6883_v57, %s5028_s26 }
 0x3ef   : > { %3611 = vrot.lane.b32.xlu0 %v7005_v12, %s5032_s11 }
 0x3f0   : > { %v7263_v54 = vpop.permute.xlu1 %2845 }
 0x3f1   : > { %v7265_v17 = vpop.permute.xlu0 %2843 }
 0x3f2   : > { %3613 = vrot.lane.b32.xlu1 %v7001_v7, %s5032_s11 }
 0x3f3   : > { %3231 = vrot.lane.b32.xlu0 %v7005_v12, %s5029_s12 }
 0x3f4   : > { %v7271_v28 = vpop.permute.xlu1 %2849 }
 0x3f5   : > { %v7273_v53 = vpop.permute.xlu0 %2847 }
 0x3f6   : > { %3359 = vrot.lane.b32.xlu1 %v7132_v19, %s5030_s20 }
 0x3f7   : > { %3233 = vrot.lane.b32.xlu0 %v7001_v7, %s5029_s12 }
 0x3f8   : > { %v7279_v57 = vpop.permute.xlu1 %2853 }
 0x3f9   : > { %v7281_v41 = vpop.permute.xlu0 %2851 }
 0x3fa   : > { %3487 = vrot.lane.b32.xlu1 %v6900_v18, %s5031_s17 }
 0x3fb   : > { %3361 = vrot.lane.b32.xlu0 %v7128_v20, %s5030_s20 }
 0x3fc   : > { %v7287_v12 = vpop.permute.xlu1 %2857 }
 0x3fd   : > { %v7289_v9 = vpop.permute.xlu0 %2855 }
 0x3fe   : > { %3489 = vrot.lane.b32.xlu1 %v6895_v45, %s5031_s17 }
 0x3ff   : > { %3107 = vrot.lane.b32.xlu0 %v6900_v18, %s5028_s26 }
 0x400   : > { %v7295_v7 = vpop.permute.xlu1 %2861 }
 0x401   : > { %v7297_v34 = vpop.permute.xlu0 %2859 }
 0x402   : > { %3109 = vrot.lane.b32.xlu1 %v6895_v45, %s5028_s26 }
 0x403   : > { %3615 = vrot.lane.b32.xlu0 %v7013_v58, %s5032_s11 }
 0x404   : > { %v7303_v60 = vpop.permute.xlu1 %2865 }
 0x405   : > { %8689 = vst [vmem:[#allocation14_spill] sm:$0xff] %v7303_v60  ;;  %v7305_v49 = vpop.permute.xlu0 %2863  ;;  %v7467_v60 = vld [vmem:[#allocation3 + $0xe0] sm:$0xff] }
 0x406   : > { %3617 = vrot.lane.b32.xlu1 %v7009_v10, %s5032_s11 }
 0x407   : > { %3235 = vrot.lane.b32.xlu0 %v7013_v58, %s5029_s12 }
 0x408   : > { %v7311_v18 = vpop.permute.xlu1 %2869 }
 0x409   : > { %8690 = vst [vmem:[#allocation53_spill] sm:$0xff] %v7311_v18  ;;  %v7313_v48 = vpop.permute.xlu0 %2867 }
 0x40a   : > { %8691 = vst [vmem:[#allocation59_spill] sm:$0xff] %v7313_v48  ;;  %3363 = vrot.lane.b32.xlu1 %v7144_v42, %s5030_s20 }
 0x40b   : > { %3237 = vrot.lane.b32.xlu0 %v7009_v10, %s5029_s12 }
 0x40c   : > { %v7319_v45 = vpop.permute.xlu1 %2873 }
 0x40d   : > { %8692 = vst [vmem:[#allocation130_spill] sm:$0xff] %v7319_v45  ;;  %v7321_v16 = vpop.permute.xlu0 %2871 }
 0x40e   : > { %8693 = vst [vmem:[#allocation133_spill] sm:$0xff] %v7321_v16  ;;  %3491 = vrot.lane.b32.xlu1 %v6912_v59, %s5031_s17 }
 0x40f   : > { %3365 = vrot.lane.b32.xlu0 %v7140_v27, %s5030_s20 }
 0x410   : > { %v7327_v58 = vpop.permute.xlu1 %2877 }
 0x411   : > { %8694 = vst [vmem:[#allocation30_spill] sm:$0xff] %v7327_v58  ;;  %v7329_v21 = vpop.permute.xlu0 %2875 }
 0x412   : > { %8695 = vst [vmem:[#allocation36_spill] sm:$0xff] %v7329_v21  ;;  %3493 = vrot.lane.b32.xlu1 %v6907_v4, %s5031_s17  ;;  %v2627_v21 = vld [vmem:[#allocation3 + $0xc1] sm:$0xff] }
 0x413   : > { %3111 = vrot.lane.b32.xlu0 %v6912_v59, %s5028_s26 }
 0x414   : > { %v7335_v10 = vpop.permute.xlu1 %2881 }
 0x415   : > { %8696 = vst [vmem:[#allocation79_spill] sm:$0xff] %v7335_v10  ;;  %v7337_v45 = vpop.permute.xlu0 %2879 }
 0x416   : > { %8697 = vst [vmem:[#allocation82_spill] sm:$0xff] %v7337_v45  ;;  %3113 = vrot.lane.b32.xlu1 %v6907_v4, %s5028_s26 }
 0x417   : > { %3619 = vrot.lane.b32.xlu0 %v7021_v31, %s5032_s11 }
 0x418   : > { %v7343_v16 = vpop.permute.xlu1 %2885 }
 0x419   : > { %8698 = vst [vmem:[#allocation99_spill] sm:$0xff] %v7343_v16  ;;  %v7345_v58 = vpop.permute.xlu0 %2883 }
 0x41a   : > { %8699 = vst [vmem:[#allocation102_spill] sm:$0xff] %v7345_v58  ;;  %3621 = vrot.lane.b32.xlu1 %v7017_v43, %s5032_s11 }
 0x41b   : > { %3239 = vrot.lane.b32.xlu0 %v7021_v31, %s5029_s12 }
 0x41c   : > { %v7351_v59 = vpop.permute.xlu1 %2889 }
 0x41d   : > { %8700 = vst [vmem:[#allocation12_spill] sm:$0xff] %v7351_v59  ;;  %v7353_v10 = vpop.permute.xlu0 %2887 }
 0x41e   : > { %8701 = vst [vmem:[#allocation20_spill] sm:$0xff] %v7353_v10  ;;  %3367 = vrot.lane.b32.xlu1 %v7156_v38, %s5030_s20 }
 0x41f   : > { %3241 = vrot.lane.b32.xlu0 %v7017_v43, %s5029_s12 }
 0x420   : > { %v7359_v4 = vpop.permute.xlu1 %2893 }
 0x421   : > { %8702 = vst [vmem:[#allocation57_spill] sm:$0xff] %v7359_v4  ;;  %v7361_v16 = vpop.permute.xlu0 %2891 }
 0x422   : > { %8703 = vst [vmem:[#allocation63_spill] sm:$0xff] %v7361_v16  ;;  %3495 = vrot.lane.b32.xlu1 %v6924_v14, %s5031_s17 }
 0x423   : > { %3369 = vrot.lane.b32.xlu0 %v7152_v63, %s5030_s20 }
 0x424   : > { %v7367_v31 = vpop.permute.xlu1 %2897 }
 0x425   : > { %8704 = vst [vmem:[#allocation132_spill] sm:$0xff] %v7367_v31  ;;  %v7369_v59 = vpop.permute.xlu0 %2895 }
 0x426   : > { %8705 = vst [vmem:[#allocation135_spill] sm:$0xff] %v7369_v59  ;;  %3497 = vrot.lane.b32.xlu1 %v6919_v3, %s5031_s17  ;;  %v2531_v59 = vld [vmem:[#allocation3 + $0xb1] sm:$0xff] }
 0x427   : > { %3115 = vrot.lane.b32.xlu0 %v6924_v14, %s5028_s26 }
 0x428   : > { %v7375_v43 = vpop.permute.xlu1 %2901 }
 0x429   : > { %8706 = vst [vmem:[#allocation34_spill] sm:$0xff] %v7375_v43  ;;  %v7377_v4 = vpop.permute.xlu0 %2899 }
 0x42a   : > { %8707 = vst [vmem:[#allocation40_spill] sm:$0xff] %v7377_v4  ;;  %3117 = vrot.lane.b32.xlu1 %v6919_v3, %s5028_s26 }
 0x42b   : > { %3623 = vrot.lane.b32.xlu0 %v7029_v8, %s5032_s11 }
 0x42c   : > { %v7383_v16 = vpop.permute.xlu1 %2969 }
 0x42d   : > { %8708 = vst [vmem:[#allocation81_spill] sm:$0xff] %v7383_v16  ;;  %v7385_v31 = vpop.permute.xlu0 %2967 }
 0x42e   : > { %8709 = vst [vmem:[#allocation84_spill] sm:$0xff] %v7385_v31  ;;  %3625 = vrot.lane.b32.xlu1 %v7025_v22, %s5032_s11 }
 0x42f   : > { %3243 = vrot.lane.b32.xlu0 %v7029_v8, %s5029_s12 }
 0x430   : > { %v7391_v14 = vpop.permute.xlu1 %2973 }
 0x431   : > { %v2972_v43 = vpop.permute.xlu0 %2971 }
 0x432   : > { %3371 = vrot.lane.b32.xlu1 %v7168_v11, %s5030_s20 }
 0x433   : > { %3245 = vrot.lane.b32.xlu0 %v7025_v22, %s5029_s12 }
 0x434   : > { %v7397_v3 = vpop.permute.xlu1 %2977 }
 0x435   : > { %v7399_v16 = vpop.permute.xlu0 %2975 }
 0x436   : > { %3499 = vrot.lane.b32.xlu1 %v6936_v0, %s5031_s17 }
 0x437   : > { %3373 = vrot.lane.b32.xlu0 %v7164_v56, %s5030_s20  ;;  %v2628_v56 = vld [vmem:[#allocation3 + $0xc9] sm:$0xff] }
 0x438   : > { %v7405_v8 = vpop.permute.xlu1 %2981 }
 0x439   : > { %v7407_v31 = vpop.permute.xlu0 %2979 }
 0x43a   : > { %3501 = vrot.lane.b32.xlu1 %v6931_v32, %s5031_s17 }
 0x43b   : > { %3119 = vrot.lane.b32.xlu0 %v6936_v0, %s5028_s26 }
 0x43c   : > { %v7413_v22 = vpop.permute.xlu1 %2985 }
 0x43d   : > { %v7415_v4 = vpop.permute.xlu0 %2983 }
 0x43e   : > { %3121 = vrot.lane.b32.xlu1 %v2531_v59, %s5028_s26 }
 0x43f   : > { %3627 = vrot.lane.b32.xlu0 %v7037_v26, %s5032_s11 }
 0x440   : > { %v7420_v10 = vpop.permute.xlu1 %2989 }
 0x441   : > { %v7422_v58 = vpop.permute.xlu0 %2987 }
 0x442   : > { %3629 = vrot.lane.b32.xlu1 %v7033_v37, %s5032_s11 }
 0x443   : > { %3247 = vrot.lane.b32.xlu0 %v7037_v26, %s5029_s12 }
 0x444   : > { %v7428_v32 = vpop.permute.xlu1 %2993 }
 0x445   : > { %8710 = vst [vmem:[#allocation101_spill] sm:$0xff] %v7428_v32  ;;  %v7430_v0 = vpop.permute.xlu0 %2991  ;;  %v2629_v32 = vld [vmem:[#allocation3 + $0xd9] sm:$0xff] }
 0x446   : > { %3375 = vrot.lane.b32.xlu1 %v7186_v6, %s5030_s20 }
 0x447   : > { %3249 = vrot.lane.b32.xlu0 %v7033_v37, %s5029_s12 }
 0x448   : > { %v7436_v59 = vpop.permute.xlu1 %2997 }
 0x449   : > { %8711 = vst [vmem:[#allocation104_spill] sm:$0xff] %v7436_v59  ;;  %v7438_v45 = vpop.permute.xlu0 %2995 }
 0x44a   : > { %8712 = vst [vmem:[#allocation17_spill] sm:$0xff] %v7438_v45  ;;  %3503 = vrot.lane.b32.xlu1 %v2627_v21, %s5031_s17 }
 0x44b   : > { %3377 = vrot.lane.b32.xlu0 %v7182_v30, %s5030_s20 }
 0x44c   : > { %v3100_v26 = vpop.permute.xlu1 %3099 }
 0x44d   : > { %v7443_v18 = vpop.permute.xlu0 %2999 }
 0x44e   : > { %8713 = vst [vmem:[#allocation25_spill] sm:$0xff] %v7443_v18  ;;  %3505 = vrot.lane.b32.xlu1 %v2628_v56, %s5031_s17 }
 0x44f   : > { %3123 = vrot.lane.b32.xlu0 %v2627_v21, %s5028_s26  ;;  %v3705_v21 = vsel %vm1715_vm3, %v7096_v29, %v7080_v46 }
 0x450   : > { %v3228_v6 = vpop.permute.xlu1 %3227 }
 0x451   : > { %v3102_v37 = vpop.permute.xlu0 %3101 }
 0x452   : > { %3125 = vrot.lane.b32.xlu1 %v2628_v56, %s5028_s26  ;;  %v3737_v56 = vsel %vm1781_vm6, %v3705_v21, %v7265_v17 }
 0x453   : > { %3631 = vrot.lane.b32.xlu0 %v7045_v51, %s5032_s11  ;;  %v3769_v11 = vsel %vm1847_vm8, %v3737_v56, %v2972_v43  ;;  %v3707_v56 = vsel %vm1715_vm3, %v7108_v25, %v7086_v1 }
 0x454   : > { %v3356_v59 = vpop.permute.xlu1 %3355  ;;  %v3801_v46 = vsel %vm1913_vm10, %v3769_v11, %v3100_v26 }
 0x455   : > { %v3230_v45 = vpop.permute.xlu0 %3229  ;;  %v3834_v29 = vsel %vm3831_vm14, %v3801_v46, %v3228_v6  ;;  %v3739_v46 = vsel %vm1781_vm6, %v3707_v56, %v7273_v53 }
 0x456   : > { %3633 = vrot.lane.b32.xlu1 %v7041_v15, %s5032_s11 }
 0x457   : > { %3251 = vrot.lane.b32.xlu0 %v7045_v51, %s5029_s12 }
 0x458   : > { %v3484_v30 = vpop.permute.xlu1 %3483 }
 0x459   : > { %v3358_v18 = vpop.permute.xlu0 %3357 }
 0x45a   : > { %3379 = vrot.lane.b32.xlu1 %v7202_v62, %s5030_s20  ;;  %v3706_v62 = vsel %vm1715_vm3, %v7092_v39, %v7078_v24  ;;  %v3867_v24 = vsel %vm3864_vm15, %v3834_v29, %v3356_v59  ;;  %v7506_v29 = vld [vmem:[#allocation3 + $0xf0] sm:$0xff] }
 0x45b   : > { %3253 = vrot.lane.b32.xlu0 %v7041_v15, %s5029_s12  ;;  %v3738_v15 = vsel %vm1781_vm6, %v3706_v62, %v7263_v54  ;;  %v3900_v43 = vsel %vm3897_vm0, %v3867_v24, %v3484_v30  ;;  %v3708_v24 = vsel %vm1715_vm3, %v7104_v23, %v7084_v44 }
 0x45c   : > { %v3486_v48 = vpop.permute.xlu1 %3485  ;;  %v3770_v17 = vsel %vm1847_vm8, %v3738_v15, %v7391_v14 }
 0x45d   : > { %v3104_v51 = vpop.permute.xlu0 %3103  ;;  %v3802_v11 = vsel %vm1913_vm10, %v3770_v17, %v3102_v37 }
 0x45e   : > { %3507 = vrot.lane.b32.xlu1 %v2629_v32, %s5031_s17  ;;  %v3835_v62 = vsel %vm3831_vm14, %v3802_v11, %v3230_v45  ;;  %v2630_v45 = vld [vmem:[#allocation3 + $0xe1] sm:$0xff] }
 0x45f   : > { %3381 = vrot.lane.b32.xlu0 %v7467_v60, %s5030_s20  ;;  %v3868_v54 = vsel %vm3864_vm15, %v3835_v62, %v3358_v18 }
 0x460   : > { %v3106_v39 = vpop.permute.xlu1 %3105  ;;  %v3901_v14 = vsel %vm3897_vm0, %v3868_v54, %v3486_v48 }
 0x461   : > { %v3612_v26 = vpop.permute.xlu0 %3611 }
 0x462   : > { %3127 = vrot.lane.b32.xlu1 %v2629_v32, %s5028_s26  ;;  %v3933_v6 = vsel %vm3930_vm1, %v3900_v43, %v3612_v26  ;;  %v2631_v43 = vld [vmem:[#allocation3 + $0xf1] sm:$0xff] }
 0x463   : > { %3001 = vrot.lane.b32.xlu0 %v7467_v60, %s5026_s19  ;;  %4794 = vmatprep.mubr.msk.f32.mxu1 %vm3979_vm2, %v3933_v6  ;;  %v7526_v26 = vld [vmem:[#allocation3 + $0xf8] sm:$0xff] }
 0x464   : > { %v3614_v59 = vpop.permute.xlu1 %3613 }
 0x465   : > { %v3934_v37 = vsel %vm3930_vm1, %v3901_v14, %v3614_v59  ;;  %v3232_v30 = vpop.permute.xlu0 %3231 }
 0x466   : > { %3635 = vrot.lane.b32.xlu1 %v7053_v40, %s5032_s11  ;;  %4795 = vmatmul.mubr.msk.f32.vlgmr.msra.gmra.mrb[0].mxu1 %vm3979_vm2, %v3934_v37 }
 0x467   : > { %3509 = vrot.lane.b32.xlu0 %v2630_v45, %s5031_s17 }
 0x468   : > { %v3360_v18 = vpop.permute.xlu1 %3359 }
 0x469   : > { %v3234_v32 = vpop.permute.xlu0 %3233 }
 0x46a   : > { %3255 = vrot.lane.b32.xlu1 %v7053_v40, %s5029_s12  ;;  %v3771_v40 = vsel %vm1847_vm8, %v3739_v46, %v7399_v16 }
 0x46b   : > { %3129 = vrot.lane.b32.xlu0 %v2630_v45, %s5028_s26  ;;  %v3803_v11 = vsel %vm1913_vm10, %v3771_v40, %v3104_v51 }
 0x46c   : > { %v3488_v48 = vpop.permute.xlu1 %3487  ;;  %v3836_v1 = vsel %vm3831_vm14, %v3803_v11, %v3232_v30  ;;  %v2632_v30 = vld [vmem:[#allocation3 + $0xf9] sm:$0xff] }
 0x46d   : > { %v3362_v21 = vpop.permute.xlu0 %3361  ;;  %v3869_v16 = vsel %vm3864_vm15, %v3836_v1, %v3360_v18 }
 0x46e   : > { %3257 = vrot.lane.b32.xlu1 %v7049_v36, %s5029_s12  ;;  %v3902_v23 = vsel %vm3897_vm0, %v3869_v16, %v3488_v48  ;;  %v2633_v16 = vld [vmem:[#allocation3 + $0x109] sm:$0xff] }
 0x46f   : > { %3637 = vrot.lane.b32.xlu0 %v7049_v36, %s5032_s11  ;;  %v3740_v36 = vsel %vm1781_vm6, %v3708_v24, %v7271_v28 }
 0x470   : > { %v3490_v15 = vpop.permute.xlu1 %3489  ;;  %v3772_v25 = vsel %vm1847_vm8, %v3740_v36, %v7397_v3 }
 0x471   : > { %v3108_v17 = vpop.permute.xlu0 %3107  ;;  %v3804_v44 = vsel %vm1913_vm10, %v3772_v25, %v3106_v39 }
 0x472   : > { %3003 = vrot.lane.b32.xlu1 %v7506_v29, %s5026_s19  ;;  %v3837_v28 = vsel %vm3831_vm14, %v3804_v44, %v3234_v32  ;;  %v3709_v32 = vsel %vm1715_vm3, %v7120_v61, %v7094_v52 }
 0x473   : > { %3383 = vrot.lane.b32.xlu0 %v7506_v29, %s5030_s20  ;;  %v3870_v6 = vsel %vm3864_vm15, %v3837_v28, %v3362_v21  ;;  %v3741_v48 = vsel %vm1781_vm6, %v3709_v32, %v7281_v41  ;;  %v2634_v28 = vld [vmem:[#allocation3 + $0x111] sm:$0xff] }
 0x474   : > { %v3110_v53 = vpop.permute.xlu1 %3109  ;;  %v3903_v3 = vsel %vm3897_vm0, %v3870_v6, %v3490_v15  ;;  %v3773_v56 = vsel %vm1847_vm8, %v3741_v48, %v7407_v31  ;;  %v3710_v15 = vsel %vm1715_vm3, %v7116_v33, %v7090_v47  ;;  %v7568_v47 = vld [vmem:[#allocation3 + $0x108] sm:$0xff]  ;;  %v7623_v48 = vld [vmem:[#allocation3 + $0x120] sm:$0xff] }
 0x475   : > { %v3616_v51 = vpop.permute.xlu0 %3615  ;;  %v3742_v52 = vsel %vm1781_vm6, %v3710_v15, %v7279_v57 }
 0x476   : > { %v3935_v62 = vsel %vm3930_vm1, %v3902_v23, %v3616_v51  ;;  %3511 = vrot.lane.b32.xlu1 %v2631_v43, %s5031_s17  ;;  %v3774_v41 = vsel %vm1847_vm8, %v3742_v52, %v7405_v8  ;;  %v7631_v52 = vld [vmem:[#allocation3 + $0x128] sm:$0xff] }
 0x477   : > { %3385 = vrot.lane.b32.xlu0 %v7526_v26, %s5030_s20  ;;  %4797 = vmatprep.mubr.msk.f32.mxu1 %vm3979_vm2, %v3935_v62  ;;  %v3806_v33 = vsel %vm1913_vm10, %v3774_v41, %v3110_v53  ;;  %v7582_v53 = vld [vmem:[#allocation3 + $0x110] sm:$0xff]  ;;  %v3711_v62 = vsel %vm1715_vm3, %v7132_v19, %v7106_v50 }
 0x478   : > { %v3618_v39 = vpop.permute.xlu1 %3617  ;;  %v3743_v6 = vsel %vm1781_vm6, %v3711_v62, %v7289_v9  ;;  %v2573_v62 = vld [vmem:[#allocation3 + $0x12a] sm:$0xff] }
 0x479   : > { %v3936_v54 = vsel %vm3930_vm1, %v3903_v3, %v3618_v39  ;;  %v3236_v14 = vpop.permute.xlu0 %3235  ;;  %v3775_v39 = vsel %vm1847_vm8, %v3743_v6, %v7415_v4 }
 0x47a   : > { %3131 = vrot.lane.b32.xlu1 %v2631_v43, %s5028_s26  ;;  %4798 = vmatmul.mubr.msk.f32.gmra.mrb[2].mxu1 %vm3979_vm2, %v3936_v54 }
 0x47b   : > { %3005 = vrot.lane.b32.xlu0 %v7526_v26, %s5026_s19 }
 0x47c   : > { %v3364_v59 = vpop.permute.xlu1 %3363 }
 0x47d   : > { %v3238_v37 = vpop.permute.xlu0 %3237 }
 0x47e   : > { %3639 = vrot.lane.b32.xlu1 %v7061_v35, %s5032_s11  ;;  %v3839_v57 = vsel %vm3831_vm14, %v3806_v33, %v3238_v37 }
 0x47f   : > { %3513 = vrot.lane.b32.xlu0 %v2632_v30, %s5031_s17 }
 0x480   : > { %v3492_v45 = vpop.permute.xlu1 %3491 }
 0x481   : > { %v3366_v18 = vpop.permute.xlu0 %3365 }
 0x482   : > { %3259 = vrot.lane.b32.xlu1 %v7061_v35, %s5029_s12  ;;  %v3805_v35 = vsel %vm1913_vm10, %v3773_v56, %v3108_v17 }
 0x483   : > { %3133 = vrot.lane.b32.xlu0 %v2632_v30, %s5028_s26  ;;  %v3838_v61 = vsel %vm3831_vm14, %v3805_v35, %v3236_v14  ;;  %v3712_v14 = vsel %vm1715_vm3, %v7128_v20, %v7102_v55  ;;  %v2635_v35 = vld [vmem:[#allocation3 + $0x121] sm:$0xff] }
 0x484   : > { %v3494_v21 = vpop.permute.xlu1 %3493  ;;  %v3871_v31 = vsel %vm3864_vm15, %v3838_v61, %v3364_v59  ;;  %v3744_v50 = vsel %vm1781_vm6, %v3712_v14, %v7287_v12 }
 0x485   : > { %v3112_v46 = vpop.permute.xlu0 %3111  ;;  %v3904_v17 = vsel %vm3897_vm0, %v3871_v31, %v3492_v45  ;;  %v3776_v9 = vsel %vm1847_vm8, %v3744_v50, %v7413_v22  ;;  %v2571_v45 = vld [vmem:[#allocation3 + $0x112] sm:$0xff]  ;;  %v3713_v31 = vsel %vm1715_vm3, %v7144_v42, %v7118_v2  ;;  %v2636_v2 = vld [vmem:[#allocation3 + $0x129] sm:$0xff]  ;;  %v7677_v50 = vld [vmem:[#allocation3 + $0x140] sm:$0xff] }
 0x486   : > { %3261 = vrot.lane.b32.xlu1 %v7057_v5, %s5029_s12  ;;  %v3807_v59 = vsel %vm1913_vm10, %v3775_v39, %v3112_v46 }
 0x487   : > { %3641 = vrot.lane.b32.xlu0 %v7057_v5, %s5032_s11  ;;  %v3872_v5 = vsel %vm3864_vm15, %v3839_v57, %v3366_v18  ;;  %v2667_v57 = vld [vmem:[#allocation3 + $0x122] sm:$0xff] }
 0x488   : > { %v3114_v40 = vpop.permute.xlu1 %3113  ;;  %v3905_v8 = vsel %vm3897_vm0, %v3872_v5, %v3494_v21 }
 0x489   : > { %v3620_v24 = vpop.permute.xlu0 %3619  ;;  %v3808_v55 = vsel %vm1913_vm10, %v3776_v9, %v3114_v40  ;;  %v3745_v40 = vsel %vm1781_vm6, %v3713_v31, %v7297_v34 }
 0x48a   : > { %v3937_v11 = vsel %vm3930_vm1, %v3904_v17, %v3620_v24  ;;  %3007 = vrot.lane.b32.xlu1 %v7568_v47, %s5026_s19  ;;  %v3777_v17 = vsel %vm1847_vm8, %v3745_v40, %v7422_v58 }
 0x48b   : > { %3387 = vrot.lane.b32.xlu0 %v7568_v47, %s5030_s20  ;;  %4800 = vmatprep.mubr.msk.f32.mxu1 %vm3979_vm2, %v3937_v11  ;;  %v8714_v11 = vld [vmem:[#allocation66_spill] sm:$0xff] }
 0x48c   : > { %v3622_v36 = vpop.permute.xlu1 %3621  ;;  %v3714_v5 = vsel %vm1715_vm3, %v7140_v27, %v8714_v11  ;;  %v2575_v11 = vld [vmem:[#allocation3 + $0x142] sm:$0xff] }
 0x48d   : > { %v3938_v1 = vsel %vm3930_vm1, %v3905_v8, %v3622_v36  ;;  %v3240_v25 = vpop.permute.xlu0 %3239  ;;  %v3746_v42 = vsel %vm1781_vm6, %v3714_v5, %v7295_v7 }
 0x48e   : > { %3515 = vrot.lane.b32.xlu1 %v2633_v16, %s5031_s17  ;;  %4801 = vmatmul.mubr.msk.f32.gmra.mrb[4].mxu1 %vm3979_vm2, %v3938_v1  ;;  %v3840_v19 = vsel %vm3831_vm14, %v3807_v59, %v3240_v25  ;;  %v3778_v58 = vsel %vm1847_vm8, %v3746_v42, %v7420_v10  ;;  %v2637_v59 = vld [vmem:[#allocation3 + $0x139] sm:$0xff] }
 0x48f   : > { %3389 = vrot.lane.b32.xlu0 %v7582_v53, %s5030_s20  ;;  %v8719_v42 = vld [vmem:[#allocation70_spill] sm:$0xff] }
 0x490   : > { %v3368_v44 = vpop.permute.xlu1 %3367 }
 0x491   : > { %v3242_v23 = vpop.permute.xlu0 %3241  ;;  %v3873_v4 = vsel %vm3864_vm15, %v3840_v19, %v3368_v44  ;;  %v8715_v19 = vld [vmem:[#allocation11_spill] sm:$0xff] }
 0x492   : > { %3135 = vrot.lane.b32.xlu1 %v2633_v16, %s5028_s26  ;;  %v3715_v9 = vsel %vm1715_vm3, %v7156_v38, %v8715_v19  ;;  %v8717_v38 = vld [vmem:[#allocation14_spill] sm:$0xff]  ;;  %v8725_v19 = vld [vmem:[#allocation53_spill] sm:$0xff] }
 0x493   : > { %3009 = vrot.lane.b32.xlu0 %v7582_v53, %s5026_s19 }
 0x494   : > { %v3496_v51 = vpop.permute.xlu1 %3495 }
 0x495   : > { %v3370_v43 = vpop.permute.xlu0 %3369  ;;  %v3906_v20 = vsel %vm3897_vm0, %v3873_v4, %v3496_v51  ;;  %v3747_v4 = vsel %vm1781_vm6, %v3715_v9, %v7305_v49  ;;  %v8718_v49 = vld [vmem:[#allocation101_spill] sm:$0xff] }
 0x496   : > { %3643 = vrot.lane.b32.xlu1 %v7066_v13, %s5032_s11 }
 0x497   : > { %3517 = vrot.lane.b32.xlu0 %v2634_v28, %s5031_s17 }
 0x498   : > { %v3498_v3 = vpop.permute.xlu1 %3497 }
 0x499   : > { %v3116_v54 = vpop.permute.xlu0 %3115 }
 0x49a   : > { %3263 = vrot.lane.b32.xlu1 %v7066_v13, %s5029_s12  ;;  %v3841_v13 = vsel %vm3831_vm14, %v3808_v55, %v3242_v23  ;;  %v3809_v8 = vsel %vm1913_vm10, %v3777_v17, %v3116_v54  ;;  %v3779_v55 = vsel %vm1847_vm8, %v3747_v4, %v7430_v0 }
 0x49b   : > { %3137 = vrot.lane.b32.xlu0 %v2634_v28, %s5028_s26  ;;  %v3874_v18 = vsel %vm3864_vm15, %v3841_v13, %v3370_v43 }
 0x49c   : > { %v3118_v37 = vpop.permute.xlu1 %3117  ;;  %v3907_v22 = vsel %vm3897_vm0, %v3874_v18, %v3498_v3  ;;  %v7671_v3 = vld [vmem:[#allocation3 + $0x138] sm:$0xff] }
 0x49d   : > { %v3624_v30 = vpop.permute.xlu0 %3623  ;;  %v3810_v27 = vsel %vm1913_vm10, %v3778_v58, %v3118_v37 }
 0x49e   : > { %v3939_v12 = vsel %vm3930_vm1, %v3906_v20, %v3624_v30  ;;  %3265 = vrot.lane.b32.xlu1 %v2571_v45, %s5029_s12  ;;  %v8716_v30 = vld [vmem:[#allocation71_spill] sm:$0xff] }
 0x49f   : > { %3645 = vrot.lane.b32.xlu0 %v2571_v45, %s5032_s11  ;;  %4803 = vmatprep.mubr.msk.f32.mxu1 %vm3979_vm2, %v3939_v12  ;;  %v3716_v45 = vsel %vm1715_vm3, %v7152_v63, %v8716_v30  ;;  %v2671_v30 = vld [vmem:[#allocation3 + $0x152] sm:$0xff] }
 0x4a0   : > { %v3626_v32 = vpop.permute.xlu1 %3625  ;;  %v3748_v12 = vsel %vm1781_vm6, %v3716_v45, %v8717_v38 }
 0x4a1   : > { %v3940_v21 = vsel %vm3930_vm1, %v3907_v22, %v3626_v32  ;;  %v3244_v56 = vpop.permute.xlu0 %3243  ;;  %v3780_v0 = vsel %vm1847_vm8, %v3748_v12, %v8718_v49 }
 0x4a2   : > { %3011 = vrot.lane.b32.xlu1 %v7623_v48, %s5026_s19  ;;  %4804 = vmatmul.mubr.msk.f32.gmra.mrb[6].mxu1 %vm3979_vm2, %v3940_v21  ;;  %v3842_v34 = vsel %vm3831_vm14, %v3809_v8, %v3244_v56 }
 0x4a3   : > { %3391 = vrot.lane.b32.xlu0 %v7623_v48, %s5030_s20 }
 0x4a4   : > { %v3372_v46 = vpop.permute.xlu1 %3371 }
 0x4a5   : > { %v3246_v15 = vpop.permute.xlu0 %3245  ;;  %v3875_v36 = vsel %vm3864_vm15, %v3842_v34, %v3372_v46  ;;  %v2669_v46 = vld [vmem:[#allocation3 + $0x13a] sm:$0xff]  ;;  %v8720_v34 = vld [vmem:[#allocation16_spill] sm:$0xff] }
 0x4a6   : > { %3519 = vrot.lane.b32.xlu1 %v2635_v35, %s5031_s17  ;;  %v3843_v44 = vsel %vm3831_vm14, %v3810_v27, %v3246_v15  ;;  %v3717_v58 = vsel %vm1715_vm3, %v8720_v34, %v8719_v42  ;;  %v8722_v27 = vld [vmem:[#allocation17_spill] sm:$0xff] }
 0x4a7   : > { %3393 = vrot.lane.b32.xlu0 %v7631_v52, %s5030_s20 }
 0x4a8   : > { %v3500_v61 = vpop.permute.xlu1 %3499 }
 0x4a9   : > { %v3374_v41 = vpop.permute.xlu0 %3373  ;;  %v3908_v25 = vsel %vm3897_vm0, %v3875_v36, %v3500_v61  ;;  %v2638_v61 = vld [vmem:[#allocation3 + $0x141] sm:$0xff] }
 0x4aa   : > { %3139 = vrot.lane.b32.xlu1 %v2635_v35, %s5028_s26  ;;  %v3876_v7 = vsel %vm3864_vm15, %v3843_v44, %v3374_v41  ;;  %v8721_v36 = vld [vmem:[#allocation59_spill] sm:$0xff] }
 0x4ab   : > { %3013 = vrot.lane.b32.xlu0 %v7631_v52, %s5026_s19 }
 0x4ac   : > { %v3502_v33 = vpop.permute.xlu1 %3501 }
 0x4ad   : > { %v3120_v24 = vpop.permute.xlu0 %3119  ;;  %v3909_v10 = vsel %vm3897_vm0, %v3876_v7, %v3502_v33  ;;  %v2639_v7 = vld [vmem:[#allocation3 + $0x151] sm:$0xff] }
 0x4ae   : > { %3647 = vrot.lane.b32.xlu1 %v2667_v57, %s5032_s11  ;;  %v3811_v13 = vsel %vm1913_vm10, %v3779_v55, %v3120_v24 }
 0x4af   : > { %3521 = vrot.lane.b32.xlu0 %v2636_v2, %s5031_s17 }
 0x4b0   : > { %v3122_v1 = vpop.permute.xlu1 %3121 }
 0x4b1   : > { %v3628_v16 = vpop.permute.xlu0 %3627  ;;  %v3812_v63 = vsel %vm1913_vm10, %v3780_v0, %v3122_v1  ;;  %v3749_v1 = vsel %vm1781_vm6, %v3717_v58, %v8721_v36 }
 0x4b2   : > { %v3941_v23 = vsel %vm3930_vm1, %v3908_v25, %v3628_v16  ;;  %3267 = vrot.lane.b32.xlu1 %v2667_v57, %s5029_s12  ;;  %v3781_v25 = vsel %vm1847_vm8, %v3749_v1, %v8722_v27  ;;  %v8731_v27 = vld [vmem:[#allocation74_spill] sm:$0xff] }
 0x4b3   : > { %3141 = vrot.lane.b32.xlu0 %v2636_v2, %s5028_s26  ;;  %4806 = vmatprep.mubr.msk.f32.mxu1 %vm3979_vm2, %v3941_v23  ;;  %v2512_v2 = vld [vmem:[#allocation3 + $0x150] sm:$0xff] }
 0x4b4   : > { %v3630_v51 = vpop.permute.xlu1 %3629 }
 0x4b5   : > { %v3942_v43 = vsel %vm3930_vm1, %v3909_v10, %v3630_v51  ;;  %v3248_v28 = vpop.permute.xlu0 %3247  ;;  %v2608_v51 = vld [vmem:[#allocation3 + $0x158] sm:$0xff] }
 0x4b6   : > { %3269 = vrot.lane.b32.xlu1 %v2573_v62, %s5029_s12  ;;  %4807 = vmatmul.mubr.msk.f32.gmra.mrb[8].mxu1 %vm3979_vm2, %v3942_v43  ;;  %v3844_v18 = vsel %vm3831_vm14, %v3811_v13, %v3248_v28  ;;  %v2640_v13 = vld [vmem:[#allocation3 + $0x159] sm:$0xff] }
 0x4b7   : > { %3649 = vrot.lane.b32.xlu0 %v2573_v62, %s5032_s11 }
 0x4b8   : > { %v3376_v6 = vpop.permute.xlu1 %3375 }
 0x4b9   : > { %v3250_v39 = vpop.permute.xlu0 %3249  ;;  %v3877_v22 = vsel %vm3864_vm15, %v3844_v18, %v3376_v6 }
 0x4ba   : > { %3015 = vrot.lane.b32.xlu1 %v7671_v3, %s5026_s19  ;;  %v3845_v15 = vsel %vm3831_vm14, %v3812_v63, %v3250_v39 }
 0x4bb   : > { %3395 = vrot.lane.b32.xlu0 %v7671_v3, %s5030_s20 }
 0x4bc   : > { %v3504_v54 = vpop.permute.xlu1 %3503 }
 0x4bd   : > { %v3378_v14 = vpop.permute.xlu0 %3377  ;;  %v3910_v21 = vsel %vm3897_vm0, %v3877_v22, %v3504_v54  ;;  %v8723_v54 = vld [vmem:[#allocation15_spill] sm:$0xff] }
 0x4be   : > { %3523 = vrot.lane.b32.xlu1 %v2637_v59, %s5031_s17  ;;  %v3878_v41 = vsel %vm3864_vm15, %v3845_v15, %v3378_v14  ;;  %v8724_v14 = vld [vmem:[#allocation73_spill] sm:$0xff]  ;;  %v2514_v15 = vld [vmem:[#allocation3 + $0x168] sm:$0xff] }
 0x4bf   : > { %3397 = vrot.lane.b32.xlu0 %v7677_v50, %s5030_s20 }
 0x4c0   : > { %v3506_v37 = vpop.permute.xlu1 %3505 }
 0x4c1   : > { %v3124_v20 = vpop.permute.xlu0 %3123  ;;  %v3911_v31 = vsel %vm3897_vm0, %v3878_v41, %v3506_v37  ;;  %v8726_v37 = vld [vmem:[#allocation104_spill] sm:$0xff] }
 0x4c2   : > { %3143 = vrot.lane.b32.xlu1 %v2637_v59, %s5028_s26  ;;  %v3813_v44 = vsel %vm1913_vm10, %v3781_v25, %v3124_v20  ;;  %v3718_v59 = vsel %vm1715_vm3, %v8724_v14, %v8723_v54  ;;  %v8732_v25 = vld [vmem:[#allocation75_spill] sm:$0xff] }
 0x4c3   : > { %3017 = vrot.lane.b32.xlu0 %v7677_v50, %s5026_s19  ;;  %v3750_v9 = vsel %vm1781_vm6, %v3718_v59, %v8725_v19 }
 0x4c4   : > { %v3126_v32 = vpop.permute.xlu1 %3125  ;;  %v3782_v55 = vsel %vm1847_vm8, %v3750_v9, %v8726_v37  ;;  %v2579_v37 = vld [vmem:[#allocation3 + $0x172] sm:$0xff] }
 0x4c5   : > { %v3632_v56 = vpop.permute.xlu0 %3631  ;;  %v3814_v45 = vsel %vm1913_vm10, %v3782_v55, %v3126_v32 }
 0x4c6   : > { %v3943_v35 = vsel %vm3930_vm1, %v3910_v21, %v3632_v56  ;;  %3651 = vrot.lane.b32.xlu1 %v2669_v46, %s5032_s11  ;;  %v2577_v21 = vld [vmem:[#allocation3 + $0x15a] sm:$0xff] }
 0x4c7   : > { %3525 = vrot.lane.b32.xlu0 %v2638_v61, %s5031_s17  ;;  %4809 = vmatprep.mubr.msk.f32.mxu1 %vm3979_vm2, %v3943_v35  ;;  %v8727_v35 = vld [vmem:[#allocation13_spill] sm:$0xff] }
 0x4c8   : > { %v3634_v40 = vpop.permute.xlu1 %3633 }
 0x4c9   : > { %v3944_v33 = vsel %vm3930_vm1, %v3911_v31, %v3634_v40  ;;  %v3252_v17 = vpop.permute.xlu0 %3251  ;;  %v8729_v31 = vld [vmem:[#allocation133_spill] sm:$0xff] }
 0x4ca   : > { %3271 = vrot.lane.b32.xlu1 %v2669_v46, %s5029_s12  ;;  %4810 = vmatmul.mubr.msk.f32.gmra.mrb[10].mxu1 %vm3979_vm2, %v3944_v33  ;;  %v3846_v10 = vsel %vm3831_vm14, %v3813_v44, %v3252_v17  ;;  %v8730_v33 = vld [vmem:[#allocation25_spill] sm:$0xff]  ;;  %v8733_v44 = vld [vmem:[#allocation130_spill] sm:$0xff] }
 0x4cb   : > { %3145 = vrot.lane.b32.xlu0 %v2638_v61, %s5028_s26  ;;  %v8728_v61 = vld [vmem:[#allocation24_spill] sm:$0xff] }
 0x4cc   : > { %v3380_v24 = vpop.permute.xlu1 %3379  ;;  %v3719_v41 = vsel %vm1715_vm3, %v8728_v61, %v8727_v35 }
 0x4cd   : > { %v3254_v57 = vpop.permute.xlu0 %3253  ;;  %v3879_v43 = vsel %vm3864_vm15, %v3846_v10, %v3380_v24  ;;  %v3751_v40 = vsel %vm1781_vm6, %v3719_v41, %v8729_v31  ;;  %v2518_v31 = vld [vmem:[#allocation3 + $0x19] sm:$0xff] }
 0x4ce   : > { %3273 = vrot.lane.b32.xlu1 %v2575_v11, %s5029_s12  ;;  %v3847_v38 = vsel %vm3831_vm14, %v3814_v45, %v3254_v57  ;;  %v3783_v17 = vsel %vm1847_vm8, %v3751_v40, %v8730_v33  ;;  %v8734_v45 = vld [vmem:[#allocation76_spill] sm:$0xff]  ;;  %v8737_v40 = vld [vmem:[#allocation18_spill] sm:$0xff] }
 0x4cf   : > { %3653 = vrot.lane.b32.xlu0 %v2575_v11, %s5032_s11  ;;  %v3722_v33 = vsel %vm1715_vm3, %v7467_v60, %v8737_v40  ;;  %v2646_v40 = vld [vmem:[#allocation3 + $0x1a1] sm:$0xff] }
 0x4d0   : > { %v3508_v5 = vpop.permute.xlu1 %3507 }
 0x4d1   : > { %v3382_v8 = vpop.permute.xlu0 %3381  ;;  %v3912_v28 = vsel %vm3897_vm0, %v3879_v43, %v3508_v5  ;;  %v2641_v5 = vld [vmem:[#allocation3 + $0x169] sm:$0xff] }
 0x4d2   : > { %3019 = vrot.lane.b32.xlu1 %v2512_v2, %s5026_s19  ;;  %v3880_v12 = vsel %vm3864_vm15, %v3847_v38, %v3382_v8 }
 0x4d3   : > { %3399 = vrot.lane.b32.xlu0 %v2512_v2, %s5030_s20  ;;  %v2610_v2 = vld [vmem:[#allocation3 + $0x170] sm:$0xff] }
 0x4d4   : > { %v3128_v16 = vpop.permute.xlu1 %3127 }
 0x4d5   : > { %v7727_v23 = vpop.permute.xlu0 %3001  ;;  %v3815_v57 = vsel %vm1913_vm10, %v3783_v17, %v3128_v16  ;;  %v3720_v16 = vsel %vm1715_vm3, %v8732_v25, %v8731_v27  ;;  %v8738_v17 = vld [vmem:[#allocation30_spill] sm:$0xff] }
 0x4d6   : > { %3527 = vrot.lane.b32.xlu1 %v2639_v7, %s5031_s17  ;;  %v2519_v27 = vld [vmem:[#allocation3 + $0x21] sm:$0xff] }
 0x4d7   : > { %3401 = vrot.lane.b32.xlu0 %v2608_v51, %s5030_s20 }
 0x4d8   : > { %v3636_v62 = vpop.permute.xlu1 %3635 }
 0x4d9   : > { %v3945_v6 = vsel %vm3930_vm1, %v3912_v28, %v3636_v62  ;;  %v3510_v39 = vpop.permute.xlu0 %3509  ;;  %v2673_v28 = vld [vmem:[#allocation3 + $0x16a] sm:$0xff] }
 0x4da   : > { %3147 = vrot.lane.b32.xlu1 %v2639_v7, %s5028_s26  ;;  %4812 = vmatprep.mubr.msk.f32.mxu1 %vm3979_vm2, %v3945_v6  ;;  %v3913_v49 = vsel %vm3897_vm0, %v3880_v12, %v3510_v39  ;;  %v3752_v7 = vsel %vm1781_vm6, %v3720_v16, %v8733_v44  ;;  %v2642_v6 = vld [vmem:[#allocation3 + $0x171] sm:$0xff] }
 0x4db   : > { %3021 = vrot.lane.b32.xlu0 %v2608_v51, %s5026_s19  ;;  %v3784_v51 = vsel %vm1847_vm8, %v3752_v7, %v7727_v23  ;;  %v8736_v12 = vld [vmem:[#allocation36_spill] sm:$0xff]  ;;  %v2550_v7 = vld [vmem:[#allocation3 + $0x1a] sm:$0xff] }
 0x4dc   : > { %v3256_v4 = vpop.permute.xlu1 %3255 }
 0x4dd   : > { %v3130_v20 = vpop.permute.xlu0 %3129  ;;  %v3848_v8 = vsel %vm3831_vm14, %v3815_v57, %v3256_v4 }
 0x4de   : > { %3655 = vrot.lane.b32.xlu1 %v2671_v30, %s5032_s11  ;;  %v3816_v62 = vsel %vm1913_vm10, %v3784_v51, %v3130_v20 }
 0x4df   : > { %3529 = vrot.lane.b32.xlu0 %v2640_v13, %s5031_s17 }
 0x4e0   : > { %v3258_v18 = vpop.permute.xlu1 %3257 }
 0x4e1   : > { %v3638_v0 = vpop.permute.xlu0 %3637  ;;  %v3849_v39 = vsel %vm3831_vm14, %v3816_v62, %v3258_v18 }
 0x4e2   : > { %v3946_v22 = vsel %vm3930_vm1, %v3913_v49, %v3638_v0  ;;  %3275 = vrot.lane.b32.xlu1 %v2671_v30, %s5029_s12  ;;  %v2516_v30 = vld [vmem:[#allocation3 + $0x180] sm:$0xff] }
 0x4e3   : > { %3149 = vrot.lane.b32.xlu0 %v2640_v13, %s5028_s26  ;;  %4813 = vmatmul.mubr.msk.f32.gmra.mrb[12].mxu1 %vm3979_vm2, %v3946_v22  ;;  %v8735_v13 = vld [vmem:[#allocation28_spill] sm:$0xff] }
 0x4e4   : > { %v3004_v32 = vpop.permute.xlu1 %3003  ;;  %v3721_v38 = vsel %vm1715_vm3, %v8735_v13, %v8734_v45  ;;  %v2583_v45 = vld [vmem:[#allocation3 + $0x30] sm:$0xff]  ;;  %v8741_v13 = vld [vmem:[#allocation21_spill] sm:$0xff] }
 0x4e5   : > { %v3384_v63 = vpop.permute.xlu0 %3383  ;;  %v3753_v18 = vsel %vm1781_vm6, %v3721_v38, %v8736_v12  ;;  %v3724_v38 = vsel %vm1715_vm3, %v7526_v26, %v8741_v13  ;;  %v2614_v12 = vld [vmem:[#allocation3 + $0x1a0] sm:$0xff] }
 0x4e6   : > { %3277 = vrot.lane.b32.xlu1 %v2577_v21, %s5029_s12  ;;  %v3881_v42 = vsel %vm3864_vm15, %v3848_v8, %v3384_v63  ;;  %v3785_v49 = vsel %vm1847_vm8, %v3753_v18, %v3004_v32  ;;  %v8742_v18 = vld [vmem:[#allocation79_spill] sm:$0xff]  ;;  %v2645_v26 = vld [vmem:[#allocation3 + $0x199] sm:$0xff] }
 0x4e7   : > { %3657 = vrot.lane.b32.xlu0 %v2577_v21, %s5032_s11  ;;  %v2643_v21 = vld [vmem:[#allocation3 + $0x181] sm:$0xff] }
 0x4e8   : > { %v3512_v56 = vpop.permute.xlu1 %3511 }
 0x4e9   : > { %v3386_v46 = vpop.permute.xlu0 %3385  ;;  %v3914_v34 = vsel %vm3897_vm0, %v3881_v42, %v3512_v56 }
 0x4ea   : > { %3023 = vrot.lane.b32.xlu1 %v2514_v15, %s5026_s19  ;;  %v3882_v54 = vsel %vm3864_vm15, %v3849_v39, %v3386_v46  ;;  %v2612_v46 = vld [vmem:[#allocation3 + $0x188] sm:$0xff] }
 0x4eb   : > { %3403 = vrot.lane.b32.xlu0 %v2514_v15, %s5030_s20 }
 0x4ec   : > { %v3132_v24 = vpop.permute.xlu1 %3131 }
 0x4ed   : > { %v7767_v11 = vpop.permute.xlu0 %3005  ;;  %v3817_v22 = vsel %vm1913_vm10, %v3785_v49, %v3132_v24  ;;  %v3754_v24 = vsel %vm1781_vm6, %v3722_v33, %v8738_v17  ;;  %v3756_v49 = vsel %vm1781_vm6, %v3724_v38, %v8742_v18 }
 0x4ee   : > { %3531 = vrot.lane.b32.xlu1 %v2641_v5, %s5031_s17 }
 0x4ef   : > { %3405 = vrot.lane.b32.xlu0 %v2610_v2, %s5030_s20 }
 0x4f0   : > { %v3640_v58 = vpop.permute.xlu1 %3639 }
 0x4f1   : > { %v3947_v36 = vsel %vm3930_vm1, %v3914_v34, %v3640_v58  ;;  %v3514_v1 = vpop.permute.xlu0 %3513 }
 0x4f2   : > { %3151 = vrot.lane.b32.xlu1 %v2641_v5, %s5028_s26  ;;  %4815 = vmatprep.mubr.msk.f32.mxu1 %vm3979_vm2, %v3947_v36  ;;  %v3915_v59 = vsel %vm3897_vm0, %v3882_v54, %v3514_v1  ;;  %v3786_v5 = vsel %vm1847_vm8, %v3754_v24, %v7767_v11  ;;  %v2675_v11 = vld [vmem:[#allocation3 + $0x182] sm:$0xff]  ;;  %v2616_v24 = vld [vmem:[#allocation3 + $0x39] sm:$0xff] }
 0x4f3   : > { %3025 = vrot.lane.b32.xlu0 %v2610_v2, %s5026_s19  ;;  %v2644_v2 = vld [vmem:[#allocation3 + $0x189] sm:$0xff] }
 0x4f4   : > { %v3260_v10 = vpop.permute.xlu1 %3259 }
 0x4f5   : > { %v3134_v43 = vpop.permute.xlu0 %3133  ;;  %v3850_v56 = vsel %vm3831_vm14, %v3817_v22, %v3260_v10 }
 0x4f6   : > { %3659 = vrot.lane.b32.xlu1 %v2673_v28, %s5032_s11  ;;  %v3818_v42 = vsel %vm1913_vm10, %v3786_v5, %v3134_v43  ;;  %v2676_v43 = vld [vmem:[#allocation3 + $0x18a] sm:$0xff] }
 0x4f7   : > { %3533 = vrot.lane.b32.xlu0 %v2642_v6, %s5031_s17 }
 0x4f8   : > { %v3262_v14 = vpop.permute.xlu1 %3261 }
 0x4f9   : > { %v3642_v19 = vpop.permute.xlu0 %3641  ;;  %v3851_v34 = vsel %vm3831_vm14, %v3818_v42, %v3262_v14 }
 0x4fa   : > { %v3948_v9 = vsel %vm3930_vm1, %v3915_v59, %v3642_v19  ;;  %3279 = vrot.lane.b32.xlu1 %v2673_v28, %s5029_s12  ;;  %v8739_v28 = vld [vmem:[#allocation19_spill] sm:$0xff] }
 0x4fb   : > { %3153 = vrot.lane.b32.xlu0 %v2642_v6, %s5028_s26  ;;  %4816 = vmatmul.mubr.msk.f32.gmra.mrb[14].mxu1 %vm3979_vm2, %v3948_v9  ;;  %v3723_v62 = vsel %vm1715_vm3, %v7506_v29, %v8739_v28  ;;  %v8740_v6 = vld [vmem:[#allocation82_spill] sm:$0xff] }
 0x4fc   : > { %v7795_v23 = vpop.permute.xlu1 %3007  ;;  %v3755_v39 = vsel %vm1781_vm6, %v3723_v62, %v8740_v6  ;;  %v2551_v29 = vld [vmem:[#allocation3 + $0x22] sm:$0xff] }
 0x4fd   : > { %v3388_v4 = vpop.permute.xlu0 %3387  ;;  %v3787_v54 = vsel %vm1847_vm8, %v3755_v39, %v7795_v23 }
 0x4fe   : > { %3281 = vrot.lane.b32.xlu1 %v2579_v37, %s5029_s12  ;;  %v3883_v15 = vsel %vm3864_vm15, %v3850_v56, %v3388_v4 }
 0x4ff   : > { %3661 = vrot.lane.b32.xlu0 %v2579_v37, %s5032_s11  ;;  %v2613_v37 = vld [vmem:[#allocation3 + $0x198] sm:$0xff] }
 0x500   : > { %v3516_v55 = vpop.permute.xlu1 %3515 }
 0x501   : > { %v3390_v20 = vpop.permute.xlu0 %3389  ;;  %v3916_v35 = vsel %vm3897_vm0, %v3883_v15, %v3516_v55 }
 0x502   : > { %3027 = vrot.lane.b32.xlu1 %v2516_v30, %s5026_s19  ;;  %v3884_v60 = vsel %vm3864_vm15, %v3851_v34, %v3390_v20  ;;  %v2647_v34 = vld [vmem:[#allocation3 + $0x32] sm:$0xff] }
 0x503   : > { %3407 = vrot.lane.b32.xlu0 %v2516_v30, %s5030_s20 }
 0x504   : > { %v3136_v0 = vpop.permute.xlu1 %3135 }
 0x505   : > { %v7808_v63 = vpop.permute.xlu0 %3009  ;;  %v3819_v59 = vsel %vm1913_vm10, %v3787_v54, %v3136_v0  ;;  %v8745_v54 = vld [vmem:[#allocation77_spill] sm:$0xff] }
 0x506   : > { %3535 = vrot.lane.b32.xlu1 %v2643_v21, %s5031_s17  ;;  %v3788_v22 = vsel %vm1847_vm8, %v3756_v49, %v7808_v63  ;;  %v2615_v63 = vld [vmem:[#allocation3 + $0x31] sm:$0xff] }
 0x507   : > { %3409 = vrot.lane.b32.xlu0 %v2612_v46, %s5030_s20 }
 0x508   : > { %v3644_v61 = vpop.permute.xlu1 %3643 }
 0x509   : > { %v3949_v32 = vsel %vm3930_vm1, %v3916_v35, %v3644_v61  ;;  %v3518_v41 = vpop.permute.xlu0 %3517 }
 0x50a   : > { %3095 = vrot.lane.b32.xlu1 %v2518_v31, %s5028_s26  ;;  %4818 = vmatprep.mubr.msk.f32.mxu1 %vm3979_vm2, %v3949_v32  ;;  %v3917_v36 = vsel %vm3897_vm0, %v3884_v60, %v3518_v41  ;;  %v8744_v60 = vld [vmem:[#allocation102_spill] sm:$0xff] }
 0x50b   : > { %3029 = vrot.lane.b32.xlu0 %v2612_v46, %s5026_s19  ;;  %v2584_v46 = vld [vmem:[#allocation3 + $0x38] sm:$0xff]  ;;  %s5033_s19 = smov [#allocation5]  }
 0x50c   : > { %v3264_v57 = vpop.permute.xlu1 %3263 }
 0x50d   : > { %v3138_v8 = vpop.permute.xlu0 %3137  ;;  %v3852_v9 = vsel %vm3831_vm14, %v3819_v59, %v3264_v57  ;;  %v2677_v57 = vld [vmem:[#allocation3 + $0x19a] sm:$0xff] }
 0x50e   : > { %3537 = vrot.lane.b32.xlu1 %v2644_v2, %s5031_s17  ;;  %v3820_v56 = vsel %vm1913_vm10, %v3788_v22, %v3138_v8 }
 0x50f   : > { %3155 = vrot.lane.b32.xlu0 %v2643_v21, %s5028_s26 }
 0x510   : > { %v3266_v58 = vpop.permute.xlu1 %3265 }
 0x511   : > { %v3646_v1 = vpop.permute.xlu0 %3645  ;;  %v3853_v15 = vsel %vm3831_vm14, %v3820_v56, %v3266_v58 }
 0x512   : > { %v3950_v25 = vsel %vm3930_vm1, %v3917_v36, %v3646_v1  ;;  %3097 = vrot.lane.b32.xlu1 %v2519_v27, %s5028_s26  ;;  %v2678_v36 = vld [vmem:[#allocation3 + $0x1a2] sm:$0xff] }
 0x513   : > { %3663 = vrot.lane.b32.xlu0 %v2675_v11, %s5032_s11  ;;  %4819 = vmatmul.mubr.msk.f32.gmra.mrb[16].mxu1 %vm3979_vm2, %v3950_v25 }
 0x514   : > { %v7836_v16 = vpop.permute.xlu1 %3011 }
 0x515   : > { %v3392_v44 = vpop.permute.xlu0 %3391 }
 0x516   : > { %3223 = vrot.lane.b32.xlu1 %v2550_v7, %s5029_s12  ;;  %v3885_v4 = vsel %vm3864_vm15, %v3852_v9, %v3392_v44  ;;  %v2648_v44 = vld [vmem:[#allocation3 + $0x3a] sm:$0xff]  ;;  %v8746_v9 = vld [vmem:[#allocation99_spill] sm:$0xff] }
 0x517   : > { %3157 = vrot.lane.b32.xlu0 %v2644_v2, %s5028_s26  ;;  %v8743_v2 = vld [vmem:[#allocation22_spill] sm:$0xff]  ;;  %s4960_s26 = sshll.u32 %s5033_s19, 4  ;;  %s4961_s26 = int_to_ptr.vmem [resolvable:$false] %s4960_s26 }
 0x518   : > { %v3520_v10 = vpop.permute.xlu1 %3519  ;;  %v3725_v42 = vsel %vm1715_vm3, %v7568_v47, %v8743_v2 }
 0x519   : > { %v3394_v51 = vpop.permute.xlu0 %3393  ;;  %v3918_v55 = vsel %vm3897_vm0, %v3885_v4, %v3520_v10  ;;  %v3757_v58 = vsel %vm1781_vm6, %v3725_v42, %v8744_v60  ;;  %v7899_v10 = vld [vmem:[%s8272_s4] ss:$0 sm:$0xff]  ;;  %v8749_v42 = vld [vmem:[#allocation55_spill] sm:$0xff] }
 0x51a   : > { %3665 = vrot.lane.b32.xlu1 %v2676_v43, %s5032_s11  ;;  %v3886_v35 = vsel %vm3864_vm15, %v3853_v15, %v3394_v51  ;;  %v3789_v1 = vsel %vm1847_vm8, %v3757_v58, %v7836_v16  ;;  %v8750_v60 = vld [vmem:[#allocation12_spill] sm:$0xff] }
 0x51b   : > { %3283 = vrot.lane.b32.xlu0 %v2675_v11, %s5029_s12 }
 0x51c   : > { %v3140_v14 = vpop.permute.xlu1 %3139 }
 0x51d   : > { %v7850_v19 = vpop.permute.xlu0 %3013  ;;  %v3821_v25 = vsel %vm1913_vm10, %v3789_v1, %v3140_v14  ;;  %v3726_v14 = vsel %vm1715_vm3, %v7582_v53, %v8745_v54  ;;  %v8751_v54 = vld [vmem:[#allocation26_spill] sm:$0xff] }
 0x51e   : > { %3285 = vrot.lane.b32.xlu1 %v2676_v43, %s5029_s12 }
 0x51f   : > { %3225 = vrot.lane.b32.xlu0 %v2551_v29, %s5029_s12  ;;  %v3758_v29 = vsel %vm1781_vm6, %v3726_v14, %v8746_v9  ;;  %v3729_v14 = vsel %vm1715_vm3, %v7671_v3, %v8751_v54  ;;  %s4962_s12 = scalar_lea.vmem %s4961_s26, 2048 }
 0x520   : > { %v3648_v20 = vpop.permute.xlu1 %3647  ;;  %v3790_v53 = vsel %vm1847_vm8, %v3758_v29, %v7850_v19 }
 0x521   : > { %v3951_v23 = vsel %vm3930_vm1, %v3918_v55, %v3648_v20  ;;  %v3522_v30 = vpop.permute.xlu0 %3521 }
 0x522   : > { %3411 = vrot.lane.b32.xlu1 %v2613_v37, %s5030_s20  ;;  %4821 = vmatprep.mubr.msk.f32.mxu1 %vm3979_vm2, %v3951_v23  ;;  %v3919_v32 = vsel %vm3897_vm0, %v3886_v35, %v3522_v30 }
 0x523   : > { %3351 = vrot.lane.b32.xlu0 %v2583_v45, %s5030_s20 }
 0x524   : > { %v3268_v0 = vpop.permute.xlu1 %3267 }
 0x525   : > { %v3142_v21 = vpop.permute.xlu0 %3141  ;;  %v3854_v47 = vsel %vm3831_vm14, %v3821_v25, %v3268_v0 }
 0x526   : > { %3413 = vrot.lane.b32.xlu1 %v2614_v12, %s5030_s20  ;;  %v3822_v23 = vsel %vm1913_vm10, %v3790_v53, %v3142_v21  ;;  %v8747_v21 = vld [vmem:[#allocation129_spill] sm:$0xff] }
 0x527   : > { %3353 = vrot.lane.b32.xlu0 %v2584_v46, %s5030_s20  ;;  %v3727_v56 = vsel %vm1715_vm3, %v7623_v48, %v8747_v21  ;;  %v8748_v46 = vld [vmem:[#allocation20_spill] sm:$0xff]  ;;  %s4466_s20 = sshll.u32 %s8013_s16, 4  ;;  %s8218_s20 = int_to_ptr.vmem [resolvable:$true] %s4466_s20 }
 0x528   : > { %v3270_v61 = vpop.permute.xlu1 %3269  ;;  %v3759_v15 = vsel %vm1781_vm6, %v3727_v56, %v8748_v46  ;;  %v8753_v46 = vld [vmem:[#allocation131_spill] sm:$0xff]  ;;  %p4963_p0 = scmp.lt.s32.totalorder %s8218_s20, %s4961_s26 }
 0x529   : > { %v3650_v41 = vpop.permute.xlu0 %3649  ;;  %v3855_v30 = vsel %vm3831_vm14, %v3822_v23, %v3270_v61 }
 0x52a   : > { %v3952_v31 = vsel %vm3930_vm1, %v3919_v32, %v3650_v41  ;;  %3539 = vrot.lane.b32.xlu1 %v2645_v26, %s5031_s17 }
 0x52b   : > { %3479 = vrot.lane.b32.xlu0 %v2615_v63, %s5031_s17  ;;  %4822 = vmatmul.mubr.msk.f32.gmra.mrb[18].mxu1 %vm3979_vm2, %v3952_v31 }
 0x52c   : > { %v3016_v33 = vpop.permute.xlu1 %3015 }
 0x52d   : > { %v3396_v17 = vpop.permute.xlu0 %3395  ;;  %v3791_v26 = vsel %vm1847_vm8, %v3759_v15, %v3016_v33  ;;  %v3730_v15 = vsel %vm1715_vm3, %v7677_v50, %v8753_v46 }
 0x52e   : > { %3541 = vrot.lane.b32.xlu1 %v2646_v40, %s5031_s17  ;;  %v3887_v7 = vsel %vm3864_vm15, %v3854_v47, %v3396_v17 }
 0x52f   : > { %3481 = vrot.lane.b32.xlu0 %v2616_v24, %s5031_s17  ;;  %s8216_s17 = scalar_lea.hbm %s8274_s6, %s4636_s18 }
 0x530   : > { %v3524_v5 = vpop.permute.xlu1 %3523 }
 0x531   : > { %v3398_v8 = vpop.permute.xlu0 %3397  ;;  %v3920_v16 = vsel %vm3897_vm0, %v3887_v7, %v3524_v5 }
 0x532   : > { %3667 = vrot.lane.b32.xlu1 %v2677_v57, %s5032_s11  ;;  %v3888_v45 = vsel %vm3864_vm15, %v3855_v30, %v3398_v8 }
 0x533   : > { %3607 = vrot.lane.b32.xlu0 %v2647_v34, %s5032_s11  ;;  %v3728_v34 = vsel %vm1715_vm3, %v7631_v52, %v8749_v42 }
 0x534   : > { %v3144_v27 = vpop.permute.xlu1 %3143  ;;  %v3760_v58 = vsel %vm1781_vm6, %v3728_v34, %v8750_v60 }
 0x535   : > { %v7890_v11 = vpop.permute.xlu0 %3017  ;;  %v3823_v61 = vsel %vm1913_vm10, %v3791_v26, %v3144_v27  ;;  %v8754_v26 = vld [vmem:[#allocation57_spill] sm:$0xff] }
 0x536   : > { %3669 = vrot.lane.b32.xlu1 %v2678_v36, %s5032_s11  ;;  %v3792_v1 = vsel %vm1847_vm8, %v3760_v58, %v7890_v11 }
 0x537   : > { %3609 = vrot.lane.b32.xlu0 %v2648_v44, %s5032_s11  ;;  %s4956_s11 = scalar_lea.vmem %s8218_s20, 1024 }
 0x538   : > { %v3652_v51 = vpop.permute.xlu1 %3651  ;;  %p4957_p11 = scmp.ne.s32.totalorder %s8218_s20, %s4956_s11  ;;  %p4964_p1 = scmp.lt.s32.totalorder %s4962_s12, %s4956_s11 }
 0x539   : > { %v3953_v43 = vsel %vm3930_vm1, %v3920_v16, %v3652_v51  ;;  %v4796_v28 = vpop.f32.mrb[0].mxu1  ;;  %v3526_v62 = vpop.permute.xlu0 %3525 }
 0x53a   : > { %v7904_v6 = vadd.f32 %v4796_v28, %v7899_v10  ;;  %v4152_v39 = vpop.f32.mrb[1].mxu1  ;;  %4824 = vmatprep.mubr.msk.f32.mxu1 %vm3979_vm2, %v3953_v43  ;;  %v3921_v19 = vsel %vm3897_vm0, %v3888_v45, %v3526_v62  ;;  %p4958_p12 = pnand %p4957_p11, %p5108_p5  ;;  %p4965_p2 = por %p4964_p1, %p4963_p0 }
 0x53b   : > { %v7918_v59 = vadd.f32 %v7899_v10, %v4152_v39 }
 0x53c   : > { %v4304_v4 = vmax.f32 %v7904_v6, 0.0  ;;  %v3272_v37 = vpop.permute.xlu1 %3271  ;;  %p4959_p13 = pneg %p4958_p12 }
 0x53d   : > { %v4303_v55 = vmax.f32 %v7918_v59, 0.0  ;;  %v3146_v20 = vpop.permute.xlu0 %3145  ;;  %v3856_v31 = vsel %vm3831_vm14, %v3823_v61, %v3272_v37  ;;  %v8752_v37 = vld [vmem:[#allocation63_spill] sm:$0xff] }
 0x53e   : > { %4336 = vst.msk [vmem:[%s7915_s14 + $0x18] sm:$0xff] %vm1715_vm3, %v4304_v4  ;;  %v3824_v25 = vsel %vm1913_vm10, %v3792_v1, %v3146_v20  ;;  %v3761_v53 = vsel %vm1781_vm6, %v3729_v14, %v8752_v37  ;;  %v2419_v37 = vld [vmem:[#allocation3 + $0x158] sm:$0xff]  ;;  %p4966_p3 = pnand %p4965_p2, %p4959_p13 }
 0x53f   : > { %4335 = vst.msk [vmem:[%s7915_s14 + $0x10] sm:$0xff] %vm1715_vm3, %v4303_v55 }
 0x540   : > { %v3274_v13 = vpop.permute.xlu1 %3273 }
 0x541   : > { %v3654_v38 = vpop.permute.xlu0 %3653  ;;  %v3857_v47 = vsel %vm3831_vm14, %v3824_v25, %v3274_v13 }
 0x542   : > { %v3954_v12 = vsel %vm3930_vm1, %v3921_v19, %v3654_v38 }
 0x543   : > { %4825 = vmatmul.mubr.msk.f32.gmra.mrb[20].mxu1 %vm3979_vm2, %v3954_v12 }
 0x544   : > { %v3020_v18 = vpop.permute.xlu1 %3019 }
 0x545   : > { %v3400_v49 = vpop.permute.xlu0 %3399  ;;  %v3793_v23 = vsel %vm1847_vm8, %v3761_v53, %v3020_v18 }
 0x546   : > { %v3889_v48 = vsel %vm3864_vm15, %v3856_v31, %v3400_v49 }
 0x548   : > { %v3528_v0 = vpop.permute.xlu1 %3527 }
 0x549   : > { %v3402_v22 = vpop.permute.xlu0 %3401  ;;  %v3922_v24 = vsel %vm3897_vm0, %v3889_v48, %v3528_v0 }
 0x54a   : > { %v3890_v44 = vsel %vm3864_vm15, %v3857_v47, %v3402_v22 }
 0x54c   : > { %v3148_v35 = vpop.permute.xlu1 %3147 }
 0x54d   : > { %v7947_v32 = vpop.permute.xlu0 %3021  ;;  %v4799_v41 = vpop.f32.mrb[2].mxu1  ;;  %v3825_v13 = vsel %vm1913_vm10, %v3793_v23, %v3148_v35  ;;  %v3762_v35 = vsel %vm1781_vm6, %v3730_v15, %v8754_v26  ;;  %v8757_v23 = vld [vmem:[#allocation32_spill] sm:$0xff] }
 0x54e   : > { %v4168_v63 = vadd.f32 %v4799_v41, %v7899_v10  ;;  %v4162_v40 = vpop.f32.mrb[3].mxu1  ;;  %v3794_v41 = vsel %vm1847_vm8, %v3762_v35, %v7947_v32 }
 0x54f   : > { %v4163_v17 = vadd.f32 %v7899_v10, %v4162_v40 }
 0x550   : > { %v4306_v33 = vmax.f32 %v4168_v63, 0.0  ;;  %v3656_v57 = vpop.permute.xlu1 %3655 }
 0x551   : > { %v4305_v5 = vmax.f32 %v4163_v17, 0.0  ;;  %v3955_v8 = vsel %vm3930_vm1, %v3922_v24, %v3656_v57  ;;  %v3530_v2 = vpop.permute.xlu0 %3529 }
 0x552   : > { %4338 = vst.msk [vmem:[%s7915_s14 + $0x28] sm:$0xff] %vm1715_vm3, %v4306_v33  ;;  %4827 = vmatprep.mubr.msk.f32.mxu1 %vm3979_vm2, %v3955_v8  ;;  %v3923_v16 = vsel %vm3897_vm0, %v3890_v44, %v3530_v2 }
 0x553   : > { %4337 = vst.msk [vmem:[%s7915_s14 + $0x20] sm:$0xff] %vm1715_vm3, %v4305_v5 }
 0x554   : > { %v3276_v36 = vpop.permute.xlu1 %3275 }
 0x555   : > { %v3150_v27 = vpop.permute.xlu0 %3149  ;;  %v3858_v3 = vsel %vm3831_vm14, %v3825_v13, %v3276_v36 }
 0x556   : > { %v3826_v63 = vsel %vm1913_vm10, %v3794_v41, %v3150_v27 }
 0x558   : > { %v3278_v7 = vpop.permute.xlu1 %3277 }
 0x559   : > { %v3658_v52 = vpop.permute.xlu0 %3657  ;;  %v3859_v40 = vsel %vm3831_vm14, %v3826_v63, %v3278_v7  ;;  %v2418_v7 = vld [vmem:[#allocation3 + $0x150] sm:$0xff] }
 0x55a   : > { %v3956_v51 = vsel %vm3930_vm1, %v3923_v16, %v3658_v52  ;;  %v8755_v16 = vld [vmem:[#allocation78_spill] sm:$0xff] }
 0x55b   : > { %4828 = vmatmul.mubr.msk.f32.gmra.mrb[22].mxu1 %vm3979_vm2, %v3956_v51  ;;  %v3731_v52 = vsel %vm1715_vm3, %v2418_v7, %v8755_v16  ;;  %v8756_v51 = vld [vmem:[#allocation135_spill] sm:$0xff]  ;;  %v8760_v7 = vld [vmem:[#allocation9_spill] sm:$0xff] }
 0x55c   : > { %v7973_v43 = vpop.permute.xlu1 %3023 }
 0x55d   : > { %v3404_v28 = vpop.permute.xlu0 %3403 }
 0x55e   : > { %v3891_v49 = vsel %vm3864_vm15, %v3858_v3, %v3404_v28  ;;  %v3763_v28 = vsel %vm1781_vm6, %v3731_v52, %v8756_v51  ;;  %v8761_v52 = vld [vmem:[#allocation40_spill] sm:$0xff] }
 0x560   : > { %v3532_v11 = vpop.permute.xlu1 %3531 }
 0x561   : > { %v3406_v62 = vpop.permute.xlu0 %3405  ;;  %v4802_v39 = vpop.f32.mrb[4].mxu1  ;;  %v3924_v18 = vsel %vm3897_vm0, %v3891_v49, %v3532_v11 }
 0x562   : > { %v4178_v9 = vadd.f32 %v4802_v39, %v7899_v10  ;;  %v4172_v29 = vpop.f32.mrb[5].mxu1  ;;  %v3892_v48 = vsel %vm3864_vm15, %v3859_v40, %v3406_v62  ;;  %v3795_v62 = vsel %vm1847_vm8, %v3763_v28, %v7973_v43  ;;  %v8758_v43 = vld [vmem:[#allocation132_spill] sm:$0xff] }
 0x563   : > { %v4173_v20 = vadd.f32 %v7899_v10, %v4172_v29 }
 0x564   : > { %v4308_v30 = vmax.f32 %v4178_v9, 0.0  ;;  %v3152_v45 = vpop.permute.xlu1 %3151 }
 0x565   : > { %v4307_v19 = vmax.f32 %v4173_v20, 0.0  ;;  %v7984_v38 = vpop.permute.xlu0 %3025  ;;  %v3827_v54 = vsel %vm1913_vm10, %v3795_v62, %v3152_v45  ;;  %v8762_v62 = vld [vmem:[#allocation10_spill] sm:$0xff] }
 0x566   : > { %4340 = vst.msk [vmem:[%s7915_s14 + $0x38] sm:$0xff] %vm1715_vm3, %v4308_v30  ;;  %v4368_v12 = vmax.f32 %v4306_v33, %v4308_v30  ;;  %v3732_v30 = vsel %vm1715_vm3, %v2419_v37, %v8757_v23 }
 0x567   : > { %4339 = vst.msk [vmem:[%s7915_s14 + $0x30] sm:$0xff] %vm1715_vm3, %v4307_v19  ;;  %v4367_v0 = vmax.f32 %v4305_v5, %v4307_v19  ;;  %v3764_v19 = vsel %vm1781_vm6, %v3732_v30, %v8758_v43 }
 0x568   : > { %4384 = vst.msk [vmem:[#allocation4 + $0x18] sm:$0xff] %vm1715_vm3, %v4368_v12  ;;  %v3660_v22 = vpop.permute.xlu1 %3659  ;;  %v3796_v45 = vsel %vm1847_vm8, %v3764_v19, %v7984_v38  ;;  %v8764_v19 = vld [vmem:[#allocation80_spill] sm:$0xff] }
 0x569   : > { %4383 = vst.msk [vmem:[#allocation4 + $0x10] sm:$0xff] %vm1715_vm3, %v4367_v0  ;;  %v3957_v21 = vsel %vm3930_vm1, %v3924_v18, %v3660_v22  ;;  %v3534_v56 = vpop.permute.xlu0 %3533 }
 0x56a   : > { %4830 = vmatprep.mubr.msk.f32.mxu1 %vm3979_vm2, %v3957_v21  ;;  %v3925_v57 = vsel %vm3897_vm0, %v3892_v48, %v3534_v56 }
 0x56c   : > { %v3280_v61 = vpop.permute.xlu1 %3279 }
 0x56d   : > { %v3154_v31 = vpop.permute.xlu0 %3153  ;;  %v3860_v14 = vsel %vm3831_vm14, %v3827_v54, %v3280_v61 }
 0x56e   : > { %v3828_v12 = vsel %vm1913_vm10, %v3796_v45, %v3154_v31 }
 0x570   : > { %v4399_v17 = vld [vmem:[#allocation4 + $0x10] ss:$2 sm:$0xff]  ;;  %v4415_v24 = vld [vmem:[#allocation4 + $0x11] ss:$2 sm:$0xff]  ;;  %v3282_v33 = vpop.permute.xlu1 %3281 }
 0x571   : > { %v4429_v50 = vmax.f32 %v4399_v17, %v4415_v24  ;;  %v3662_v5 = vpop.permute.xlu0 %3661  ;;  %v3861_v18 = vsel %vm3831_vm14, %v3828_v12, %v3282_v33 }
 0x572   : > { %v3958_v32 = vsel %vm3930_vm1, %v3925_v57, %v3662_v5 }
 0x573   : > { %4831 = vmatmul.mubr.msk.f32.gmra.mrb[24].mxu1 %vm3979_vm2, %v3958_v32  ;;  %4437 = vst.msk [vmem:[%s8013_s16 + $0x8] sm:$0xff] %vm1715_vm3, %v4429_v50 }
 0x574   : > { %v8017_v8 = vpop.permute.xlu1 %3027 }
 0x575   : > { %v3408_v2 = vpop.permute.xlu0 %3407  ;;  %v4805_v42 = vpop.f32.mrb[6].mxu1 }
 0x576   : > { %v4188_v34 = vadd.f32 %v4805_v42, %v7899_v10  ;;  %v4182_v60 = vpop.f32.mrb[7].mxu1  ;;  %v3893_v9 = vsel %vm3864_vm15, %v3860_v14, %v3408_v2  ;;  %v2390_v2 = vld [vmem:[#allocation3] sm:$0xff] }
 0x577   : > { %v4183_v58 = vadd.f32 %v7899_v10, %v4182_v60  ;;  %v3703_v16 = vsel %vm1715_vm3, %v2390_v2, %v8760_v7 }
 0x578   : > { %v4310_v36 = vmax.f32 %v4188_v34, 0.0  ;;  %v3536_v1 = vpop.permute.xlu1 %3535  ;;  %v2420_v34 = vld [vmem:[#allocation3 + $0x168] sm:$0xff]  ;;  %v3735_v54 = vsel %vm1781_vm6, %v3703_v16, %v8762_v62 }
 0x579   : > { %v4309_v27 = vmax.f32 %v4183_v58, 0.0  ;;  %v3410_v25 = vpop.permute.xlu0 %3409  ;;  %v3926_v53 = vsel %vm3897_vm0, %v3893_v9, %v3536_v1 }
 0x57a   : > { %4342 = vst.msk [vmem:[%s7915_s14 + $0x48] sm:$0xff] %vm1715_vm3, %v4310_v36  ;;  %v3894_v56 = vsel %vm3864_vm15, %v3861_v18, %v3410_v25 }
 0x57b   : > { %4341 = vst.msk [vmem:[%s7915_s14 + $0x40] sm:$0xff] %vm1715_vm3, %v4309_v27 }
 0x57c   : > { %v8025_v47 = vpop.permute.xlu1 %3095 }
 0x57d   : > { %v8027_v44 = vpop.permute.xlu0 %3029 }
 0x580   : > { %v3538_v11 = vpop.permute.xlu1 %3537 }
 0x581   : > { %v8035_v39 = vpop.permute.xlu0 %3155  ;;  %v3927_v15 = vsel %vm3897_vm0, %v3894_v56, %v3538_v11  ;;  %v2391_v11 = vld [vmem:[#allocation3 + $0x8] sm:$0xff] }
 0x584   : > { %v8040_v29 = vpop.permute.xlu1 %3097 }
 0x585   : > { %v3664_v20 = vpop.permute.xlu0 %3663 }
 0x586   : > { %v3959_v13 = vsel %vm3930_vm1, %v3926_v53, %v3664_v20  ;;  %v2421_v53 = vld [vmem:[#allocation3 + $0x170] sm:$0xff] }
 0x587   : > { %4833 = vmatprep.mubr.msk.f32.mxu1 %vm3979_vm2, %v3959_v13  ;;  %v8763_v20 = vld [vmem:[#allocation84_spill] sm:$0xff]  ;;  %v3734_v45 = vsel %vm1715_vm3, %v2421_v53, %v8764_v19 }
 0x588   : > { %v3224_v3 = vpop.permute.xlu1 %3223  ;;  %v3767_v23 = vsel %vm1847_vm8, %v3735_v54, %v8763_v20 }
 0x589   : > { %v8052_v49 = vpop.permute.xlu0 %3157  ;;  %v4808_v0 = vpop.f32.mrb[8].mxu1  ;;  %v3799_v12 = vsel %vm1913_vm10, %v3767_v23, %v8025_v47 }
 0x58a   : > { %v4198_v22 = vadd.f32 %v4808_v0, %v7899_v10  ;;  %v4192_v21 = vpop.f32.mrb[9].mxu1  ;;  %v8765_v0 = vld [vmem:[#allocation8_spill] sm:$0xff] }
 0x58b   : > { %v4193_v46 = vadd.f32 %v7899_v10, %v4192_v21  ;;  %v3704_v18 = vsel %vm1715_vm3, %v2391_v11, %v8765_v0 }
 0x58c   : > { %v4312_v38 = vmax.f32 %v4198_v22, 0.0  ;;  %v3666_v26 = vpop.permute.xlu1 %3665  ;;  %v8766_v22 = vld [vmem:[#allocation34_spill] sm:$0xff] }
 0x58d   : > { %v4311_v35 = vmax.f32 %v4193_v46, 0.0  ;;  %v3960_v61 = vsel %vm3930_vm1, %v3927_v15, %v3666_v26  ;;  %v3284_v41 = vpop.permute.xlu0 %3283  ;;  %v3766_v21 = vsel %vm1781_vm6, %v3734_v45, %v8766_v22  ;;  %v8767_v46 = vld [vmem:[#allocation100_spill] sm:$0xff] }
 0x58e   : > { %4344 = vst.msk [vmem:[%s7915_s14 + $0x58] sm:$0xff] %vm1715_vm3, %v4312_v38  ;;  %v4370_v31 = vmax.f32 %v4310_v36, %v4312_v38  ;;  %4834 = vmatmul.mubr.msk.f32.gmra.mrb[26].mxu1 %vm3979_vm2, %v3960_v61  ;;  %v8759_v36 = vld [vmem:[#allocation98_spill] sm:$0xff]  ;;  %v3736_v15 = vsel %vm1781_vm6, %v3704_v18, %v8767_v46  ;;  %v3798_v47 = vsel %vm1847_vm8, %v3766_v21, %v8027_v44  ;;  %v8768_v61 = vld [vmem:[#allocation81_spill] sm:$0xff] }
 0x58f   : > { %4343 = vst.msk [vmem:[%s7915_s14 + $0x50] sm:$0xff] %vm1715_vm3, %v4311_v35  ;;  %v4369_v63 = vmax.f32 %v4309_v27, %v4311_v35  ;;  %v3733_v1 = vsel %vm1715_vm3, %v2420_v34, %v8759_v36 }
 0x590   : > { %4386 = vst.msk [vmem:[#allocation4 + $0x28] sm:$0xff] %vm1715_vm3, %v4370_v31  ;;  %v3286_v40 = vpop.permute.xlu1 %3285  ;;  %v3765_v51 = vsel %vm1781_vm6, %v3733_v1, %v8761_v52 }
 0x591   : > { %4385 = vst.msk [vmem:[#allocation4 + $0x20] sm:$0xff] %vm1715_vm3, %v4369_v63  ;;  %v3226_v48 = vpop.permute.xlu0 %3225  ;;  %v3797_v14 = vsel %vm1847_vm8, %v3765_v51, %v8017_v8 }
 0x592   : > { %v3829_v30 = vsel %vm1913_vm10, %v3797_v14, %v8035_v39  ;;  %v3832_v39 = vsel %vm3831_vm14, %v3799_v12, %v3224_v3  ;;  %v3830_v3 = vsel %vm1913_vm10, %v3798_v47, %v8052_v49 }
 0x593   : > { %v3862_v8 = vsel %vm3831_vm14, %v3829_v30, %v3284_v41  ;;  %v3768_v41 = vsel %vm1847_vm8, %v3736_v15, %v8768_v61  ;;  %v3863_v44 = vsel %vm3831_vm14, %v3830_v3, %v3286_v40 }
 0x594   : > { %v3412_v17 = vpop.permute.xlu1 %3411 }
 0x595   : > { %v3352_v24 = vpop.permute.xlu0 %3351  ;;  %v3895_v56 = vsel %vm3864_vm15, %v3862_v8, %v3412_v17 }
 0x596   : > { %v3865_v38 = vsel %vm3864_vm15, %v3832_v39, %v3352_v24 }
 0x598   : > { %v4401_v33 = vld [vmem:[#allocation4 + $0x20] ss:$2 sm:$0xff]  ;;  %v4417_v50 = vld [vmem:[#allocation4 + $0x21] ss:$2 sm:$0xff]  ;;  %v3414_v57 = vpop.permute.xlu1 %3413 }
 0x599   : > { %v4430_v5 = vmax.f32 %v4401_v33, %v4417_v50  ;;  %v3354_v32 = vpop.permute.xlu0 %3353  ;;  %v3800_v33 = vsel %vm1913_vm10, %v3768_v41, %v8040_v29 }
 0x59a   : > { %v3833_v50 = vsel %vm3831_vm14, %v3800_v33, %v3226_v48 }
 0x59b   : > { %4438 = vst.msk [vmem:[%s8013_s16 + $0x10] sm:$0xff] %vm1715_vm3, %v4430_v5  ;;  %v3896_v5 = vsel %vm3864_vm15, %v3863_v44, %v3414_v57  ;;  %v3866_v49 = vsel %vm3864_vm15, %v3833_v50, %v3354_v32 }
 0x59c   : > { %v3540_v42 = vpop.permute.xlu1 %3539 }
 0x59d   : > { %v3480_v60 = vpop.permute.xlu0 %3479  ;;  %v4811_v58 = vpop.f32.mrb[10].mxu1  ;;  %v3928_v26 = vsel %vm3897_vm0, %v3895_v56, %v3540_v42 }
 0x59e   : > { %v4208_v27 = vadd.f32 %v4811_v58, %v7899_v10  ;;  %v4202_v25 = vpop.f32.mrb[11].mxu1  ;;  %v3898_v31 = vsel %vm3897_vm0, %v3865_v38, %v3480_v60 }
 0x59f   : > { %v4203_v28 = vadd.f32 %v7899_v10, %v4202_v25 }
 0x5a0   : > { %v4314_v9 = vmax.f32 %v4208_v27, 0.0  ;;  %v3542_v37 = vpop.permute.xlu1 %3541 }
 0x5a1   : > { %v4313_v13 = vmax.f32 %v4203_v28, 0.0  ;;  %v3482_v43 = vpop.permute.xlu0 %3481  ;;  %v3929_v2 = vsel %vm3897_vm0, %v3896_v5, %v3542_v37 }
 0x5a2   : > { %4346 = vst.msk [vmem:[%s7915_s14 + $0x68] sm:$0xff] %vm1715_vm3, %v4314_v9  ;;  %v3899_v29 = vsel %vm3897_vm0, %v3866_v49, %v3482_v43 }
 0x5a3   : > { %4345 = vst.msk [vmem:[%s7915_s14 + $0x60] sm:$0xff] %vm1715_vm3, %v4313_v13 }
 0x5a4   : > { %v3668_v35 = vpop.permute.xlu1 %3667 }
 0x5a5   : > { %v3961_v63 = vsel %vm3930_vm1, %v3928_v26, %v3668_v35  ;;  %v3608_v17 = vpop.permute.xlu0 %3607 }
 0x5a6   : > { %v3931_v24 = vsel %vm3930_vm1, %v3898_v31, %v3608_v17  ;;  %4836 = vmatprep.mubr.msk.f32.mxu1 %vm3979_vm2, %v3961_v63 }
 0x5a7   : > { %4791 = vmatprep.mubr.msk.f32.mxu0 %vm3979_vm2, %v3931_v24 }
 0x5a8   : > { %v3670_v42 = vpop.permute.xlu1 %3669 }
 0x5a9   : > { %v3962_v40 = vsel %vm3930_vm1, %v3929_v2, %v3670_v42  ;;  %v3610_v34 = vpop.permute.xlu0 %3609 }
 0x5aa   : > { %v3932_v60 = vsel %vm3930_vm1, %v3899_v29, %v3610_v34  ;;  %4837 = vmatmul.mubr.msk.f32.gmra.mrb[28].mxu1 %vm3979_vm2, %v3962_v40 }
 0x5ab   : > { %4792 = vmatmul.mubr.msk.f32.vlgmr.msra.gmra.mrb[32].mxu0 %vm3979_vm2, %v3932_v60 }
 0x5b6   : > { %v4814_v48 = vpop.f32.mrb[12].mxu1 }
 0x5b7   : > { %v4218_v57 = vadd.f32 %v4814_v48, %v7899_v10  ;;  %v4212_v32 = vpop.f32.mrb[13].mxu1 }
 0x5b8   : > { %v4213_v58 = vadd.f32 %v7899_v10, %v4212_v32 }
 0x5b9   : > { %v4316_v36 = vmax.f32 %v4218_v57, 0.0 }
 0x5ba   : > { %v4315_v1 = vmax.f32 %v4213_v58, 0.0 }
 0x5bb   : > { %4348 = vst.msk [vmem:[%s7915_s14 + $0x78] sm:$0xff] %vm1715_vm3, %v4316_v36  ;;  %v4372_v27 = vmax.f32 %v4314_v9, %v4316_v36 }
 0x5bc   : > { %4347 = vst.msk [vmem:[%s7915_s14 + $0x70] sm:$0xff] %vm1715_vm3, %v4315_v1  ;;  %v4371_v25 = vmax.f32 %v4313_v13, %v4315_v1 }
 0x5bd   : > { %4388 = vst.msk [vmem:[#allocation4 + $0x38] sm:$0xff] %vm1715_vm3, %v4372_v27 }
 0x5be   : > { %4387 = vst.msk [vmem:[#allocation4 + $0x30] sm:$0xff] %vm1715_vm3, %v4371_v25 }
 0x5c5   : > { %v4403_v7 = vld [vmem:[#allocation4 + $0x30] ss:$2 sm:$0xff]  ;;  %v4419_v16 = vld [vmem:[#allocation4 + $0x31] ss:$2 sm:$0xff] }
 0x5c6   : > { %v4431_v52 = vmax.f32 %v4403_v7, %v4419_v16 }
 0x5c8   : > { %4439 = vst.msk [vmem:[%s8013_s16 + $0x18] sm:$0xff] %vm1715_vm3, %v4431_v52 }
 0x5ce   : > { %v4817_v51 = vpop.f32.mrb[14].mxu1 }
 0x5cf   : > { %v4228_v28 = vadd.f32 %v4817_v51, %v7899_v10  ;;  %v4222_v11 = vpop.f32.mrb[15].mxu1 }
 0x5d0   : > { %v4223_v62 = vadd.f32 %v7899_v10, %v4222_v11 }
 0x5d1   : > { %v4318_v54 = vmax.f32 %v4228_v28, 0.0 }
 0x5d2   : > { %v4317_v14 = vmax.f32 %v4223_v62, 0.0 }
 0x5d3   : > { %4350 = vst.msk [vmem:[%s7915_s14 + $0x88] sm:$0xff] %vm1715_vm3, %v4318_v54 }
 0x5d4   : > { %4349 = vst.msk [vmem:[%s7915_s14 + $0x80] sm:$0xff] %vm1715_vm3, %v4317_v14 }
 0x5e6   : > { %v4820_v9 = vpop.f32.mrb[16].mxu1 }
 0x5e7   : > { %v4238_v37 = vadd.f32 %v4820_v9, %v7899_v10  ;;  %v4232_v53 = vpop.f32.mrb[17].mxu1 }
 0x5e8   : > { %v4233_v20 = vadd.f32 %v7899_v10, %v4232_v53 }
 0x5e9   : > { %v4320_v23 = vmax.f32 %v4238_v37, 0.0 }
 0x5ea   : > { %v4319_v30 = vmax.f32 %v4233_v20, 0.0 }
 0x5eb   : > { %4352 = vst.msk [vmem:[%s7915_s14 + $0x98] sm:$0xff] %vm1715_vm3, %v4320_v23  ;;  %v4374_v13 = vmax.f32 %v4318_v54, %v4320_v23 }
 0x5ec   : > { %4351 = vst.msk [vmem:[%s7915_s14 + $0x90] sm:$0xff] %vm1715_vm3, %v4319_v30  ;;  %v4373_v43 = vmax.f32 %v4317_v14, %v4319_v30 }
 0x5ed   : > { %4390 = vst.msk [vmem:[#allocation4 + $0x48] sm:$0xff] %vm1715_vm3, %v4374_v13 }
 0x5ee   : > { %4389 = vst.msk [vmem:[#allocation4 + $0x40] sm:$0xff] %vm1715_vm3, %v4373_v43 }
 0x5f5   : > { %v4405_v19 = vld [vmem:[#allocation4 + $0x40] ss:$2 sm:$0xff]  ;;  %v4421_v45 = vld [vmem:[#allocation4 + $0x41] ss:$2 sm:$0xff] }
 0x5f6   : > { %v4432_v12 = vmax.f32 %v4405_v19, %v4421_v45 }
 0x5f8   : > { %4440 = vst.msk [vmem:[%s8013_s16 + $0x20] sm:$0xff] %vm1715_vm3, %v4432_v12 }
 0x5fe   : > { %v4823_v8 = vpop.f32.mrb[18].mxu1 }
 0x5ff   : > { %v4248_v0 = vadd.f32 %v4823_v8, %v7899_v10  ;;  %v4242_v18 = vpop.f32.mrb[19].mxu1 }
 0x600   : > { %v4243_v22 = vadd.f32 %v7899_v10, %v4242_v18 }
 0x601   : > { %v4322_v21 = vmax.f32 %v4248_v0, 0.0 }
 0x602   : > { %v4321_v39 = vmax.f32 %v4243_v22, 0.0 }
 0x603   : > { %4354 = vst.msk [vmem:[%s7915_s14 + $0xa8] sm:$0xff] %vm1715_vm3, %v4322_v21 }
 0x604   : > { %4353 = vst.msk [vmem:[%s7915_s14 + $0xa0] sm:$0xff] %vm1715_vm3, %v4321_v39 }
 0x616   : > { %v4826_v56 = vpop.f32.mrb[20].mxu1 }
 0x617   : > { %v4258_v46 = vadd.f32 %v4826_v56, %v7899_v10  ;;  %v4252_v15 = vpop.f32.mrb[21].mxu1 }
 0x618   : > { %v4253_v47 = vadd.f32 %v7899_v10, %v4252_v15 }
 0x619   : > { %v4324_v38 = vmax.f32 %v4258_v46, 0.0 }
 0x61a   : > { %v4323_v26 = vmax.f32 %v4253_v47, 0.0 }
 0x61b   : > { %4356 = vst.msk [vmem:[%s7915_s14 + $0xb8] sm:$0xff] %vm1715_vm3, %v4324_v38  ;;  %v4376_v35 = vmax.f32 %v4322_v21, %v4324_v38 }
 0x61c   : > { %4355 = vst.msk [vmem:[%s7915_s14 + $0xb0] sm:$0xff] %vm1715_vm3, %v4323_v26  ;;  %v4375_v61 = vmax.f32 %v4321_v39, %v4323_v26 }
 0x61d   : > { %4392 = vst.msk [vmem:[#allocation4 + $0x58] sm:$0xff] %vm1715_vm3, %v4376_v35 }
 0x61e   : > { %4391 = vst.msk [vmem:[#allocation4 + $0x50] sm:$0xff] %vm1715_vm3, %v4375_v61 }
 0x625   : > { %v4407_v41 = vld [vmem:[#allocation4 + $0x50] ss:$2 sm:$0xff]  ;;  %v4423_v3 = vld [vmem:[#allocation4 + $0x51] ss:$2 sm:$0xff] }
 0x626   : > { %v4433_v31 = vmax.f32 %v4407_v41, %v4423_v3 }
 0x628   : > { %4441 = vst.msk [vmem:[%s8013_s16 + $0x28] sm:$0xff] %vm1715_vm3, %v4433_v31 }
 0x62e   : > { %v4829_v63 = vpop.f32.mrb[22].mxu1 }
 0x62f   : > { %v4268_v17 = vadd.f32 %v4829_v63, %v7899_v10  ;;  %v4262_v33 = vpop.f32.mrb[23].mxu1 }
 0x630   : > { %v4263_v44 = vadd.f32 %v7899_v10, %v4262_v33 }
 0x631   : > { %v4326_v24 = vmax.f32 %v4268_v17, 0.0 }
 0x632   : > { %v4325_v50 = vmax.f32 %v4263_v44, 0.0 }
 0x633   : > { %4358 = vst.msk [vmem:[%s7915_s14 + $0xc8] sm:$0xff] %vm1715_vm3, %v4326_v24 }
 0x634   : > { %4357 = vst.msk [vmem:[%s7915_s14 + $0xc0] sm:$0xff] %vm1715_vm3, %v4325_v50 }
 0x646   : > { %v4832_v5 = vpop.f32.mrb[24].mxu1 }
 0x647   : > { %v4278_v49 = vadd.f32 %v4832_v5, %v7899_v10  ;;  %v4272_v2 = vpop.f32.mrb[25].mxu1 }
 0x648   : > { %v4273_v42 = vadd.f32 %v7899_v10, %v4272_v2 }
 0x649   : > { %v4328_v29 = vmax.f32 %v4278_v49, 0.0 }
 0x64a   : > { %v4327_v40 = vmax.f32 %v4273_v42, 0.0 }
 0x64b   : > { %4360 = vst.msk [vmem:[%s7915_s14 + $0xd8] sm:$0xff] %vm1715_vm3, %v4328_v29  ;;  %v4378_v34 = vmax.f32 %v4326_v24, %v4328_v29 }
 0x64c   : > { %4359 = vst.msk [vmem:[%s7915_s14 + $0xd0] sm:$0xff] %vm1715_vm3, %v4327_v40  ;;  %v4377_v60 = vmax.f32 %v4325_v50, %v4327_v40 }
 0x64d   : > { %4394 = vst.msk [vmem:[#allocation4 + $0x68] sm:$0xff] %vm1715_vm3, %v4378_v34 }
 0x64e   : > { %4393 = vst.msk [vmem:[#allocation4 + $0x60] sm:$0xff] %vm1715_vm3, %v4377_v60 }
 0x655   : > { %v4409_v48 = vld [vmem:[#allocation4 + $0x60] ss:$2 sm:$0xff]  ;;  %v4425_v57 = vld [vmem:[#allocation4 + $0x61] ss:$2 sm:$0xff] }
 0x656   : > { %v4434_v32 = vmax.f32 %v4409_v48, %v4425_v57 }
 0x658   : > { %4442 = vst.msk [vmem:[%s8013_s16 + $0x30] sm:$0xff] %vm1715_vm3, %v4434_v32 }
 0x661   : > { %v4835_v58 = vpop.f32.mrb[26].mxu1 }
 0x662   : > { %v4288_v36 = vadd.f32 %v4835_v58, %v7899_v10  ;;  %v4282_v1 = vpop.f32.mrb[27].mxu1 }
 0x663   : > { %v4283_v27 = vadd.f32 %v7899_v10, %v4282_v1 }
 0x664   : > { %v4330_v25 = vmax.f32 %v4288_v36, 0.0 }
 0x665   : > { %v4329_v7 = vmax.f32 %v4283_v27, 0.0 }
 0x666   : > { %4362 = vst.msk [vmem:[%s7915_s14 + $0xe8] sm:$0xff] %vm1715_vm3, %v4330_v25 }
 0x667   : > { %4361 = vst.msk [vmem:[%s7915_s14 + $0xe0] sm:$0xff] %vm1715_vm3, %v4329_v7 }
 0x67d   : > { %v4838_v16 = vpop.f32.mrb[28].mxu1 }
 0x67e   : > { %v4298_v52 = vadd.f32 %v4838_v16, %v7899_v10  ;;  %v4793_v51 = vpop.f32.mrb[32].mxu0  ;;  %v4292_v28 = vpop.f32.mrb[29].mxu1 }
 0x67f   : > { %v4148_v11 = vadd.f32 %v4793_v51, %v7899_v10  ;;  %v4293_v62 = vadd.f32 %v7899_v10, %v4292_v28  ;;  %v4142_v54 = vpop.f32.mrb[33].mxu0 }
 0x680   : > { %v4332_v14 = vmax.f32 %v4298_v52, 0.0  ;;  %v4143_v9 = vadd.f32 %v7899_v10, %v4142_v54 }
 0x681   : > { %v4302_v37 = vmax.f32 %v4148_v11, 0.0  ;;  %v4331_v53 = vmax.f32 %v4293_v62, 0.0 }
 0x682   : > { %4364 = vst.msk [vmem:[%s7915_s14 + $0xf8] sm:$0xff] %vm1715_vm3, %v4332_v14  ;;  %v4380_v20 = vmax.f32 %v4330_v25, %v4332_v14  ;;  %v4301_v23 = vmax.f32 %v4143_v9, 0.0 }
 0x683   : > { %4334 = vst.msk [vmem:[%s7915_s14 + $0x8] sm:$0xff] %vm1715_vm3, %v4302_v37  ;;  %v4366_v30 = vmax.f32 %v4302_v37, %v4304_v4  ;;  %4363 = vst.msk [vmem:[%s7915_s14 + $0xf0] sm:$0xff] %vm1715_vm3, %v4331_v53  ;;  %v4379_v13 = vmax.f32 %v4329_v7, %v4331_v53 }
 0x684   : > { %4396 = vst.msk [vmem:[#allocation4 + $0x78] sm:$0xff] %vm1715_vm3, %v4380_v20  ;;  %4333 = vst.msk [vmem:[%s7915_s14] sm:$0xff] %vm1715_vm3, %v4301_v23  ;;  %v4365_v10 = vmax.f32 %v4301_v23, %v4303_v55 }
 0x685   : > { %4382 = vst.msk [vmem:[#allocation4 + $0x8] sm:$0xff] %vm1715_vm3, %v4366_v30  ;;  %4395 = vst.msk [vmem:[#allocation4 + $0x70] sm:$0xff] %vm1715_vm3, %v4379_v13 }
 0x686   : > { %4381 = vst.msk [vmem:[#allocation4] sm:$0xff] %vm1715_vm3, %v4365_v10 }
 0x68c   : > { %v4411_v6 = vld [vmem:[#allocation4 + $0x70] ss:$2 sm:$0xff]  ;;  %v4427_v4 = vld [vmem:[#allocation4 + $0x71] ss:$2 sm:$0xff] }
 0x68d   : > { %v4435_v43 = vmax.f32 %v4411_v6, %v4427_v4  ;;  %v4397_v19 = vld [vmem:[#allocation4] ss:$2 sm:$0xff]  ;;  %v4413_v45 = vld [vmem:[#allocation4 + $0x1] ss:$2 sm:$0xff] }
 0x68e   : > { %v4428_v59 = vmax.f32 %v4397_v19, %v4413_v45 }
 0x68f   : > { %4443 = vst.msk [vmem:[%s8013_s16 + $0x38] sm:$0xff] %vm1715_vm3, %v4435_v43 }
 0x690   : > { %4436 = vst.msk [vmem:[%s8013_s16] sm:$0xff] %vm1715_vm3, %v4428_v59 }
 0x691   : > { %4969 = shalt.err (!%p4966_p3)
}
 0x692   : > { %s4970_s13 = scalar_lea.hbm %s8216_s17, 1024  ;;  %s4974_s10 = scalar_lea.hbm %s8274_s6, 2048 }
 0x693   : > { %p4971_p4 = scmp.ne.s32.totalorder %s8216_s17, %s4970_s13  ;;  %p4975_p9 = scmp.lt.u32.totalorder %s8216_s17, %s8274_s6 }
 0x694   : > { %p4976_p10 = scmp.lt.u32.totalorder %s4974_s10, %s4970_s13  ;;  %p4978_p12 = scmp.lt.u32.totalorder %s4970_s13, %s8216_s17 }
 0x695   : > { %p4972_p7 = pnand %p4971_p4, %p5108_p5 }
 0x696   : > { %p4977_p11 = por %p4976_p10, %p4975_p9 }
 0x697   : > { %p4973_p8 = pneg %p4972_p7 }
 0x698   : > { %p4979_p13 = por %p4978_p12, %p4977_p11 }
 0x69a   : > { %p4980_p0 = pnand %p4979_p13, %p4973_p8 }
 0x69c   : > { %4983 = shalt.err (!%p4980_p0)
}
 0x69d   : > { %s5034_s28 = smov 128  }
 0x69e   : > { %4873 = dma.vmem_to_hbm [thread:$0]  (%p5108_p5), %s8218_s20, 1024, %s8216_s17, %s8226_s25, %s5034_s28, %s5034_s28, %s5022_s15  }
 0x69f PF: > { %p4879_p1 = scmp.ge.s32.totalorder %s5018_s24, 2  ;;  %s4489_s29 = sand.u32 1, %s5006_s21  }
 0x6a0   : > { %s4490_s11 = scalar_lea.sflag [#allocation6], %s4489_s29 }
 0x6a1   : > { %p4876_p2 = pnand %p4879_p1, %p5112_p6 }
 0x6a3   : > { %5001 = dma.done.wait (!%p4876_p2), %s4490_s11, 1024  }
 0x6a4   : > { %5003 = vsyncadd (!%p4876_p2), %s4490_s11, 4294966272  ;;  %p17_p3 = scmp.ge.s32.totalorder %s5095_s27, 4   ;;  %s8769_s21 = smov %s5010_s22 }
 0x6a5   : > { %s8770_s22 = smov %s5014_s23  ;;  %s8771_s23 = smov %s5106_s30 }
 0x6a6   : > { %s8772_s24 = smov %s5095_s27  ;;  %19 = sbr.rel (!%p17_p3) target bundleno = 3 (0x3), region = 108 }
 0x6ad   :  { %4495 = vsyncpa [#allocation6], 1 }
 0x6ae   :  { %4497 = vsyncpa [#allocation6 + $0x1], 1 }

</bundles_post_ra>
